<compile_context>
chip_gen: v7x
topology: tpu7x:2x2x1
jax: 0.10.0
libtpu: 0.0.40
codegen_flags: <defaults>
</compile_context>

<pallas_src>
import functools

import jax
import jax.numpy as jnp
from jax.experimental import pallas as pl
from jax.experimental.pallas import tpu as pltpu


HIDDEN_SIZES = (256, 512, 1024, 512, 256)
LANE = 128


def _layer_dims(input_size, output_size):
    dims = (input_size,) + HIDDEN_SIZES + (output_size,)
    return list(zip(dims[:-1], dims[1:]))


# ----------------------------- kernel ----------------------------------------


def fused_mlp_kernel(x_ref, *refs):
    """refs = (w1_q, s1, b1, w2_q, s2, b2, ..., w6_q, s6, b6, o_ref).

    Chains all matmuls on the MXU with fp32 accumulation. Weights are int8
    VMEM-resident tiles, cast to bf16 right before the dot; per-output-channel
    scales are folded into the f32 epilogue (y = dot * s + b), so the dequant
    cost is only a (tm, N) multiply. Inter-layer activations are stored bf16.
    Softmax runs over the padded lane-dense logits; padded columns carry a
    -1e30 bias so exp()==0.
    """
    o_ref = refs[-1]
    wsb = refs[:-1]
    n_layers = len(wsb) // 3

    h = x_ref[...].astype(jnp.bfloat16)
    for i in range(n_layers):
        w_q = wsb[3 * i][...]                     # int8 weight tile (K, N)
        s = wsb[3 * i + 1][...]                   # f32 per-channel scale (1, N)
        b = wsb[3 * i + 2][...]                   # f32 bias (1, N)
        y = jnp.dot(h, w_q.astype(jnp.bfloat16),
                    preferred_element_type=jnp.float32)
        y = y * s + b                             # f32 epilogue (v5e VPU has no bf16)
        if i != n_layers - 1:
            h = jnp.maximum(y, 0.0).astype(jnp.bfloat16)   # bf16 inter-layer acts
        else:
            h = y                                            # keep logits in f32

    # numerically stable softmax over the last (feature) axis
    m = jnp.max(h, axis=-1, keepdims=True)
    e = jnp.exp(h - m)
    denom = jnp.sum(e, axis=-1, keepdims=True)
    o_ref[...] = (e * pl.reciprocal(denom, approx=True)).astype(o_ref.dtype)


# ----------------------------- wrapper ----------------------------------------


def pallas_mlp(x, packed_params, output_size):
    """x: (M, input_size) fp32.
    packed_params: [(W_int8 (in,out), scale_f32 (1,out), bias_f32 (1,out)), ...]
    with the last layer padded out to a multiple of 128 lanes."""
    M, K = x.shape
    n_pad = packed_params[-1][0].shape[1]       # padded output width (>=128)

    # batch tiling: one minimal block if small, else 256-row tiles (fills the
    # 256-wide MXU on v6e/v7x and halves grid-step overhead vs 128).
    if M <= 256:
        tm = -(-M // 8) * 8                     # sublane multiple, single tile
    else:
        tm = 256
    m_pad = -(-M // tm) * tm
    if m_pad != M:
        x = jnp.pad(x, ((0, m_pad - M), (0, 0)))

    in_specs = [pl.BlockSpec((tm, K), lambda i: (i, 0))]
    flat_args = [x]
    for (w_q, s, b) in packed_params:
        kin, kout = w_q.shape
        # Constant block index across the grid -> single-buffer (no 2x VMEM).
        in_specs.append(pl.BlockSpec((kin, kout), lambda i: (0, 0),
                                     pipeline_mode=pl.Buffered(1)))
        in_specs.append(pl.BlockSpec((1, kout), lambda i: (0, 0),
                                     pipeline_mode=pl.Buffered(1)))
        in_specs.append(pl.BlockSpec((1, kout), lambda i: (0, 0),
                                     pipeline_mode=pl.Buffered(1)))
        flat_args += [w_q, s, b]

    out = pl.pallas_call(
        fused_mlp_kernel,
        out_shape=jax.ShapeDtypeStruct((m_pad, n_pad), jnp.float32),
        grid=(m_pad // tm,),
        in_specs=in_specs,
        out_specs=pl.BlockSpec((tm, n_pad), lambda i: (i, 0)),
        compiler_params=pltpu.CompilerParams(
            dimension_semantics=("parallel",),       # shards batch tiles across v7x TCs
            vmem_limit_bytes=32 * 1024 * 1024,       # safe on v5e/v6e/v7x (<= 64 MiB phys)
        ),
    )(*flat_args)

    return out[:M, :output_size]


@functools.partial(jax.jit, static_argnames=("output_size",))
def mlp_forward(x, packed_params, *, output_size):
    return pallas_mlp(x, packed_params, output_size)


# ----------------------------- params -----------------------------------------


def init_mlp_params(key, input_size, output_size):
    """fp32 init mimicking nn.Linear's uniform(-1/sqrt(in), 1/sqrt(in))."""
    params = []
    for (fan_in, fan_out) in _layer_dims(input_size, output_size):
        key, kw, kb = jax.random.split(key, 3)
        bound = 1.0 / jnp.sqrt(float(fan_in))
        w = jax.random.uniform(kw, (fan_in, fan_out), jnp.float32, -bound, bound)
        b = jax.random.uniform(kb, (fan_out,), jnp.float32, -bound, bound)
        params.append((w, b))
    return params


def pack_params(params, output_size):
    """Pad last layer to a lane-dense width, then quantize weights to int8 with
    per-output-channel f32 scales (biases stay f32).

    Padded output columns get bias = -1e30 (f32) so the in-kernel softmax
    assigns them zero probability; their weight columns are zero -> quantize to 0.
    """
    n_pad = max(LANE, pl.cdiv(output_size, LANE) * LANE)
    packed = []
    n_layers = len(params)
    for i, (w, b) in enumerate(params):
        if i == n_layers - 1 and w.shape[1] != n_pad:
            pad = n_pad - w.shape[1]
            w = jnp.pad(w, ((0, 0), (0, pad)))
            b = jnp.concatenate([b, jnp.full((pad,), -1e30, jnp.float32)])
        amax = jnp.max(jnp.abs(w), axis=0)                    # (out,)
        scale = jnp.where(amax > 0, amax / 127.0, 1.0)        # avoid /0 on padded cols
        w_q = jnp.clip(jnp.round(w / scale), -127, 127).astype(jnp.int8)
        packed.append((w_q,
                       scale.reshape(1, -1).astype(jnp.float32),
                       b.reshape(1, -1).astype(jnp.float32)))
    return packed


# ----------------------------- main --------------------------------------------


if __name__ == "__main__":
    input_size = 32
    output_size = 16
    batch = 8

    key = jax.random.PRNGKey(0)
    kx, kp = jax.random.split(key)
    x = jax.random.normal(kx, (batch, input_size), jnp.float32)

    params = init_mlp_params(kp, input_size, output_size)
    packed = pack_params(params, output_size)

    out = mlp_forward(x, packed, output_size=output_size)
    out = jax.block_until_ready(out)

    # pure-JAX reference with the SAME numerics (int8 weights dequantized via
    # per-channel scales, bf16 activations, f32 accumulation/epilogue).
    h = x.astype(jnp.bfloat16)
    for i, (w_q, s, b) in enumerate(packed):
        y = jnp.dot(h, w_q.astype(jnp.bfloat16),
                    preferred_element_type=jnp.float32) * s + b
        h = jnp.maximum(y, 0.0).astype(jnp.bfloat16) if i != len(packed) - 1 else y
    ref = jax.nn.softmax(h, axis=-1)[:, :output_size]

    assert out.shape == (batch, output_size)
    assert jnp.allclose(out, ref, atol=2e-2, rtol=2e-2)
    assert jnp.allclose(jnp.sum(out, axis=-1), 1.0, atol=1e-2)

    print("KERNEL_OK")
</pallas_src>

<mosaic_0001>
module attributes {stable_mosaic.version = 11 : i64} {
  func.func @fused_mlp_kernel(%arg0: i32, %arg1: memref<8x32xf32, #tpu.memory_space<vmem>>, %arg2: memref<32x256xi8, #tpu.memory_space<vmem>>, %arg3: memref<1x256xf32, #tpu.memory_space<vmem>>, %arg4: memref<1x256xf32, #tpu.memory_space<vmem>>, %arg5: memref<256x512xi8, #tpu.memory_space<vmem>>, %arg6: memref<1x512xf32, #tpu.memory_space<vmem>>, %arg7: memref<1x512xf32, #tpu.memory_space<vmem>>, %arg8: memref<512x1024xi8, #tpu.memory_space<vmem>>, %arg9: memref<1x1024xf32, #tpu.memory_space<vmem>>, %arg10: memref<1x1024xf32, #tpu.memory_space<vmem>>, %arg11: memref<1024x512xi8, #tpu.memory_space<vmem>>, %arg12: memref<1x512xf32, #tpu.memory_space<vmem>>, %arg13: memref<1x512xf32, #tpu.memory_space<vmem>>, %arg14: memref<512x256xi8, #tpu.memory_space<vmem>>, %arg15: memref<1x256xf32, #tpu.memory_space<vmem>>, %arg16: memref<1x256xf32, #tpu.memory_space<vmem>>, %arg17: memref<256x128xi8, #tpu.memory_space<vmem>>, %arg18: memref<1x128xf32, #tpu.memory_space<vmem>>, %arg19: memref<1x128xf32, #tpu.memory_space<vmem>>, %arg20: memref<8x128xf32, #tpu.memory_space<vmem>>) attributes {dimension_semantics = [#tpu.dimension_semantics<parallel>], iteration_bounds = array<i64: 1>, scalar_prefetch = 0 : i64, scratch_operands = 0 : i64, tpu.core_type = #tpu.core_type<tc>, window_params = [{transform_indices = @transform_0, window_bounds = array<i64: 8, 32>}, {pipeline_mode = #tpu.pipeline_mode<synchronous>, transform_indices = @transform_1, window_bounds = array<i64: 32, 256>}, {pipeline_mode = #tpu.pipeline_mode<synchronous>, transform_indices = @transform_2, window_bounds = array<i64: 1, 256>}, {pipeline_mode = #tpu.pipeline_mode<synchronous>, transform_indices = @transform_3, window_bounds = array<i64: 1, 256>}, {pipeline_mode = #tpu.pipeline_mode<synchronous>, transform_indices = @transform_4, window_bounds = array<i64: 256, 512>}, {pipeline_mode = #tpu.pipeline_mode<synchronous>, transform_indices = @transform_5, window_bounds = array<i64: 1, 512>}, {pipeline_mode = #tpu.pipeline_mode<synchronous>, transform_indices = @transform_6, window_bounds = array<i64: 1, 512>}, {pipeline_mode = #tpu.pipeline_mode<synchronous>, transform_indices = @transform_7, window_bounds = array<i64: 512, 1024>}, {pipeline_mode = #tpu.pipeline_mode<synchronous>, transform_indices = @transform_8, window_bounds = array<i64: 1, 1024>}, {pipeline_mode = #tpu.pipeline_mode<synchronous>, transform_indices = @transform_9, window_bounds = array<i64: 1, 1024>}, {pipeline_mode = #tpu.pipeline_mode<synchronous>, transform_indices = @transform_10, window_bounds = array<i64: 1024, 512>}, {pipeline_mode = #tpu.pipeline_mode<synchronous>, transform_indices = @transform_11, window_bounds = array<i64: 1, 512>}, {pipeline_mode = #tpu.pipeline_mode<synchronous>, transform_indices = @transform_12, window_bounds = array<i64: 1, 512>}, {pipeline_mode = #tpu.pipeline_mode<synchronous>, transform_indices = @transform_13, window_bounds = array<i64: 512, 256>}, {pipeline_mode = #tpu.pipeline_mode<synchronous>, transform_indices = @transform_14, window_bounds = array<i64: 1, 256>}, {pipeline_mode = #tpu.pipeline_mode<synchronous>, transform_indices = @transform_15, window_bounds = array<i64: 1, 256>}, {pipeline_mode = #tpu.pipeline_mode<synchronous>, transform_indices = @transform_16, window_bounds = array<i64: 256, 128>}, {pipeline_mode = #tpu.pipeline_mode<synchronous>, transform_indices = @transform_17, window_bounds = array<i64: 1, 128>}, {pipeline_mode = #tpu.pipeline_mode<synchronous>, transform_indices = @transform_18, window_bounds = array<i64: 1, 128>}, {transform_indices = @transform_19, window_bounds = array<i64: 8, 128>}]} {
    %c0 = arith.constant 0 : index
    %c0_0 = arith.constant 0 : index
    %0 = vector.load %arg1[%c0, %c0_0] : memref<8x32xf32, #tpu.memory_space<vmem>>, vector<8x32xf32>
    %1 = arith.truncf %0 : vector<8x32xf32> to vector<8x32xbf16>
    %c0_1 = arith.constant 0 : index
    %c0_2 = arith.constant 0 : index
    %2 = vector.load %arg2[%c0_1, %c0_2] : memref<32x256xi8, #tpu.memory_space<vmem>>, vector<32x256xi8>
    %c0_3 = arith.constant 0 : index
    %c0_4 = arith.constant 0 : index
    %3 = vector.load %arg3[%c0_3, %c0_4] : memref<1x256xf32, #tpu.memory_space<vmem>>, vector<1x256xf32>
    %c0_5 = arith.constant 0 : index
    %c0_6 = arith.constant 0 : index
    %4 = vector.load %arg4[%c0_5, %c0_6] : memref<1x256xf32, #tpu.memory_space<vmem>>, vector<1x256xf32>
    %5 = arith.sitofp %2 : vector<32x256xi8> to vector<32x256xbf16>
    %cst = arith.constant dense<0.000000e+00> : vector<8x256xf32>
    %6 = tpu.matmul %1, %5, %cst {dimension_numbers = #tpu.dot_dimension_numbers<[1], [0], [0], [1], [0, 0, 1, 1], [], []>} : vector<8x32xbf16>, vector<32x256xbf16>, vector<8x256xf32> -> vector<8x256xf32>
    %7 = vector.broadcast %3 : vector<1x256xf32> to vector<8x256xf32>
    %8 = arith.mulf %6, %7 : vector<8x256xf32>
    %9 = vector.broadcast %4 : vector<1x256xf32> to vector<8x256xf32>
    %10 = arith.addf %8, %9 : vector<8x256xf32>
    %cst_7 = arith.constant 0.000000e+00 : f32
    %11 = vector.broadcast %cst_7 : f32 to vector<8x256xf32>
    %12 = arith.maximumf %10, %11 : vector<8x256xf32>
    %13 = arith.truncf %12 : vector<8x256xf32> to vector<8x256xbf16>
    %c0_8 = arith.constant 0 : index
    %c0_9 = arith.constant 0 : index
    %14 = vector.load %arg5[%c0_8, %c0_9] : memref<256x512xi8, #tpu.memory_space<vmem>>, vector<256x512xi8>
    %c0_10 = arith.constant 0 : index
    %c0_11 = arith.constant 0 : index
    %15 = vector.load %arg6[%c0_10, %c0_11] : memref<1x512xf32, #tpu.memory_space<vmem>>, vector<1x512xf32>
    %c0_12 = arith.constant 0 : index
    %c0_13 = arith.constant 0 : index
    %16 = vector.load %arg7[%c0_12, %c0_13] : memref<1x512xf32, #tpu.memory_space<vmem>>, vector<1x512xf32>
    %17 = arith.sitofp %14 : vector<256x512xi8> to vector<256x512xbf16>
    %cst_14 = arith.constant dense<0.000000e+00> : vector<8x512xf32>
    %18 = tpu.matmul %13, %17, %cst_14 {dimension_numbers = #tpu.dot_dimension_numbers<[1], [0], [0], [1], [0, 0, 1, 1], [], []>} : vector<8x256xbf16>, vector<256x512xbf16>, vector<8x512xf32> -> vector<8x512xf32>
    %19 = vector.broadcast %15 : vector<1x512xf32> to vector<8x512xf32>
    %20 = arith.mulf %18, %19 : vector<8x512xf32>
    %21 = vector.broadcast %16 : vector<1x512xf32> to vector<8x512xf32>
    %22 = arith.addf %20, %21 : vector<8x512xf32>
    %cst_15 = arith.constant 0.000000e+00 : f32
    %23 = vector.broadcast %cst_15 : f32 to vector<8x512xf32>
    %24 = arith.maximumf %22, %23 : vector<8x512xf32>
    %25 = arith.truncf %24 : vector<8x512xf32> to vector<8x512xbf16>
    %c0_16 = arith.constant 0 : index
    %c0_17 = arith.constant 0 : index
    %26 = vector.load %arg8[%c0_16, %c0_17] : memref<512x1024xi8, #tpu.memory_space<vmem>>, vector<512x1024xi8>
    %c0_18 = arith.constant 0 : index
    %c0_19 = arith.constant 0 : index
    %27 = vector.load %arg9[%c0_18, %c0_19] : memref<1x1024xf32, #tpu.memory_space<vmem>>, vector<1x1024xf32>
    %c0_20 = arith.constant 0 : index
    %c0_21 = arith.constant 0 : index
    %28 = vector.load %arg10[%c0_20, %c0_21] : memref<1x1024xf32, #tpu.memory_space<vmem>>, vector<1x1024xf32>
    %29 = arith.sitofp %26 : vector<512x1024xi8> to vector<512x1024xbf16>
    %cst_22 = arith.constant dense<0.000000e+00> : vector<8x1024xf32>
    %30 = tpu.matmul %25, %29, %cst_22 {dimension_numbers = #tpu.dot_dimension_numbers<[1], [0], [0], [1], [0, 0, 1, 1], [], []>} : vector<8x512xbf16>, vector<512x1024xbf16>, vector<8x1024xf32> -> vector<8x1024xf32>
    %31 = vector.broadcast %27 : vector<1x1024xf32> to vector<8x1024xf32>
    %32 = arith.mulf %30, %31 : vector<8x1024xf32>
    %33 = vector.broadcast %28 : vector<1x1024xf32> to vector<8x1024xf32>
    %34 = arith.addf %32, %33 : vector<8x1024xf32>
    %cst_23 = arith.constant 0.000000e+00 : f32
    %35 = vector.broadcast %cst_23 : f32 to vector<8x1024xf32>
    %36 = arith.maximumf %34, %35 : vector<8x1024xf32>
    %37 = arith.truncf %36 : vector<8x1024xf32> to vector<8x1024xbf16>
    %c0_24 = arith.constant 0 : index
    %c0_25 = arith.constant 0 : index
    %38 = vector.load %arg11[%c0_24, %c0_25] : memref<1024x512xi8, #tpu.memory_space<vmem>>, vector<1024x512xi8>
    %c0_26 = arith.constant 0 : index
    %c0_27 = arith.constant 0 : index
    %39 = vector.load %arg12[%c0_26, %c0_27] : memref<1x512xf32, #tpu.memory_space<vmem>>, vector<1x512xf32>
    %c0_28 = arith.constant 0 : index
    %c0_29 = arith.constant 0 : index
    %40 = vector.load %arg13[%c0_28, %c0_29] : memref<1x512xf32, #tpu.memory_space<vmem>>, vector<1x512xf32>
    %41 = arith.sitofp %38 : vector<1024x512xi8> to vector<1024x512xbf16>
    %cst_30 = arith.constant dense<0.000000e+00> : vector<8x512xf32>
    %42 = tpu.matmul %37, %41, %cst_30 {dimension_numbers = #tpu.dot_dimension_numbers<[1], [0], [0], [1], [0, 0, 1, 1], [], []>} : vector<8x1024xbf16>, vector<1024x512xbf16>, vector<8x512xf32> -> vector<8x512xf32>
    %43 = vector.broadcast %39 : vector<1x512xf32> to vector<8x512xf32>
    %44 = arith.mulf %42, %43 : vector<8x512xf32>
    %45 = vector.broadcast %40 : vector<1x512xf32> to vector<8x512xf32>
    %46 = arith.addf %44, %45 : vector<8x512xf32>
    %cst_31 = arith.constant 0.000000e+00 : f32
    %47 = vector.broadcast %cst_31 : f32 to vector<8x512xf32>
    %48 = arith.maximumf %46, %47 : vector<8x512xf32>
    %49 = arith.truncf %48 : vector<8x512xf32> to vector<8x512xbf16>
    %c0_32 = arith.constant 0 : index
    %c0_33 = arith.constant 0 : index
    %50 = vector.load %arg14[%c0_32, %c0_33] : memref<512x256xi8, #tpu.memory_space<vmem>>, vector<512x256xi8>
    %c0_34 = arith.constant 0 : index
    %c0_35 = arith.constant 0 : index
    %51 = vector.load %arg15[%c0_34, %c0_35] : memref<1x256xf32, #tpu.memory_space<vmem>>, vector<1x256xf32>
    %c0_36 = arith.constant 0 : index
    %c0_37 = arith.constant 0 : index
    %52 = vector.load %arg16[%c0_36, %c0_37] : memref<1x256xf32, #tpu.memory_space<vmem>>, vector<1x256xf32>
    %53 = arith.sitofp %50 : vector<512x256xi8> to vector<512x256xbf16>
    %cst_38 = arith.constant dense<0.000000e+00> : vector<8x256xf32>
    %54 = tpu.matmul %49, %53, %cst_38 {dimension_numbers = #tpu.dot_dimension_numbers<[1], [0], [0], [1], [0, 0, 1, 1], [], []>} : vector<8x512xbf16>, vector<512x256xbf16>, vector<8x256xf32> -> vector<8x256xf32>
    %55 = vector.broadcast %51 : vector<1x256xf32> to vector<8x256xf32>
    %56 = arith.mulf %54, %55 : vector<8x256xf32>
    %57 = vector.broadcast %52 : vector<1x256xf32> to vector<8x256xf32>
    %58 = arith.addf %56, %57 : vector<8x256xf32>
    %cst_39 = arith.constant 0.000000e+00 : f32
    %59 = vector.broadcast %cst_39 : f32 to vector<8x256xf32>
    %60 = arith.maximumf %58, %59 : vector<8x256xf32>
    %61 = arith.truncf %60 : vector<8x256xf32> to vector<8x256xbf16>
    %c0_40 = arith.constant 0 : index
    %c0_41 = arith.constant 0 : index
    %62 = vector.load %arg17[%c0_40, %c0_41] : memref<256x128xi8, #tpu.memory_space<vmem>>, vector<256x128xi8>
    %c0_42 = arith.constant 0 : index
    %c0_43 = arith.constant 0 : index
    %63 = vector.load %arg18[%c0_42, %c0_43] : memref<1x128xf32, #tpu.memory_space<vmem>>, vector<1x128xf32>
    %c0_44 = arith.constant 0 : index
    %c0_45 = arith.constant 0 : index
    %64 = vector.load %arg19[%c0_44, %c0_45] : memref<1x128xf32, #tpu.memory_space<vmem>>, vector<1x128xf32>
    %65 = arith.sitofp %62 : vector<256x128xi8> to vector<256x128xbf16>
    %cst_46 = arith.constant dense<0.000000e+00> : vector<8x128xf32>
    %66 = tpu.matmul %61, %65, %cst_46 {dimension_numbers = #tpu.dot_dimension_numbers<[1], [0], [0], [1], [0, 0, 1, 1], [], []>} : vector<8x256xbf16>, vector<256x128xbf16>, vector<8x128xf32> -> vector<8x128xf32>
    %67 = vector.broadcast %63 : vector<1x128xf32> to vector<8x128xf32>
    %68 = arith.mulf %66, %67 : vector<8x128xf32>
    %69 = vector.broadcast %64 : vector<1x128xf32> to vector<8x128xf32>
    %70 = arith.addf %68, %69 : vector<8x128xf32>
    %cst_47 = arith.constant dense<0xFF800000> : vector<8xf32>
    %71 = vector.multi_reduction <maximumf>, %70, %cst_47 [1] : vector<8x128xf32> to vector<8xf32>
    %72 = vector.shape_cast %71 : vector<8xf32> to vector<8x1xf32>
    %73 = vector.broadcast %72 : vector<8x1xf32> to vector<8x128xf32>
    %74 = arith.subf %70, %73 : vector<8x128xf32>
    %75 = math.exp %74 : vector<8x128xf32>
    %cst_48 = arith.constant dense<0.000000e+00> : vector<8xf32>
    %76 = vector.multi_reduction <add>, %75, %cst_48 [1] : vector<8x128xf32> to vector<8xf32>
    %77 = vector.shape_cast %76 : vector<8xf32> to vector<8x1xf32>
    %78 = tpu.reciprocal %77 {approx = true} : vector<8x1xf32> -> vector<8x1xf32>
    %79 = vector.broadcast %78 : vector<8x1xf32> to vector<8x128xf32>
    %80 = arith.mulf %75, %79 : vector<8x128xf32>
    %c0_49 = arith.constant 0 : index
    %c0_50 = arith.constant 0 : index
    %81 = vector.load %arg20[%c0_49, %c0_50] : memref<8x128xf32, #tpu.memory_space<vmem>>, vector<8x128xf32>
    tpu.vector_store %arg20[%c0_49, %c0_50], %80 {strides = array<i32>} : memref<8x128xf32, #tpu.memory_space<vmem>>, vector<8x128xf32>,
    return
  }
  func.func @transform_0(%arg0: i32) -> (i32, i32) {
    %c0_i32 = arith.constant 0 : i32
    %c0_i32_0 = arith.constant 0 : i32
    return %arg0, %c0_i32 : i32, i32
  }
  func.func @transform_1(%arg0: i32) -> (i32, i32) {
    %c0_i32 = arith.constant 0 : i32
    %c0_i32_0 = arith.constant 0 : i32
    %c0_i32_1 = arith.constant 0 : i32
    return %c0_i32, %c0_i32_0 : i32, i32
  }
  func.func @transform_2(%arg0: i32) -> (i32, i32) {
    %c0_i32 = arith.constant 0 : i32
    %c0_i32_0 = arith.constant 0 : i32
    %c0_i32_1 = arith.constant 0 : i32
    return %c0_i32, %c0_i32_0 : i32, i32
  }
  func.func @transform_3(%arg0: i32) -> (i32, i32) {
    %c0_i32 = arith.constant 0 : i32
    %c0_i32_0 = arith.constant 0 : i32
    %c0_i32_1 = arith.constant 0 : i32
    return %c0_i32, %c0_i32_0 : i32, i32
  }
  func.func @transform_4(%arg0: i32) -> (i32, i32) {
    %c0_i32 = arith.constant 0 : i32
    %c0_i32_0 = arith.constant 0 : i32
    %c0_i32_1 = arith.constant 0 : i32
    return %c0_i32, %c0_i32_0 : i32, i32
  }
  func.func @transform_5(%arg0: i32) -> (i32, i32) {
    %c0_i32 = arith.constant 0 : i32
    %c0_i32_0 = arith.constant 0 : i32
    %c0_i32_1 = arith.constant 0 : i32
    return %c0_i32, %c0_i32_0 : i32, i32
  }
  func.func @transform_6(%arg0: i32) -> (i32, i32) {
    %c0_i32 = arith.constant 0 : i32
    %c0_i32_0 = arith.constant 0 : i32
    %c0_i32_1 = arith.constant 0 : i32
    return %c0_i32, %c0_i32_0 : i32, i32
  }
  func.func @transform_7(%arg0: i32) -> (i32, i32) {
    %c0_i32 = arith.constant 0 : i32
    %c0_i32_0 = arith.constant 0 : i32
    %c0_i32_1 = arith.constant 0 : i32
    return %c0_i32, %c0_i32_0 : i32, i32
  }
  func.func @transform_8(%arg0: i32) -> (i32, i32) {
    %c0_i32 = arith.constant 0 : i32
    %c0_i32_0 = arith.constant 0 : i32
    %c0_i32_1 = arith.constant 0 : i32
    return %c0_i32, %c0_i32_0 : i32, i32
  }
  func.func @transform_9(%arg0: i32) -> (i32, i32) {
    %c0_i32 = arith.constant 0 : i32
    %c0_i32_0 = arith.constant 0 : i32
    %c0_i32_1 = arith.constant 0 : i32
    return %c0_i32, %c0_i32_0 : i32, i32
  }
  func.func @transform_10(%arg0: i32) -> (i32, i32) {
    %c0_i32 = arith.constant 0 : i32
    %c0_i32_0 = arith.constant 0 : i32
    %c0_i32_1 = arith.constant 0 : i32
    return %c0_i32, %c0_i32_0 : i32, i32
  }
  func.func @transform_11(%arg0: i32) -> (i32, i32) {
    %c0_i32 = arith.constant 0 : i32
    %c0_i32_0 = arith.constant 0 : i32
    %c0_i32_1 = arith.constant 0 : i32
    return %c0_i32, %c0_i32_0 : i32, i32
  }
  func.func @transform_12(%arg0: i32) -> (i32, i32) {
    %c0_i32 = arith.constant 0 : i32
    %c0_i32_0 = arith.constant 0 : i32
    %c0_i32_1 = arith.constant 0 : i32
    return %c0_i32, %c0_i32_0 : i32, i32
  }
  func.func @transform_13(%arg0: i32) -> (i32, i32) {
    %c0_i32 = arith.constant 0 : i32
    %c0_i32_0 = arith.constant 0 : i32
    %c0_i32_1 = arith.constant 0 : i32
    return %c0_i32, %c0_i32_0 : i32, i32
  }
  func.func @transform_14(%arg0: i32) -> (i32, i32) {
    %c0_i32 = arith.constant 0 : i32
    %c0_i32_0 = arith.constant 0 : i32
    %c0_i32_1 = arith.constant 0 : i32
    return %c0_i32, %c0_i32_0 : i32, i32
  }
  func.func @transform_15(%arg0: i32) -> (i32, i32) {
    %c0_i32 = arith.constant 0 : i32
    %c0_i32_0 = arith.constant 0 : i32
    %c0_i32_1 = arith.constant 0 : i32
    return %c0_i32, %c0_i32_0 : i32, i32
  }
  func.func @transform_16(%arg0: i32) -> (i32, i32) {
    %c0_i32 = arith.constant 0 : i32
    %c0_i32_0 = arith.constant 0 : i32
    %c0_i32_1 = arith.constant 0 : i32
    return %c0_i32, %c0_i32_0 : i32, i32
  }
  func.func @transform_17(%arg0: i32) -> (i32, i32) {
    %c0_i32 = arith.constant 0 : i32
    %c0_i32_0 = arith.constant 0 : i32
    %c0_i32_1 = arith.constant 0 : i32
    return %c0_i32, %c0_i32_0 : i32, i32
  }
  func.func @transform_18(%arg0: i32) -> (i32, i32) {
    %c0_i32 = arith.constant 0 : i32
    %c0_i32_0 = arith.constant 0 : i32
    %c0_i32_1 = arith.constant 0 : i32
    return %c0_i32, %c0_i32_0 : i32, i32
  }
  func.func @transform_19(%arg0: i32) -> (i32, i32) {
    %c0_i32 = arith.constant 0 : i32
    %c0_i32_0 = arith.constant 0 : i32
    return %arg0, %c0_i32 : i32, i32
  }
}

</mosaic_0001>

<bundles_post_ra>
// kernel: mlp_forward.1
= control target key start
LH: loop header
LB: loop body
LE: loop exit
PB: predicated region body
PF: predicated region fallthrough
CT: control target
= control target key end

     0   :  { %s3182_s0 = inlined_call_operand.hbm [shape: f32[8,32], index: 0, kind: input, shape index: {}]   ;;  %s3183_s1 = inlined_call_operand.hbm [shape: s8[32,256], index: 1, kind: input, shape index: {}]   ;;  %s3184_s2 = inlined_call_operand.vmem [shape: f32[1,256], index: 2, kind: input, shape index: {}]   ;;  %s3185_s3 = inlined_call_operand.hbm [shape: f32[1,256], index: 3, kind: input, shape index: {}]   ;;  %s3186_s4 = inlined_call_operand.hbm [shape: s8[256,512], index: 4, kind: input, shape index: {}]   ;;  %s3187_s5 = inlined_call_operand.hbm [shape: f32[1,512], index: 5, kind: input, shape index: {}]   ;;  %s3188_s6 = inlined_call_operand.vmem [shape: f32[1,512], index: 6, kind: input, shape index: {}]   ;;  %s3189_s7 = inlined_call_operand.hbm [shape: s8[512,1024], index: 7, kind: input, shape index: {}]   ;;  %s3190_s8 = inlined_call_operand.vmem [shape: f32[1,1024], index: 8, kind: input, shape index: {}]   ;;  %s3191_s9 = inlined_call_operand.vmem [shape: f32[1,1024], index: 9, kind: input, shape index: {}]   ;;  %s3192_s10 = inlined_call_operand.hbm [shape: s8[1024,512], index: 10, kind: input, shape index: {}]   ;;  %s3193_s11 = inlined_call_operand.vmem [shape: f32[1,512], index: 11, kind: input, shape index: {}]   ;;  %s3194_s12 = inlined_call_operand.vmem [shape: f32[1,512], index: 12, kind: input, shape index: {}]   ;;  %s3195_s13 = inlined_call_operand.hbm [shape: s8[512,256], index: 13, kind: input, shape index: {}]   ;;  %s3196_s14 = inlined_call_operand.vmem [shape: f32[1,256], index: 14, kind: input, shape index: {}]   ;;  %s3197_s15 = inlined_call_operand.vmem [shape: f32[1,256], index: 15, kind: input, shape index: {}]   ;;  %s3198_s16 = inlined_call_operand.hbm [shape: s8[256,128], index: 16, kind: input, shape index: {}]   ;;  %s3199_s17 = inlined_call_operand.vmem [shape: f32[1,128], index: 17, kind: input, shape index: {}]   ;;  %s3200_s18 = inlined_call_operand.vmem [shape: f32[1,128], index: 18, kind: input, shape index: {}]   ;;  %s3201_s19 = inlined_call_operand.hbm [shape: f32[8,128], index: 19, kind: output, shape index: {}]  }
   0x1   :  { %3207 = sst [smem:[#allocation24_spill]] %s3182_s0 }
   0x2   :  { %3208 = sst [smem:[#allocation25_spill]] %s3183_s1 }
   0x3   :  { %3209 = sst [smem:[#allocation26_spill]] %s3184_s2 }
   0x4   :  { %3210 = sst [smem:[#allocation27_spill]] %s3185_s3 }
   0x5   :  { %24 = vsyncpa [#allocation3], 0 }
   0x6   :  { %25 = vsyncpa [#allocation6], 0 }
   0x7   :  { %26 = vsyncpa [#allocation9], 0 }
   0x8   :  { %27 = vsyncpa [#allocation12], 0 }
   0x9   :  { %28 = vsyncpa [#allocation15], 0 }
   0xa   :  { %29 = vsyncpa [#allocation4], 0  ;;  %s2746_s0 = smov [#allocation5]   ;;  %s2747_s20 = smov [#allocation8]  }
   0xb   :  { %s46_s30 = sshll.u32 %s2746_s0, 4  ;;  %s67_s21 = sshll.u32 %s2747_s20, 4  ;;  %s47_s30 = int_to_ptr.vmem [resolvable:$true] %s46_s30  ;;  %s2865_s21 = int_to_ptr.vmem [resolvable:$true] %s67_s21 }
   0xc   :  { %s3211_s2 = sld [smem:[#allocation25_spill]] }
  0x12   :  { %s2514_s23 = scalar_lea.hbm %s3211_s2, 256 }
  0x13   :  { %p2515_p0 = scmp.ne.s32.totalorder %s3211_s2, %s2514_s23  ;;  %p2518_p1 = scmp.lt.u32.totalorder %s2514_s23, %s3211_s2 }
  0x15   :  { %p2520_p2 = pnand %p2518_p1, %p2515_p0 }
  0x17   :  { %2523 = shalt.err (!%p2520_p2)
}
  0x18   :  { %s2524_s27 = scalar_lea.vmem %s47_s30, 256  ;;  %p2529_p4 = scmp.lt.s32.totalorder %s47_s30, %s47_s30 }
  0x19   :  { %p2525_p3 = scmp.ne.s32.totalorder %s47_s30, %s2524_s27  ;;  %p2530_p5 = scmp.lt.s32.totalorder %s2524_s27, %s2524_s27 }
  0x1b   :  { %p2531_p6 = por %p2530_p5, %p2529_p4 }
  0x1d   :  { %p2532_p7 = pnand %p2531_p6, %p2525_p3 }
  0x1f   :  { %2535 = shalt.err (!%p2532_p7)
}
  0x20   :  { %49 = dma.hbm_to_vmem [thread:$0]  %s3211_s2, 256, %s47_s30, [#allocation6]  }
  0x21   :  { %s2536_s1 = scalar_lea.hbm %s3186_s4, 4096 }
  0x22   :  { %p2537_p8 = scmp.ne.s32.totalorder %s3186_s4, %s2536_s1  ;;  %p2540_p9 = scmp.lt.u32.totalorder %s2536_s1, %s3186_s4 }
  0x24   :  { %p2542_p10 = pnand %p2540_p9, %p2537_p8 }
  0x26   :  { %2545 = shalt.err (!%p2542_p10)
}
  0x27   :  { %s2546_s3 = scalar_lea.vmem %s2865_s21, 4096  ;;  %p2551_p12 = scmp.lt.s32.totalorder %s2865_s21, %s2865_s21 }
  0x28   :  { %p2547_p11 = scmp.ne.s32.totalorder %s2865_s21, %s2546_s3  ;;  %p2552_p13 = scmp.lt.s32.totalorder %s2546_s3, %s2546_s3 }
  0x2a   :  { %p2553_p0 = por %p2552_p13, %p2551_p12 }
  0x2c   :  { %p2554_p1 = pnand %p2553_p0, %p2547_p11 }
  0x2e   :  { %2557 = shalt.err (!%p2554_p1)
}
  0x2f   :  { %s3205_s30 = smov 512   ;;  %s3206_s2 = smov 32  }
  0x30   :  { %73 = dma.hbm_to_vmem [thread:$0]  %s3186_s4, 4096, %s2865_s21, [#allocation9], %s3205_s30, %s3205_s30, %s3206_s2  }
  0x31   :  { %s2750_s28 = smov [#allocation11]   ;;  %s2558_s1 = scalar_lea.hbm %s3189_s7, 16384 }
  0x32   :  { %s91_s29 = sshll.u32 %s2750_s28, 4  ;;  %p2559_p2 = scmp.ne.s32.totalorder %s3189_s7, %s2558_s1  ;;  %s92_s29 = int_to_ptr.vmem [resolvable:$true] %s91_s29 }
  0x33   :  { %p2562_p3 = scmp.lt.u32.totalorder %s2558_s1, %s3189_s7 }
  0x35   :  { %p2564_p4 = pnand %p2562_p3, %p2559_p2 }
  0x37   :  { %2567 = shalt.err (!%p2564_p4)
}
  0x38   :  { %s2568_s3 = scalar_lea.vmem %s92_s29, 16384  ;;  %p2573_p6 = scmp.lt.s32.totalorder %s92_s29, %s92_s29 }
  0x39   :  { %p2569_p5 = scmp.ne.s32.totalorder %s92_s29, %s2568_s3  ;;  %p2574_p7 = scmp.lt.s32.totalorder %s2568_s3, %s2568_s3 }
  0x3b   :  { %p2575_p8 = por %p2574_p7, %p2573_p6 }
  0x3d   :  { %p2576_p9 = pnand %p2575_p8, %p2569_p5 }
  0x3f   :  { %2579 = shalt.err (!%p2576_p9)
}
  0x40   :  { %s2751_s4 = smov 1024   ;;  %s2752_s21 = smov 64  }
  0x41   :  { %97 = dma.hbm_to_vmem [thread:$0]  %s3189_s7, 16384, %s92_s29, [#allocation12], %s2751_s4, %s2751_s4, %s2752_s21  }
  0x42   :  { %s2753_s28 = smov [#allocation14]   ;;  %s2580_s22 = scalar_lea.hbm %s3195_s13, 4096 }
  0x43   :  { %s123_s0 = sshll.u32 %s2753_s28, 4  ;;  %p2581_p10 = scmp.ne.s32.totalorder %s3195_s13, %s2580_s22  ;;  %s124_s0 = int_to_ptr.vmem [resolvable:$true] %s123_s0 }
  0x44   :  { %p2584_p11 = scmp.lt.u32.totalorder %s2580_s22, %s3195_s13 }
  0x46   :  { %p2586_p12 = pnand %p2584_p11, %p2581_p10 }
  0x48   :  { %2589 = shalt.err (!%p2586_p12)
}
  0x49   :  { %s2590_s30 = scalar_lea.vmem %s124_s0, 4096  ;;  %p2595_p0 = scmp.lt.s32.totalorder %s124_s0, %s124_s0 }
  0x4a   :  { %p2591_p13 = scmp.ne.s32.totalorder %s124_s0, %s2590_s30  ;;  %p2596_p1 = scmp.lt.s32.totalorder %s2590_s30, %s2590_s30 }
  0x4c   :  { %p2597_p2 = por %p2596_p1, %p2595_p0 }
  0x4e   :  { %p2598_p3 = pnand %p2597_p2, %p2591_p13 }
  0x50   :  { %2601 = shalt.err (!%p2598_p3)
}
  0x51   :  { %s2754_s7 = smov 256   ;;  %s2755_s29 = smov 16  }
  0x52   :  { %129 = dma.hbm_to_vmem [thread:$0]  %s3195_s13, 4096, %s124_s0, [#allocation15], %s2754_s7, %s2754_s7, %s2755_s29  }
  0x53   :  { %s2756_s26 = smov [#allocation2]   ;;  %s2757_s28 = smov [#allocation7]  }
  0x54   :  { %s36_s27 = sshll.u32 %s2756_s26, 4  ;;  %s58_s20 = sshll.u32 %s2757_s28, 4  ;;  %s37_s27 = int_to_ptr.vmem [resolvable:$true] %s36_s27  ;;  %s59_s20 = int_to_ptr.vmem [resolvable:$true] %s58_s20 }
  0x55   :  { %s3212_s24 = sld [smem:[#allocation24_spill]] }
  0x5b   :  { %s2602_s23 = scalar_lea.hbm %s3212_s24, 128 }
  0x5c   :  { %p2603_p4 = scmp.ne.s32.totalorder %s3212_s24, %s2602_s23  ;;  %p2606_p5 = scmp.lt.u32.totalorder %s2602_s23, %s3212_s24 }
  0x5e   :  { %p2608_p6 = pnand %p2606_p5, %p2603_p4 }
  0x60   :  { %2611 = shalt.err (!%p2608_p6)
}
  0x61   :  { %s2612_s13 = scalar_lea.vmem %s37_s27, 128  ;;  %p2617_p8 = scmp.lt.s32.totalorder %s37_s27, %s37_s27 }
  0x62   :  { %p2613_p7 = scmp.ne.s32.totalorder %s37_s27, %s2612_s13  ;;  %p2618_p9 = scmp.lt.s32.totalorder %s2612_s13, %s2612_s13 }
  0x64   :  { %p2619_p10 = por %p2618_p9, %p2617_p8 }
  0x66   :  { %p2620_p11 = pnand %p2619_p10, %p2613_p7 }
  0x68   :  { %2623 = shalt.err (!%p2620_p11)
}
  0x69   :  { %39 = dma.hbm_to_vmem [thread:$0]  %s3212_s24, 128, %s37_s27, [#allocation3]  }
  0x6a   :  { %s3213_s21 = sld [smem:[#allocation27_spill]] }
  0x70   :  { %s2624_s26 = scalar_lea.hbm %s3213_s21, 32 }
  0x71   :  { %p2625_p12 = scmp.ne.s32.totalorder %s3213_s21, %s2624_s26  ;;  %p2628_p13 = scmp.lt.u32.totalorder %s2624_s26, %s3213_s21 }
  0x73   :  { %p2630_p0 = pnand %p2628_p13, %p2625_p12 }
  0x75   :  { %2633 = shalt.err (!%p2630_p0)
}
  0x76   :  { %s2634_s23 = scalar_lea.vmem %s59_s20, 32  ;;  %p2639_p2 = scmp.lt.s32.totalorder %s59_s20, %s59_s20 }
  0x77   :  { %p2635_p1 = scmp.ne.s32.totalorder %s59_s20, %s2634_s23  ;;  %p2640_p3 = scmp.lt.s32.totalorder %s2634_s23, %s2634_s23 }
  0x79   :  { %p2641_p4 = por %p2640_p3, %p2639_p2 }
  0x7b   :  { %p2642_p5 = pnand %p2641_p4, %p2635_p1 }
  0x7d   :  { %2645 = shalt.err (!%p2642_p5)
}
  0x7e   :  { %61 = dma.hbm_to_vmem [thread:$0]  %s3213_s21, 32, %s59_s20, [#allocation6]  }
  0x7f   :  { %s2758_s30 = smov [#allocation10]   ;;  %s2759_s3 = smov [#allocation13]  }
  0x80   :  { %s80_s25 = sshll.u32 %s2758_s30, 4  ;;  %s107_s13 = sshll.u32 %s2759_s3, 4  ;;  %s81_s25 = int_to_ptr.vmem [resolvable:$true] %s80_s25  ;;  %s2947_s13 = int_to_ptr.vmem [resolvable:$true] %s107_s13 }
  0x81   :  { %s2646_s29 = scalar_lea.hbm %s3187_s5, 64 }
  0x82   :  { %p2647_p6 = scmp.ne.s32.totalorder %s3187_s5, %s2646_s29  ;;  %p2650_p7 = scmp.lt.u32.totalorder %s2646_s29, %s3187_s5 }
  0x84   :  { %p2652_p8 = pnand %p2650_p7, %p2647_p6 }
  0x86   :  { %2655 = shalt.err (!%p2652_p8)
}
  0x87   :  { %s2656_s20 = scalar_lea.vmem %s81_s25, 64  ;;  %p2661_p10 = scmp.lt.s32.totalorder %s81_s25, %s81_s25 }
  0x88   :  { %p2657_p9 = scmp.ne.s32.totalorder %s81_s25, %s2656_s20  ;;  %p2662_p11 = scmp.lt.s32.totalorder %s2656_s20, %s2656_s20 }
  0x8a   :  { %p2663_p12 = por %p2662_p11, %p2661_p10 }
  0x8c   :  { %p2664_p13 = pnand %p2663_p12, %p2657_p9 }
  0x8e   :  { %2667 = shalt.err (!%p2664_p13)
}
  0x8f   :  { %83 = dma.hbm_to_vmem [thread:$0]  %s3187_s5, 64, %s81_s25, [#allocation9]  }
  0x90   :  { %s2668_s27 = scalar_lea.hbm %s3192_s10, 16384 }
  0x91   :  { %p2669_p0 = scmp.ne.s32.totalorder %s3192_s10, %s2668_s27  ;;  %p2672_p1 = scmp.lt.u32.totalorder %s2668_s27, %s3192_s10 }
  0x93   :  { %p2674_p2 = pnand %p2672_p1, %p2669_p0 }
  0x95   :  { %2677 = shalt.err (!%p2674_p2)
}
  0x96   :  { %s2678_s7 = scalar_lea.vmem %s2947_s13, 16384  ;;  %p2683_p4 = scmp.lt.s32.totalorder %s2947_s13, %s2947_s13 }
  0x97   :  { %p2679_p3 = scmp.ne.s32.totalorder %s2947_s13, %s2678_s7  ;;  %p2684_p5 = scmp.lt.s32.totalorder %s2678_s7, %s2678_s7 }
  0x99   :  { %p2685_p6 = por %p2684_p5, %p2683_p4 }
  0x9b   :  { %p2686_p7 = pnand %p2685_p6, %p2679_p3 }
  0x9d   :  { %2689 = shalt.err (!%p2686_p7)
}
  0x9e   :  { %s3214_s5 = smov 32   ;;  %s3215_s25 = smov 512  }
  0x9f   :  { %113 = dma.hbm_to_vmem [thread:$0]  %s3192_s10, 16384, %s2947_s13, [#allocation12], %s3215_s25, %s3215_s25, %s3214_s5  }
  0xa0   :  { %s2760_s26 = smov [#allocation16]   ;;  %s2690_s21 = scalar_lea.hbm %s3198_s16, 1024 }
  0xa1   :  { %s139_s28 = sshll.u32 %s2760_s26, 4  ;;  %p2691_p8 = scmp.ne.s32.totalorder %s3198_s16, %s2690_s21  ;;  %s140_s28 = int_to_ptr.vmem [resolvable:$true] %s139_s28 }
  0xa2   :  { %p2694_p9 = scmp.lt.u32.totalorder %s2690_s21, %s3198_s16 }
  0xa4   :  { %p2696_p10 = pnand %p2694_p9, %p2691_p8 }
  0xa6   :  { %2699 = shalt.err (!%p2696_p10)
}
  0xa7   :  { %s2700_s24 = scalar_lea.vmem %s140_s28, 1024  ;;  %p2705_p12 = scmp.lt.s32.totalorder %s140_s28, %s140_s28 }
  0xa8   :  { %p2701_p11 = scmp.ne.s32.totalorder %s140_s28, %s2700_s24  ;;  %p2706_p13 = scmp.lt.s32.totalorder %s2700_s24, %s2700_s24 }
  0xaa   :  { %p2707_p0 = por %p2706_p13, %p2705_p12 }
  0xac   :  { %p2708_p1 = pnand %p2707_p0, %p2701_p11 }
  0xae   :  { %2711 = shalt.err (!%p2708_p1)
}
  0xaf   :  { %s2761_s10 = smov 128   ;;  %s2762_s13 = smov 8  }
  0xb0   :  { %145 = dma.hbm_to_vmem [thread:$0]  %s3198_s16, 1024, %s140_s28, [#allocation15], %s2761_s10, %s2761_s10, %s2762_s13  }
  0xb1   :  { %2734 = dma.done.wait [#allocation3], 128  }
  0xb2   :  { %2735 = vsyncadd [#allocation3], 4294967168 }
  0xb3   :  { %2736 = dma.done.wait [#allocation6], 288  }
  0xb4   :  { %2737 = vsyncadd [#allocation6], 4294967008 }
  0xb5   :  { %2738 = dma.done.wait [#allocation9], 4160  }
  0xb6   :  { %2739 = vsyncadd [#allocation9], 4294963136 }
  0xb7   :  { %2740 = dma.done.wait [#allocation12], 32768  }
  0xb8   :  { %2741 = vsyncadd [#allocation12], 4294934528 }
  0xb9   :  { %2742 = dma.done.wait [#allocation15], 5120  }
  0xba   :  { %2743 = vsyncadd [#allocation15], 4294962176  ;;  %v2763_v0 = vmov 0   ;;  %v181_v1 = vld [vmem:[#allocation5 + $0x8] sm:$0xff]  ;;  %v180_v2 = vld [vmem:[#allocation5] sm:$0xff]  ;;  %vm188_vm0 = vcmask 261120  }
  0xbb   :  { %224 = vmatprep.mubr.bf16.mxu1 %v2763_v0  ;;  %v185_v3 = vunpack.c.l.s8.bf16 %v181_v1  ;;  %v187_v4 = vunpack.c.h.s8.bf16 %v181_v1  ;;  %v184_v5 = vunpack.c.l.s8.bf16 %v180_v2  ;;  %v264_v6 = vld [vmem:[#allocation8 + $0x8] sm:$0xff]  ;;  %v263_v7 = vld [vmem:[#allocation8] sm:$0xff]  ;;  %v186_v12 = vunpack.c.h.s8.bf16 %v180_v2  ;;  %v2993_v57 = vld [vmem:[#allocation8 + $0x18] sm:$0xff]  ;;  %s3216_s7 = sld [smem:[#allocation26_spill]] }
  0xbc   :  { %v298_v8 = vunpack.c.l.s8.bf16 %v264_v6  ;;  %v302_v9 = vunpack.c.h.s8.bf16 %v264_v6  ;;  %v297_v10 = vunpack.c.l.s8.bf16 %v263_v7  ;;  %v268_v11 = vld [vmem:[#allocation8 + $0x28] sm:$0xff]  ;;  %v301_v14 = vunpack.c.h.s8.bf16 %v263_v7  ;;  %v267_v16 = vld [vmem:[#allocation8 + $0x20] sm:$0xff] }
  0xbd   :  { %192 = vmatprep.subr.bf16.mxu1 %v185_v3  ;;  %v178_v13 = vld [vmem:[#allocation2] sm:$0xff]  ;;  %v306_v15 = vunpack.c.l.s8.bf16 %v268_v11  ;;  %v305_v18 = vunpack.c.l.s8.bf16 %v267_v16  ;;  %v310_v19 = vunpack.c.h.s8.bf16 %v268_v11  ;;  %v309_v21 = vunpack.c.h.s8.bf16 %v267_v16 }
  0xbe   :  { %193 = vmatpush1.bf16.msra.mxu1 %v184_v5  ;;  %361 = vmatprep.subr.bf16.mxu0 %v298_v8  ;;  %v179_v17 = vpack.c.bf16 %v178_v13, %v178_v13  ;;  %v272_v20 = vld [vmem:[#allocation8 + $0x48] sm:$0xff]  ;;  %v271_v23 = vld [vmem:[#allocation8 + $0x40] sm:$0xff]  ;;  %v300_v58 = vunpack.c.l.s8.bf16 %v2993_v57 }
  0xbf   :  { %194 = vmatprep.subr.bf16.mxu1 %v187_v4  ;;  %362 = vmatpush1.bf16.msra.mxu0 %v297_v10  ;;  %v314_v22 = vunpack.c.l.s8.bf16 %v272_v20  ;;  %v313_v24 = vunpack.c.l.s8.bf16 %v271_v23  ;;  %v318_v25 = vunpack.c.h.s8.bf16 %v272_v20  ;;  %v276_v26 = vld [vmem:[#allocation8 + $0x68] sm:$0xff]  ;;  %v317_v27 = vunpack.c.h.s8.bf16 %v271_v23  ;;  %v275_v29 = vld [vmem:[#allocation8 + $0x60] sm:$0xff] }
  0xc0   :  { %363 = vmatprep.subr.bf16.mxu0 %v302_v9  ;;  %v322_v28 = vunpack.c.l.s8.bf16 %v276_v26  ;;  %v321_v30 = vunpack.c.l.s8.bf16 %v275_v29  ;;  %v326_v31 = vunpack.c.h.s8.bf16 %v276_v26  ;;  %v280_v32 = vld [vmem:[#allocation8 + $0x88] sm:$0xff]  ;;  %v325_v33 = vunpack.c.h.s8.bf16 %v275_v29  ;;  %v279_v35 = vld [vmem:[#allocation8 + $0x80] sm:$0xff] }
  0xc1   :  { %v330_v34 = vunpack.c.l.s8.bf16 %v280_v32  ;;  %v329_v36 = vunpack.c.l.s8.bf16 %v279_v35  ;;  %v334_v37 = vunpack.c.h.s8.bf16 %v280_v32  ;;  %v284_v38 = vld [vmem:[#allocation8 + $0xa8] sm:$0xff]  ;;  %v333_v39 = vunpack.c.h.s8.bf16 %v279_v35  ;;  %v283_v41 = vld [vmem:[#allocation8 + $0xa0] sm:$0xff] }
  0xc2   :  { %195 = vmatpush1.bf16.msra.mxu1 %v186_v12  ;;  %v338_v40 = vunpack.c.l.s8.bf16 %v284_v38  ;;  %v337_v42 = vunpack.c.l.s8.bf16 %v283_v41  ;;  %v342_v43 = vunpack.c.h.s8.bf16 %v284_v38  ;;  %v288_v44 = vld [vmem:[#allocation8 + $0xc8] sm:$0xff]  ;;  %v341_v45 = vunpack.c.h.s8.bf16 %v283_v41  ;;  %v287_v47 = vld [vmem:[#allocation8 + $0xc0] sm:$0xff] }
  0xc3   :  { %364 = vmatpush1.bf16.msra.mxu0 %v301_v14  ;;  %v346_v46 = vunpack.c.l.s8.bf16 %v288_v44  ;;  %v345_v48 = vunpack.c.l.s8.bf16 %v287_v47  ;;  %v350_v49 = vunpack.c.h.s8.bf16 %v288_v44  ;;  %v349_v50 = vunpack.c.h.s8.bf16 %v287_v47  ;;  %v292_v51 = vld [vmem:[#allocation8 + $0xe8] sm:$0xff]  ;;  %v291_v53 = vld [vmem:[#allocation8 + $0xe0] sm:$0xff] }
  0xc4   :  { %365 = vmatprep.subr.bf16.mxu0 %v306_v15  ;;  %v354_v52 = vunpack.c.l.s8.bf16 %v292_v51  ;;  %v353_v54 = vunpack.c.l.s8.bf16 %v291_v53  ;;  %v358_v55 = vunpack.c.h.s8.bf16 %v292_v51  ;;  %v357_v56 = vunpack.c.h.s8.bf16 %v291_v53  ;;  %v502_v59 = vld [vmem:[#allocation11 + $0x8] sm:$0xff]  ;;  %v501_v60 = vld [vmem:[#allocation11] sm:$0xff] }
  0xc5   :  { %2420 = vmatmul.mubr.msk.bf16.vlgmr.msra.gmra.mrb[0].mxu1 %vm188_vm0, %v179_v17  ;;  %v632_v61 = vunpack.c.l.s8.bf16 %v502_v59  ;;  %v631_v62 = vunpack.c.l.s8.bf16 %v501_v60  ;;  %v640_v63 = vunpack.c.h.s8.bf16 %v502_v59  ;;  %v639_v0 = vunpack.c.h.s8.bf16 %v501_v60  ;;  %v510_v1 = vld [vmem:[#allocation11 + $0x48] sm:$0xff]  ;;  %v509_v3 = vld [vmem:[#allocation11 + $0x40] sm:$0xff] }
  0xc6   :  { %v648_v2 = vunpack.c.l.s8.bf16 %v510_v1  ;;  %v647_v4 = vunpack.c.l.s8.bf16 %v509_v3  ;;  %v656_v5 = vunpack.c.h.s8.bf16 %v510_v1  ;;  %v655_v6 = vunpack.c.h.s8.bf16 %v509_v3  ;;  %v518_v7 = vld [vmem:[#allocation11 + $0x88] sm:$0xff]  ;;  %v517_v9 = vld [vmem:[#allocation11 + $0x80] sm:$0xff] }
  0xc7   :  { %366 = vmatpush1.bf16.msra.mxu0 %v305_v18  ;;  %887 = vmatprep.subr.bf16.mxu1 %v632_v61  ;;  %v664_v8 = vunpack.c.l.s8.bf16 %v518_v7  ;;  %v663_v10 = vunpack.c.l.s8.bf16 %v517_v9  ;;  %v672_v11 = vunpack.c.h.s8.bf16 %v518_v7  ;;  %v671_v12 = vunpack.c.h.s8.bf16 %v517_v9  ;;  %v526_v13 = vld [vmem:[#allocation11 + $0xc8] sm:$0xff]  ;;  %v525_v15 = vld [vmem:[#allocation11 + $0xc0] sm:$0xff] }
  0xc8   :  { %367 = vmatprep.subr.bf16.mxu0 %v310_v19  ;;  %888 = vmatpush1.bf16.msra.mxu1 %v631_v62  ;;  %v680_v14 = vunpack.c.l.s8.bf16 %v526_v13  ;;  %v679_v16 = vunpack.c.l.s8.bf16 %v525_v15  ;;  %v688_v17 = vunpack.c.h.s8.bf16 %v526_v13  ;;  %v687_v18 = vunpack.c.h.s8.bf16 %v525_v15  ;;  %v534_v19 = vld [vmem:[#allocation11 + $0x108] sm:$0xff] }
  0xc9   :  { %889 = vmatprep.subr.bf16.mxu1 %v640_v63  ;;  %v696_v20 = vunpack.c.l.s8.bf16 %v534_v19  ;;  %v704_v23 = vunpack.c.h.s8.bf16 %v534_v19  ;;  %v234_v26 = vlaneseq  ;;  %v304_v62 = vunpack.c.h.s8.bf16 %v2993_v57  ;;  %v270_v63 = vld [vmem:[#allocation8 + $0x38] sm:$0xff]  ;;  %v273_v57 = vld [vmem:[#allocation8 + $0x50] sm:$0xff] }
  0xca   :  { %v308_v1 = vunpack.c.l.s8.bf16 %v270_v63  ;;  %v277_v13 = vld [vmem:[#allocation8 + $0x70] sm:$0xff] }
  0xcb   :  { %368 = vmatpush1.bf16.msra.mxu0 %v309_v21  ;;  %v533_v21 = vld [vmem:[#allocation11 + $0x100] sm:$0xff]  ;;  %v281_v19 = vld [vmem:[#allocation8 + $0x90] sm:$0xff] }
  0xcc   :  { %369 = vmatprep.subr.bf16.mxu0 %v314_v22  ;;  %890 = vmatpush1.bf16.msra.mxu1 %v639_v0  ;;  %v695_v22 = vunpack.c.l.s8.bf16 %v533_v21 }
  0xcd   :  { %891 = vmatprep.subr.bf16.mxu1 %v648_v2  ;;  %v269_v2 = vld [vmem:[#allocation8 + $0x30] sm:$0xff] }
  0xce   :  { %v307_v3 = vunpack.c.l.s8.bf16 %v269_v2 }
  0xcf   :  { %370 = vmatpush1.bf16.msra.mxu0 %v313_v24  ;;  %v703_v24 = vunpack.c.h.s8.bf16 %v533_v21 }
  0xd0   :  { %371 = vmatprep.subr.bf16.mxu0 %v318_v25  ;;  %892 = vmatpush1.bf16.msra.mxu1 %v647_v4  ;;  %v542_v25 = vld [vmem:[#allocation11 + $0x148] sm:$0xff]  ;;  %v312_v4 = vunpack.c.h.s8.bf16 %v270_v63 }
  0xd1   :  { %893 = vmatprep.subr.bf16.mxu1 %v656_v5  ;;  %v274_v5 = vld [vmem:[#allocation8 + $0x58] sm:$0xff] }
  0xd2   :  { %v316_v7 = vunpack.c.l.s8.bf16 %v274_v5  ;;  %v320_v9 = vunpack.c.h.s8.bf16 %v274_v5 }
  0xd3   :  { %372 = vmatpush1.bf16.msra.mxu0 %v317_v27  ;;  %v712_v27 = vunpack.c.l.s8.bf16 %v542_v25 }
  0xd4   :  { %373 = vmatprep.subr.bf16.mxu0 %v322_v28  ;;  %894 = vmatpush1.bf16.msra.mxu1 %v655_v6  ;;  %v541_v28 = vld [vmem:[#allocation11 + $0x140] sm:$0xff]  ;;  %v311_v6 = vunpack.c.h.s8.bf16 %v269_v2  ;;  %v558_v2 = vld [vmem:[#allocation11 + $0x1c8] sm:$0xff] }
  0xd5   :  { %895 = vmatprep.subr.bf16.mxu1 %v664_v8  ;;  %v711_v29 = vunpack.c.l.s8.bf16 %v541_v28  ;;  %v719_v32 = vunpack.c.h.s8.bf16 %v541_v28  ;;  %v315_v8 = vunpack.c.l.s8.bf16 %v273_v57  ;;  %v290_v28 = vld [vmem:[#allocation8 + $0xd8] sm:$0xff] }
  0xd7   :  { %374 = vmatpush1.bf16.msra.mxu0 %v321_v30  ;;  %v720_v30 = vunpack.c.h.s8.bf16 %v542_v25  ;;  %v285_v25 = vld [vmem:[#allocation8 + $0xb0] sm:$0xff] }
  0xd8   :  { %375 = vmatprep.subr.bf16.mxu0 %v326_v31  ;;  %896 = vmatpush1.bf16.msra.mxu1 %v663_v10  ;;  %v2996_v31 = vshrl.u32 %v234_v26, 7  ;;  %v278_v10 = vld [vmem:[#allocation8 + $0x78] sm:$0xff]  ;;  %v339_v26 = vunpack.c.l.s8.bf16 %v285_v25 }
  0xd9   :  { %897 = vmatprep.subr.bf16.mxu1 %v672_v11  ;;  %v319_v11 = vunpack.c.h.s8.bf16 %v273_v57  ;;  %v328_v15 = vunpack.c.h.s8.bf16 %v278_v10  ;;  %v536_v57 = vld [vmem:[#allocation11 + $0x118] sm:$0xff] }
  0xda   :  { %v3005_v38 = vsub.s32 1, %v2996_v31 }
  0xdb   :  { %376 = vmatpush1.bf16.msra.mxu0 %v325_v33  ;;  %v550_v33 = vld [vmem:[#allocation11 + $0x188] sm:$0xff] }
  0xdc   :  { %377 = vmatprep.subr.bf16.mxu0 %v330_v34  ;;  %898 = vmatpush1.bf16.msra.mxu1 %v671_v12  ;;  %v2999_v34 = vsub.s32 0, %v2996_v31  ;;  %v728_v35 = vunpack.c.l.s8.bf16 %v550_v33  ;;  %v736_v41 = vunpack.c.h.s8.bf16 %v550_v33  ;;  %v324_v12 = vunpack.c.l.s8.bf16 %v278_v10 }
  0xdd   :  { %899 = vmatprep.subr.bf16.mxu1 %v680_v14  ;;  %v323_v14 = vunpack.c.l.s8.bf16 %v277_v13 }
  0xdf   :  { %378 = vmatpush1.bf16.msra.mxu0 %v329_v36  ;;  %v549_v36 = vld [vmem:[#allocation11 + $0x180] sm:$0xff] }
  0xe0   :  { %379 = vmatprep.subr.bf16.mxu0 %v334_v37  ;;  %900 = vmatpush1.bf16.msra.mxu1 %v679_v16  ;;  %v182_v37 = vld [vmem:[%s3216_s7] sm:$0x3]  ;;  %v282_v16 = vld [vmem:[#allocation8 + $0x98] sm:$0xff] }
  0xe1   :  { %901 = vmatprep.subr.bf16.mxu1 %v688_v17  ;;  %v327_v17 = vunpack.c.h.s8.bf16 %v277_v13  ;;  %v336_v21 = vunpack.c.h.s8.bf16 %v282_v16  ;;  %v3016_v13 = vld [vmem:[#allocation11 + $0x208] sm:$0xff] }
  0xe3   :  { %380 = vmatpush1.bf16.msra.mxu0 %v333_v39  ;;  %v727_v39 = vunpack.c.l.s8.bf16 %v549_v36 }
  0xe4   :  { %381 = vmatprep.subr.bf16.mxu0 %v338_v40  ;;  %902 = vmatpush1.bf16.msra.mxu1 %v687_v18  ;;  %v183_v40 = vld [vmem:[#allocation7] sm:$0x3]  ;;  %v332_v18 = vunpack.c.l.s8.bf16 %v282_v16  ;;  %v706_v16 = vunpack.c.h.s8.bf16 %v536_v57 }
  0xe5   :  { %903 = vmatprep.subr.bf16.mxu1 %v696_v20  ;;  %v250_v44 = vrot.slane %v183_v40, %v2999_v34  ;;  %v254_v47 = vrot.slane %v183_v40, %v3005_v38  ;;  %v331_v20 = vunpack.c.l.s8.bf16 %v281_v19  ;;  %v293_v40 = vld [vmem:[#allocation8 + $0xf0] sm:$0xff] }
  0xe7   :  { %382 = vmatpush1.bf16.msra.mxu0 %v337_v42  ;;  %v237_v42 = vrot.slane %v182_v37, %v2999_v34 }
  0xe8   :  { %383 = vmatprep.subr.bf16.mxu0 %v342_v43  ;;  %904 = vmatpush1.bf16.msra.mxu1 %v695_v22  ;;  %v241_v43 = vrot.slane %v182_v37, %v3005_v38  ;;  %v286_v22 = vld [vmem:[#allocation8 + $0xb8] sm:$0xff] }
  0xe9   :  { %905 = vmatprep.subr.bf16.mxu1 %v704_v23  ;;  %v335_v23 = vunpack.c.h.s8.bf16 %v281_v19 }
  0xeb   :  { %384 = vmatpush1.bf16.msra.mxu0 %v341_v45  ;;  %v735_v45 = vunpack.c.h.s8.bf16 %v549_v36  ;;  %v294_v36 = vld [vmem:[#allocation8 + $0xf8] sm:$0xff] }
  0xec   :  { %385 = vmatprep.subr.bf16.mxu0 %v346_v46  ;;  %906 = vmatpush1.bf16.msra.mxu1 %v703_v24  ;;  %v340_v24 = vunpack.c.l.s8.bf16 %v286_v22 }
  0xed   :  { %907 = vmatprep.subr.bf16.mxu1 %v712_v27  ;;  %v344_v27 = vunpack.c.h.s8.bf16 %v286_v22 }
  0xef   :  { %386 = vmatpush1.bf16.msra.mxu0 %v345_v48 }
  0xf0   :  { %387 = vmatprep.subr.bf16.mxu0 %v350_v49  ;;  %908 = vmatpush1.bf16.msra.mxu1 %v711_v29  ;;  %v343_v29 = vunpack.c.h.s8.bf16 %v285_v25 }
  0xf1   :  { %909 = vmatprep.subr.bf16.mxu1 %v720_v30  ;;  %v348_v30 = vunpack.c.l.s8.bf16 %v290_v28 }
  0xf3   :  { %388 = vmatpush1.bf16.msra.mxu0 %v349_v50 }
  0xf4   :  { %389 = vmatprep.subr.bf16.mxu0 %v354_v52  ;;  %910 = vmatpush1.bf16.msra.mxu1 %v719_v32  ;;  %v289_v32 = vld [vmem:[#allocation8 + $0xd0] sm:$0xff] }
  0xf5   :  { %911 = vmatprep.subr.bf16.mxu1 %v728_v35  ;;  %v347_v33 = vunpack.c.l.s8.bf16 %v289_v32  ;;  %v352_v35 = vunpack.c.h.s8.bf16 %v290_v28  ;;  %v351_v37 = vunpack.c.h.s8.bf16 %v289_v32 }
  0xf7   :  { %390 = vmatpush1.bf16.msra.mxu0 %v353_v54 }
  0xf8   :  { %391 = vmatprep.subr.bf16.mxu0 %v358_v55  ;;  %912 = vmatpush1.bf16.msra.mxu1 %v727_v39  ;;  %v356_v39 = vunpack.c.l.s8.bf16 %v294_v36 }
  0xf9   :  { %913 = vmatprep.subr.bf16.mxu1 %v736_v41  ;;  %v355_v41 = vunpack.c.l.s8.bf16 %v293_v40 }
  0xfb   :  { %392 = vmatpush1.bf16.msra.mxu0 %v357_v56  ;;  %v265_v56 = vld [vmem:[#allocation8 + $0x10] sm:$0xff] }
  0xfc   :  { %402 = vmatprep.subr.bf16.mxu0 %v300_v58  ;;  %914 = vmatpush1.bf16.msra.mxu1 %v735_v45  ;;  %v299_v60 = vunpack.c.l.s8.bf16 %v265_v56  ;;  %v303_v0 = vunpack.c.h.s8.bf16 %v265_v56 }
 0x198   :  { %v226_v46 = vpop.f32.mrb[0].mxu1 }
 0x199   :  { %v244_v48 = vmul.f32 %v237_v42, %v226_v46  ;;  %v228_v49 = vpop.f32.mrb[1].mxu1  ;;  %v360_v42 = vunpack.c.h.s8.bf16 %v294_v36  ;;  %v503_v46 = vld [vmem:[#allocation11 + $0x10] sm:$0xff] }
 0x19a   :  { %v245_v50 = vmul.f32 %v241_v43, %v228_v49  ;;  %v230_v51 = vpop.f32.mrb[2].mxu1  ;;  %v504_v43 = vld [vmem:[#allocation11 + $0x18] sm:$0xff] }
 0x19b   :  { %v257_v52 = vadd.f32 %v250_v44, %v244_v48  ;;  %v231_v53 = vpop.f32.mrb[3].mxu1  ;;  %v359_v44 = vunpack.c.h.s8.bf16 %v293_v40  ;;  %v634_v45 = vunpack.c.l.s8.bf16 %v504_v43  ;;  %v642_v48 = vunpack.c.h.s8.bf16 %v504_v43  ;;  %v512_v49 = vld [vmem:[#allocation11 + $0x58] sm:$0xff] }
 0x19c   :  { %v258_v54 = vadd.f32 %v254_v47, %v245_v50  ;;  %v633_v47 = vunpack.c.l.s8.bf16 %v503_v46  ;;  %v641_v50 = vunpack.c.h.s8.bf16 %v503_v46  ;;  %v650_v51 = vunpack.c.l.s8.bf16 %v512_v49 }
 0x19d   :  { %v259_v55 = vmax.f32 %v257_v52, 0.0  ;;  %v511_v52 = vld [vmem:[#allocation11 + $0x50] sm:$0xff] }
 0x19e   :  { %v260_v58 = vmax.f32 %v258_v54, 0.0  ;;  %v649_v53 = vunpack.c.l.s8.bf16 %v511_v52  ;;  %v658_v54 = vunpack.c.h.s8.bf16 %v512_v49  ;;  %v657_v56 = vunpack.c.h.s8.bf16 %v511_v52 }
 0x19f   :  { %v3011_v61 = vpack.c.bf16 %v259_v55, %v259_v55  ;;  %v520_v55 = vld [vmem:[#allocation11 + $0x98] sm:$0xff] }
 0x1a0   :  { %v262_v59 = vpack.c.bf16 %v260_v58, %v260_v58  ;;  %v666_v58 = vunpack.c.l.s8.bf16 %v520_v55 }
 0x1a2   :  { %393 = vmatprep.mubr.bf16.mxu0 %v262_v59 }
 0x1a3   :  { %394 = vmatmul.mubr.bf16.vlgmr.msra.gmra.mrb[0].mxu0 %v3011_v61 }
 0x1a4   :  { %403 = vmatpush1.bf16.msra.mxu0 %v299_v60  ;;  %434 = vmatprep.mubr.bf16.mxu0 %v262_v59  ;;  %v519_v59 = vld [vmem:[#allocation11 + $0x90] sm:$0xff] }
 0x1a5   :  { %404 = vmatprep.subr.bf16.mxu0 %v304_v62  ;;  %v665_v60 = vunpack.c.l.s8.bf16 %v519_v59  ;;  %v674_v62 = vunpack.c.h.s8.bf16 %v520_v55  ;;  %v673_v63 = vunpack.c.h.s8.bf16 %v519_v59 }
 0x1a8   :  { %405 = vmatpush1.bf16.msra.mxu0 %v303_v0 }
 0x1a9   :  { %406 = vmatprep.subr.bf16.mxu0 %v308_v1  ;;  %v527_v1 = vld [vmem:[#allocation11 + $0xd0] sm:$0xff] }
 0x1aa   :  { %v681_v5 = vunpack.c.l.s8.bf16 %v527_v1 }
 0x1ac   :  { %407 = vmatpush1.bf16.msra.mxu0 %v307_v3  ;;  %v744_v3 = vunpack.c.l.s8.bf16 %v558_v2 }
 0x1ad   :  { %408 = vmatprep.subr.bf16.mxu0 %v312_v4  ;;  %v557_v4 = vld [vmem:[#allocation11 + $0x1c0] sm:$0xff] }
 0x1ae   :  { %915 = vmatprep.subr.bf16.mxu1 %v744_v3  ;;  %v751_v10 = vunpack.c.h.s8.bf16 %v557_v4  ;;  %v576_v3 = vld [vmem:[#allocation11 + $0x258] sm:$0xff] }
 0x1b0   :  { %409 = vmatpush1.bf16.msra.mxu0 %v311_v6  ;;  %v743_v6 = vunpack.c.l.s8.bf16 %v557_v4 }
 0x1b1   :  { %410 = vmatprep.subr.bf16.mxu0 %v316_v7 }
 0x1b2   :  { %916 = vmatpush1.bf16.msra.mxu1 %v743_v6 }
 0x1b4   :  { %411 = vmatpush1.bf16.msra.mxu0 %v315_v8  ;;  %v752_v8 = vunpack.c.h.s8.bf16 %v558_v2  ;;  %v574_v2 = vld [vmem:[#allocation11 + $0x248] sm:$0xff] }
 0x1b5   :  { %412 = vmatprep.subr.bf16.mxu0 %v320_v9  ;;  %v689_v9 = vunpack.c.h.s8.bf16 %v527_v1  ;;  %v776_v6 = vunpack.c.l.s8.bf16 %v574_v2 }
 0x1b6   :  { %917 = vmatprep.subr.bf16.mxu1 %v752_v8  ;;  %v575_v8 = vld [vmem:[#allocation11 + $0x250] sm:$0xff] }
 0x1b7   :  { %918 = vmatpush1.bf16.msra.mxu1 %v751_v10  ;;  %v777_v10 = vunpack.c.l.s8.bf16 %v575_v8 }
 0x1b8   :  { %413 = vmatpush1.bf16.msra.mxu0 %v319_v11  ;;  %v698_v11 = vunpack.c.l.s8.bf16 %v536_v57  ;;  %v573_v57 = vld [vmem:[#allocation11 + $0x240] sm:$0xff] }
 0x1b9   :  { %414 = vmatprep.subr.bf16.mxu0 %v324_v12  ;;  %v535_v12 = vld [vmem:[#allocation11 + $0x110] sm:$0xff] }
 0x1bc   :  { %415 = vmatpush1.bf16.msra.mxu0 %v323_v14  ;;  %v760_v14 = vunpack.c.l.s8.bf16 %v3016_v13 }
 0x1bd   :  { %416 = vmatprep.subr.bf16.mxu0 %v328_v15  ;;  %v697_v15 = vunpack.c.l.s8.bf16 %v535_v12 }
 0x1be   :  { %928 = vmatprep.subr.bf16.mxu1 %v760_v14  ;;  %v584_v14 = vld [vmem:[#allocation11 + $0x298] sm:$0xff] }
 0x1c0   :  { %417 = vmatpush1.bf16.msra.mxu0 %v327_v17  ;;  %v544_v17 = vld [vmem:[#allocation11 + $0x158] sm:$0xff] }
 0x1c1   :  { %418 = vmatprep.subr.bf16.mxu0 %v332_v18  ;;  %v705_v18 = vunpack.c.h.s8.bf16 %v535_v12  ;;  %v714_v19 = vunpack.c.l.s8.bf16 %v544_v17  ;;  %v722_v22 = vunpack.c.h.s8.bf16 %v544_v17  ;;  %v786_v12 = vunpack.c.h.s8.bf16 %v576_v3 }
 0x1c4   :  { %419 = vmatpush1.bf16.msra.mxu0 %v331_v20  ;;  %v543_v20 = vld [vmem:[#allocation11 + $0x150] sm:$0xff] }
 0x1c5   :  { %420 = vmatprep.subr.bf16.mxu0 %v336_v21  ;;  %v713_v21 = vunpack.c.l.s8.bf16 %v543_v20 }
 0x1c8   :  { %421 = vmatpush1.bf16.msra.mxu0 %v335_v23  ;;  %v552_v23 = vld [vmem:[#allocation11 + $0x198] sm:$0xff] }
 0x1c9   :  { %422 = vmatprep.subr.bf16.mxu0 %v340_v24  ;;  %v721_v24 = vunpack.c.h.s8.bf16 %v543_v20  ;;  %v730_v25 = vunpack.c.l.s8.bf16 %v552_v23  ;;  %v738_v28 = vunpack.c.h.s8.bf16 %v552_v23  ;;  %v583_v20 = vld [vmem:[#allocation11 + $0x290] sm:$0xff] }
 0x1cc   :  { %423 = vmatpush1.bf16.msra.mxu0 %v339_v26  ;;  %v551_v26 = vld [vmem:[#allocation11 + $0x190] sm:$0xff] }
 0x1cd   :  { %424 = vmatprep.subr.bf16.mxu0 %v344_v27  ;;  %v729_v27 = vunpack.c.l.s8.bf16 %v551_v26 }
 0x1d0   :  { %425 = vmatpush1.bf16.msra.mxu0 %v343_v29  ;;  %v560_v29 = vld [vmem:[#allocation11 + $0x1d8] sm:$0xff] }
 0x1d1   :  { %426 = vmatprep.subr.bf16.mxu0 %v348_v30  ;;  %v737_v30 = vunpack.c.h.s8.bf16 %v551_v26  ;;  %v746_v32 = vunpack.c.l.s8.bf16 %v560_v29  ;;  %v754_v36 = vunpack.c.h.s8.bf16 %v560_v29  ;;  %v592_v26 = vld [vmem:[#allocation11 + $0x2d8] sm:$0xff] }
 0x1d4   :  { %427 = vmatpush1.bf16.msra.mxu0 %v347_v33  ;;  %v559_v33 = vld [vmem:[#allocation11 + $0x1d0] sm:$0xff] }
 0x1d5   :  { %428 = vmatprep.subr.bf16.mxu0 %v352_v35  ;;  %v745_v35 = vunpack.c.l.s8.bf16 %v559_v33 }
 0x1d8   :  { %429 = vmatpush1.bf16.msra.mxu0 %v351_v37  ;;  %v568_v37 = vld [vmem:[#allocation11 + $0x218] sm:$0xff] }
 0x1d9   :  { %430 = vmatprep.subr.bf16.mxu0 %v356_v39  ;;  %v753_v39 = vunpack.c.h.s8.bf16 %v559_v33  ;;  %v762_v40 = vunpack.c.l.s8.bf16 %v568_v37  ;;  %v770_v1 = vunpack.c.h.s8.bf16 %v568_v37  ;;  %v591_v33 = vld [vmem:[#allocation11 + $0x2d0] sm:$0xff] }
 0x1dc   :  { %431 = vmatpush1.bf16.msra.mxu0 %v355_v41  ;;  %v3019_v41 = vld [vmem:[#allocation10] sm:$0xf] }
 0x1dd   :  { %432 = vmatprep.subr.bf16.mxu0 %v360_v42  ;;  %v3024_v42 = vld [vmem:[%s3188_s6] sm:$0xf]  ;;  %v447_v43 = vrot.slane %v3019_v41, %v2999_v34 }
 0x1e0   :  { %433 = vmatpush1.bf16.msra.mxu0 %v359_v44  ;;  %v451_v44 = vrot.slane %v3019_v41, %v3005_v38 }
 0x1e1   :  { %969 = vmatprep.subr.bf16.mxu0 %v634_v45  ;;  %v472_v45 = vrot.slane %v3024_v42, %v2999_v34 }
 0x1e3   :  { %435 = vmatmul.mubr.bf16.vlgmr.msra.gmra.mrb[4].mxu0 %v3011_v61  ;;  %v528_v61 = vld [vmem:[#allocation11 + $0xd8] sm:$0xff] }
 0x1e4   :  { %970 = vmatpush1.bf16.msra.mxu0 %v633_v47  ;;  %v682_v0 = vunpack.c.l.s8.bf16 %v528_v61  ;;  %v690_v7 = vunpack.c.h.s8.bf16 %v528_v61  ;;  %v476_v47 = vrot.slane %v3024_v42, %v3005_v38 }
 0x1e5   :  { %971 = vmatprep.subr.bf16.mxu0 %v642_v48 }
 0x1e8   :  { %972 = vmatpush1.bf16.msra.mxu0 %v641_v50 }
 0x1e9   :  { %973 = vmatprep.subr.bf16.mxu0 %v650_v51 }
 0x1ec   :  { %974 = vmatpush1.bf16.msra.mxu0 %v649_v53 }
 0x1ed   :  { %975 = vmatprep.subr.bf16.mxu0 %v658_v54 }
 0x1f0   :  { %976 = vmatpush1.bf16.msra.mxu0 %v657_v56  ;;  %v565_v56 = vld [vmem:[#allocation11 + $0x200] sm:$0xff] }
 0x1f1   :  { %977 = vmatprep.subr.bf16.mxu0 %v666_v58  ;;  %v567_v58 = vld [vmem:[#allocation11 + $0x210] sm:$0xff]  ;;  %v767_v4 = vunpack.c.h.s8.bf16 %v565_v56 }
 0x1f2   :  { %v761_v61 = vunpack.c.l.s8.bf16 %v567_v58 }
 0x1f4   :  { %978 = vmatpush1.bf16.msra.mxu0 %v665_v60 }
 0x1f5   :  { %979 = vmatprep.subr.bf16.mxu0 %v674_v62  ;;  %v759_v62 = vunpack.c.l.s8.bf16 %v565_v56 }
 0x1f8   :  { %980 = vmatpush1.bf16.msra.mxu0 %v673_v63 }
 0x1f9   :  { %981 = vmatprep.subr.bf16.mxu0 %v682_v0  ;;  %v768_v0 = vunpack.c.h.s8.bf16 %v3016_v13  ;;  %v582_v13 = vld [vmem:[#allocation11 + $0x288] sm:$0xff] }
 0x1fa   :  { %v792_v17 = vunpack.c.l.s8.bf16 %v582_v13  ;;  %v800_v23 = vunpack.c.h.s8.bf16 %v582_v13 }
 0x1fc   :  { %982 = vmatpush1.bf16.msra.mxu0 %v681_v5  ;;  %v769_v5 = vunpack.c.h.s8.bf16 %v567_v58 }
 0x1fd   :  { %983 = vmatprep.subr.bf16.mxu0 %v690_v7  ;;  %v778_v7 = vunpack.c.l.s8.bf16 %v576_v3 }
 0x200   :  { %984 = vmatpush1.bf16.msra.mxu0 %v689_v9  ;;  %v775_v9 = vunpack.c.l.s8.bf16 %v573_v57 }
 0x201   :  { %985 = vmatprep.subr.bf16.mxu0 %v698_v11  ;;  %v784_v11 = vunpack.c.h.s8.bf16 %v574_v2 }
 0x204   :  { %986 = vmatpush1.bf16.msra.mxu0 %v697_v15  ;;  %v783_v15 = vunpack.c.h.s8.bf16 %v573_v57 }
 0x205   :  { %987 = vmatprep.subr.bf16.mxu0 %v706_v16  ;;  %v785_v16 = vunpack.c.h.s8.bf16 %v575_v8 }
 0x208   :  { %988 = vmatpush1.bf16.msra.mxu0 %v705_v18  ;;  %v794_v18 = vunpack.c.l.s8.bf16 %v584_v14 }
 0x209   :  { %989 = vmatprep.subr.bf16.mxu0 %v714_v19  ;;  %v581_v19 = vld [vmem:[#allocation11 + $0x280] sm:$0xff] }
 0x20c   :  { %990 = vmatpush1.bf16.msra.mxu0 %v713_v21  ;;  %v791_v21 = vunpack.c.l.s8.bf16 %v581_v19 }
 0x20d   :  { %991 = vmatprep.subr.bf16.mxu0 %v722_v22  ;;  %v793_v22 = vunpack.c.l.s8.bf16 %v583_v20 }
 0x210   :  { %992 = vmatpush1.bf16.msra.mxu0 %v721_v24  ;;  %v802_v24 = vunpack.c.h.s8.bf16 %v584_v14 }
 0x211   :  { %993 = vmatprep.subr.bf16.mxu0 %v730_v25  ;;  %v590_v25 = vld [vmem:[#allocation11 + $0x2c8] sm:$0xff] }
 0x212   :  { %v808_v29 = vunpack.c.l.s8.bf16 %v590_v25  ;;  %v816_v37 = vunpack.c.h.s8.bf16 %v590_v25  ;;  %v621_v25 = vld [vmem:[#allocation11 + $0x3c0] sm:$0xff] }
 0x214   :  { %994 = vmatpush1.bf16.msra.mxu0 %v729_v27  ;;  %v799_v27 = vunpack.c.h.s8.bf16 %v581_v19  ;;  %v624_v19 = vld [vmem:[#allocation11 + $0x3d8] sm:$0xff] }
 0x215   :  { %995 = vmatprep.subr.bf16.mxu0 %v738_v28  ;;  %v801_v28 = vunpack.c.h.s8.bf16 %v583_v20 }
 0x218   :  { %996 = vmatpush1.bf16.msra.mxu0 %v737_v30  ;;  %v810_v30 = vunpack.c.l.s8.bf16 %v592_v26 }
 0x219   :  { %997 = vmatprep.subr.bf16.mxu0 %v746_v32  ;;  %v589_v32 = vld [vmem:[#allocation11 + $0x2c0] sm:$0xff] }
 0x21c   :  { %998 = vmatpush1.bf16.msra.mxu0 %v745_v35  ;;  %v807_v35 = vunpack.c.l.s8.bf16 %v589_v32 }
 0x21d   :  { %999 = vmatprep.subr.bf16.mxu0 %v754_v36  ;;  %v809_v36 = vunpack.c.l.s8.bf16 %v591_v33 }
 0x220   :  { %1000 = vmatpush1.bf16.msra.mxu0 %v753_v39  ;;  %v818_v39 = vunpack.c.h.s8.bf16 %v592_v26  ;;  %v623_v26 = vld [vmem:[#allocation11 + $0x3d0] sm:$0xff] }
 0x221   :  { %1010 = vmatprep.subr.bf16.mxu0 %v762_v40  ;;  %v598_v40 = vld [vmem:[#allocation11 + $0x308] sm:$0xff] }
 0x276   :  { %v395_v46 = vpop.f32.mrb[0].mxu0 }
 0x277   :  { %v464_v48 = vmul.f32 %v447_v43, %v395_v46  ;;  %v397_v49 = vpop.f32.mrb[1].mxu0  ;;  %v600_v43 = vld [vmem:[#allocation11 + $0x318] sm:$0xff]  ;;  %v824_v46 = vunpack.c.l.s8.bf16 %v598_v40 }
 0x278   :  { %v465_v50 = vmul.f32 %v451_v44, %v397_v49  ;;  %v399_v51 = vpop.f32.mrb[2].mxu0  ;;  %v815_v44 = vunpack.c.h.s8.bf16 %v589_v32  ;;  %v599_v49 = vld [vmem:[#allocation11 + $0x310] sm:$0xff]  ;;  %v871_v32 = vunpack.c.l.s8.bf16 %v621_v25 }
 0x279   :  { %v489_v52 = vadd.f32 %v472_v45, %v464_v48  ;;  %v400_v53 = vpop.f32.mrb[3].mxu0  ;;  %v817_v45 = vunpack.c.h.s8.bf16 %v591_v33  ;;  %v597_v48 = vld [vmem:[#allocation11 + $0x300] sm:$0xff]  ;;  %v825_v51 = vunpack.c.l.s8.bf16 %v599_v49  ;;  %v833_v58 = vunpack.c.h.s8.bf16 %v599_v49 }
 0x27a   :  { %v490_v54 = vadd.f32 %v476_v47, %v465_v50  ;;  %v826_v47 = vunpack.c.l.s8.bf16 %v600_v43  ;;  %v823_v50 = vunpack.c.l.s8.bf16 %v597_v48  ;;  %v834_v53 = vunpack.c.h.s8.bf16 %v600_v43 }
 0x27b   :  { %v493_v55 = vmax.f32 %v489_v52, 0.0  ;;  %v832_v52 = vunpack.c.h.s8.bf16 %v598_v40  ;;  %v831_v56 = vunpack.c.h.s8.bf16 %v597_v48  ;;  %v873_v33 = vunpack.c.l.s8.bf16 %v623_v26 }
 0x27c   :  { %v494_v59 = vmax.f32 %v490_v54, 0.0  ;;  %v606_v54 = vld [vmem:[#allocation11 + $0x348] sm:$0xff]  ;;  %v879_v48 = vunpack.c.h.s8.bf16 %v621_v25  ;;  %v881_v49 = vunpack.c.h.s8.bf16 %v623_v26  ;;  %v532_v25 = vld [vmem:[#allocation11 + $0xf8] sm:$0xff] }
 0x27d   :  { %v3036_v63 = vpack.c.bf16 %v493_v55, %v493_v55  ;;  %v608_v55 = vld [vmem:[#allocation11 + $0x358] sm:$0xff]  ;;  %v848_v3 = vunpack.c.h.s8.bf16 %v606_v54 }
 0x27e   :  { %v3034_v60 = vpack.c.bf16 %v494_v59, %v494_v59  ;;  %v840_v59 = vunpack.c.l.s8.bf16 %v606_v54  ;;  %v507_v54 = vld [vmem:[#allocation11 + $0x30] sm:$0xff] }
 0x280   :  { %919 = vmatprep.mubr.bf16.mxu1 %v3034_v60  ;;  %1001 = vmatprep.mubr.bf16.mxu0 %v3034_v60 }
 0x281   :  { %920 = vmatmul.mubr.bf16.vlgmr.msra.gmra.mrb[4].mxu1 %v3036_v63  ;;  %1002 = vmatmul.mubr.bf16.vlgmr.msra.gmra.mrb[8].mxu0 %v3036_v63 }
 0x282   :  { %929 = vmatpush1.bf16.msra.mxu1 %v759_v62  ;;  %1011 = vmatpush1.bf16.msra.mxu0 %v761_v61  ;;  %v842_v62 = vunpack.c.l.s8.bf16 %v608_v55  ;;  %v605_v61 = vld [vmem:[#allocation11 + $0x340] sm:$0xff] }
 0x283   :  { %930 = vmatprep.subr.bf16.mxu1 %v768_v0  ;;  %1012 = vmatprep.subr.bf16.mxu0 %v770_v1  ;;  %v607_v0 = vld [vmem:[#allocation11 + $0x350] sm:$0xff]  ;;  %v839_v1 = vunpack.c.l.s8.bf16 %v605_v61 }
 0x284   :  { %v841_v2 = vunpack.c.l.s8.bf16 %v607_v0  ;;  %v849_v57 = vunpack.c.h.s8.bf16 %v607_v0  ;;  %v514_v0 = vld [vmem:[#allocation11 + $0x68] sm:$0xff] }
 0x286   :  { %931 = vmatpush1.bf16.msra.mxu1 %v767_v4  ;;  %1013 = vmatpush1.bf16.msra.mxu0 %v769_v5  ;;  %v850_v4 = vunpack.c.h.s8.bf16 %v608_v55  ;;  %v614_v5 = vld [vmem:[#allocation11 + $0x388] sm:$0xff] }
 0x287   :  { %932 = vmatprep.subr.bf16.mxu1 %v776_v6  ;;  %1014 = vmatprep.subr.bf16.mxu0 %v778_v7  ;;  %v616_v6 = vld [vmem:[#allocation11 + $0x398] sm:$0xff]  ;;  %v847_v7 = vunpack.c.h.s8.bf16 %v605_v61  ;;  %v856_v8 = vunpack.c.l.s8.bf16 %v614_v5  ;;  %v864_v14 = vunpack.c.h.s8.bf16 %v614_v5  ;;  %v513_v5 = vld [vmem:[#allocation11 + $0x60] sm:$0xff] }
 0x28a   :  { %933 = vmatpush1.bf16.msra.mxu1 %v775_v9  ;;  %1015 = vmatpush1.bf16.msra.mxu0 %v777_v10  ;;  %v858_v9 = vunpack.c.l.s8.bf16 %v616_v6  ;;  %v613_v10 = vld [vmem:[#allocation11 + $0x380] sm:$0xff] }
 0x28b   :  { %934 = vmatprep.subr.bf16.mxu1 %v784_v11  ;;  %1016 = vmatprep.subr.bf16.mxu0 %v786_v12  ;;  %v615_v11 = vld [vmem:[#allocation11 + $0x390] sm:$0xff]  ;;  %v855_v12 = vunpack.c.l.s8.bf16 %v613_v10  ;;  %v863_v20 = vunpack.c.h.s8.bf16 %v613_v10 }
 0x28c   :  { %v857_v13 = vunpack.c.l.s8.bf16 %v615_v11 }
 0x28e   :  { %935 = vmatpush1.bf16.msra.mxu1 %v783_v15  ;;  %1017 = vmatpush1.bf16.msra.mxu0 %v785_v16  ;;  %v866_v15 = vunpack.c.h.s8.bf16 %v616_v6  ;;  %v3044_v16 = vsub.s32 2, %v2996_v31 }
 0x28f   :  { %936 = vmatprep.subr.bf16.mxu1 %v792_v17  ;;  %1018 = vmatprep.subr.bf16.mxu0 %v794_v18  ;;  %v3047_v17 = vsub.s32 3, %v2996_v31  ;;  %v622_v18 = vld [vmem:[#allocation11 + $0x3c8] sm:$0xff] }
 0x292   :  { %937 = vmatpush1.bf16.msra.mxu1 %v791_v21  ;;  %1019 = vmatpush1.bf16.msra.mxu0 %v793_v22  ;;  %v865_v21 = vunpack.c.h.s8.bf16 %v615_v11  ;;  %v455_v22 = vrot.slane %v3019_v41, %v3044_v16  ;;  %v522_v11 = vld [vmem:[#allocation11 + $0xa8] sm:$0xff] }
 0x293   :  { %938 = vmatprep.subr.bf16.mxu1 %v800_v23  ;;  %1020 = vmatprep.subr.bf16.mxu0 %v802_v24  ;;  %v872_v23 = vunpack.c.l.s8.bf16 %v622_v18  ;;  %v874_v24 = vunpack.c.l.s8.bf16 %v624_v19 }
 0x296   :  { %939 = vmatpush1.bf16.msra.mxu1 %v799_v27  ;;  %1021 = vmatpush1.bf16.msra.mxu0 %v801_v28  ;;  %v459_v27 = vrot.slane %v3019_v41, %v3047_v17  ;;  %v480_v28 = vrot.slane %v3024_v42, %v3044_v16  ;;  %v506_v41 = vld [vmem:[#allocation11 + $0x28] sm:$0xff] }
 0x297   :  { %940 = vmatprep.subr.bf16.mxu1 %v808_v29  ;;  %1022 = vmatprep.subr.bf16.mxu0 %v810_v30  ;;  %v484_v30 = vrot.slane %v3024_v42, %v3047_v17 }
 0x29a   :  { %941 = vmatpush1.bf16.msra.mxu1 %v807_v35  ;;  %1023 = vmatpush1.bf16.msra.mxu0 %v809_v36 }
 0x29b   :  { %942 = vmatprep.subr.bf16.mxu1 %v816_v37  ;;  %1024 = vmatprep.subr.bf16.mxu0 %v818_v39  ;;  %v880_v37 = vunpack.c.h.s8.bf16 %v622_v18  ;;  %v882_v39 = vunpack.c.h.s8.bf16 %v624_v19  ;;  %v523_v19 = vld [vmem:[#allocation11 + $0xb0] sm:$0xff] }
 0x29e   :  { %943 = vmatpush1.bf16.msra.mxu1 %v815_v44  ;;  %1025 = vmatpush1.bf16.msra.mxu0 %v817_v45  ;;  %v508_v44 = vld [vmem:[#allocation11 + $0x38] sm:$0xff] }
 0x29f   :  { %944 = vmatprep.subr.bf16.mxu1 %v824_v46  ;;  %1026 = vmatprep.subr.bf16.mxu0 %v826_v47  ;;  %v646_v61 = vunpack.c.h.s8.bf16 %v508_v44 }
 0x2a2   :  { %945 = vmatpush1.bf16.msra.mxu1 %v823_v50  ;;  %1027 = vmatpush1.bf16.msra.mxu0 %v825_v51  ;;  %v636_v50 = vunpack.c.l.s8.bf16 %v506_v41  ;;  %v638_v51 = vunpack.c.l.s8.bf16 %v508_v44 }
 0x2a3   :  { %946 = vmatprep.subr.bf16.mxu1 %v832_v52  ;;  %1028 = vmatprep.subr.bf16.mxu0 %v834_v53  ;;  %v505_v52 = vld [vmem:[#allocation11 + $0x20] sm:$0xff] }
 0x2a6   :  { %947 = vmatpush1.bf16.msra.mxu1 %v831_v56  ;;  %1029 = vmatpush1.bf16.msra.mxu0 %v833_v58  ;;  %v635_v56 = vunpack.c.l.s8.bf16 %v505_v52 }
 0x2a7   :  { %948 = vmatprep.subr.bf16.mxu1 %v840_v59  ;;  %1030 = vmatprep.subr.bf16.mxu0 %v842_v62  ;;  %v637_v59 = vunpack.c.l.s8.bf16 %v507_v54  ;;  %v644_v62 = vunpack.c.h.s8.bf16 %v506_v41 }
 0x2aa   :  { %949 = vmatpush1.bf16.msra.mxu1 %v839_v1  ;;  %1031 = vmatpush1.bf16.msra.mxu0 %v841_v2  ;;  %v516_v1 = vld [vmem:[#allocation11 + $0x78] sm:$0xff]  ;;  %v643_v2 = vunpack.c.h.s8.bf16 %v505_v52 }
 0x2ab   :  { %950 = vmatprep.subr.bf16.mxu1 %v848_v3  ;;  %1032 = vmatprep.subr.bf16.mxu0 %v850_v4  ;;  %v645_v3 = vunpack.c.h.s8.bf16 %v507_v54  ;;  %v652_v4 = vunpack.c.l.s8.bf16 %v514_v0  ;;  %v654_v6 = vunpack.c.l.s8.bf16 %v516_v1  ;;  %v662_v10 = vunpack.c.h.s8.bf16 %v516_v1  ;;  %v548_v52 = vld [vmem:[#allocation11 + $0x178] sm:$0xff] }
 0x2ae   :  { %951 = vmatpush1.bf16.msra.mxu1 %v847_v7  ;;  %1033 = vmatpush1.bf16.msra.mxu0 %v849_v57  ;;  %v515_v7 = vld [vmem:[#allocation11 + $0x70] sm:$0xff]  ;;  %v651_v57 = vunpack.c.l.s8.bf16 %v513_v5 }
 0x2af   :  { %952 = vmatprep.subr.bf16.mxu1 %v856_v8  ;;  %1034 = vmatprep.subr.bf16.mxu0 %v858_v9  ;;  %v653_v8 = vunpack.c.l.s8.bf16 %v515_v7  ;;  %v660_v9 = vunpack.c.h.s8.bf16 %v514_v0 }
 0x2b2   :  { %953 = vmatpush1.bf16.msra.mxu1 %v855_v12  ;;  %1035 = vmatpush1.bf16.msra.mxu0 %v857_v13  ;;  %v524_v12 = vld [vmem:[#allocation11 + $0xb8] sm:$0xff]  ;;  %v659_v13 = vunpack.c.h.s8.bf16 %v513_v5 }
 0x2b3   :  { %954 = vmatprep.subr.bf16.mxu1 %v864_v14  ;;  %1036 = vmatprep.subr.bf16.mxu0 %v866_v15  ;;  %v668_v14 = vunpack.c.l.s8.bf16 %v522_v11  ;;  %v521_v15 = vld [vmem:[#allocation11 + $0xa0] sm:$0xff]  ;;  %v670_v18 = vunpack.c.l.s8.bf16 %v524_v12  ;;  %v556_v5 = vld [vmem:[#allocation11 + $0x1b8] sm:$0xff] }
 0x2b4   :  { %v675_v26 = vunpack.c.h.s8.bf16 %v521_v15 }
 0x2b6   :  { %v436_v29 = vpop.f32.mrb[4].mxu0  ;;  %955 = vmatpush1.bf16.msra.mxu1 %v863_v20  ;;  %1037 = vmatpush1.bf16.msra.mxu0 %v865_v21  ;;  %v667_v20 = vunpack.c.l.s8.bf16 %v521_v15  ;;  %v669_v21 = vunpack.c.l.s8.bf16 %v523_v19  ;;  %v564_v15 = vld [vmem:[#allocation11 + $0x1f8] sm:$0xff] }
 0x2b7   :  { %v466_v35 = vmul.f32 %v455_v22, %v436_v29  ;;  %v438_v36 = vpop.f32.mrb[5].mxu0  ;;  %956 = vmatprep.subr.bf16.mxu1 %v872_v23  ;;  %1038 = vmatprep.subr.bf16.mxu0 %v874_v24  ;;  %v676_v22 = vunpack.c.h.s8.bf16 %v522_v11  ;;  %v678_v23 = vunpack.c.h.s8.bf16 %v524_v12  ;;  %v530_v24 = vld [vmem:[#allocation11 + $0xe8] sm:$0xff]  ;;  %v529_v29 = vld [vmem:[#allocation11 + $0xe0] sm:$0xff] }
 0x2b8   :  { %v467_v40 = vmul.f32 %v459_v27, %v438_v36  ;;  %v440_v43 = vpop.f32.mrb[6].mxu0  ;;  %v677_v27 = vunpack.c.h.s8.bf16 %v523_v19  ;;  %v692_v36 = vunpack.c.h.s8.bf16 %v530_v24 }
 0x2b9   :  { %v491_v45 = vadd.f32 %v480_v28, %v466_v35  ;;  %v441_v46 = vpop.f32.mrb[7].mxu0  ;;  %v684_v28 = vunpack.c.l.s8.bf16 %v530_v24  ;;  %v691_v43 = vunpack.c.h.s8.bf16 %v529_v29 }
 0x2ba   :  { %v492_v47 = vadd.f32 %v484_v30, %v467_v40  ;;  %957 = vmatpush1.bf16.msra.mxu1 %v871_v32  ;;  %1039 = vmatpush1.bf16.msra.mxu0 %v873_v33  ;;  %v686_v30 = vunpack.c.l.s8.bf16 %v532_v25  ;;  %v531_v32 = vld [vmem:[#allocation11 + $0xf0] sm:$0xff]  ;;  %v683_v33 = vunpack.c.l.s8.bf16 %v529_v29  ;;  %v540_v40 = vld [vmem:[#allocation11 + $0x138] sm:$0xff] }
 0x2bb   :  { %v495_v42 = vmax.f32 %v491_v45, 0.0  ;;  %958 = vmatprep.subr.bf16.mxu1 %v880_v37  ;;  %1040 = vmatprep.subr.bf16.mxu0 %v882_v39  ;;  %v685_v35 = vunpack.c.l.s8.bf16 %v531_v32  ;;  %v694_v37 = vunpack.c.h.s8.bf16 %v532_v25  ;;  %v538_v39 = vld [vmem:[#allocation11 + $0x128] sm:$0xff]  ;;  %v693_v41 = vunpack.c.h.s8.bf16 %v531_v32  ;;  %v537_v45 = vld [vmem:[#allocation11 + $0x120] sm:$0xff]  ;;  %v572_v29 = vld [vmem:[#allocation11 + $0x238] sm:$0xff] }
 0x2bc   :  { %v496_v53 = vmax.f32 %v492_v47, 0.0  ;;  %v700_v44 = vunpack.c.l.s8.bf16 %v538_v39  ;;  %v702_v46 = vunpack.c.l.s8.bf16 %v540_v40  ;;  %v539_v47 = vld [vmem:[#allocation11 + $0x130] sm:$0xff] }
 0x2bd   :  { %v3059_v58 = vpack.c.bf16 %v495_v42, %v495_v42  ;;  %v708_v42 = vunpack.c.h.s8.bf16 %v538_v39  ;;  %v709_v54 = vunpack.c.h.s8.bf16 %v539_v47 }
 0x2be   :  { %v3057_v55 = vpack.c.bf16 %v496_v53, %v496_v53  ;;  %959 = vmatpush1.bf16.msra.mxu1 %v879_v48  ;;  %1041 = vmatpush1.bf16.msra.mxu0 %v881_v49  ;;  %v699_v48 = vunpack.c.l.s8.bf16 %v537_v45  ;;  %v701_v49 = vunpack.c.l.s8.bf16 %v539_v47  ;;  %v707_v53 = vunpack.c.h.s8.bf16 %v537_v45  ;;  %v580_v45 = vld [vmem:[#allocation11 + $0x278] sm:$0xff] }
 0x2bf   :  { %1051 = vmatprep.subr.bf16.mxu1 %v636_v50  ;;  %1133 = vmatprep.subr.bf16.mxu0 %v638_v51  ;;  %v710_v50 = vunpack.c.h.s8.bf16 %v540_v40  ;;  %v546_v51 = vld [vmem:[#allocation11 + $0x168] sm:$0xff] }
 0x2c0   :  { %960 = vmatprep.mubr.bf16.mxu1 %v3057_v55  ;;  %1042 = vmatprep.mubr.bf16.mxu0 %v3057_v55 }
 0x2c1   :  { %961 = vmatmul.mubr.bf16.vlgmr.msra.gmra.mrb[4].mxu1 %v3059_v58  ;;  %1043 = vmatmul.mubr.bf16.vlgmr.msra.gmra.mrb[8].mxu0 %v3059_v58 }
 0x2c2   :  { %1052 = vmatpush1.bf16.msra.mxu1 %v635_v56  ;;  %1083 = vmatprep.mubr.bf16.mxu1 %v3034_v60  ;;  %v716_v56 = vunpack.c.l.s8.bf16 %v546_v51 }
 0x2c3   :  { %1134 = vmatpush1.bf16.msra.mxu0 %v637_v59  ;;  %1165 = vmatprep.mubr.bf16.mxu0 %v3034_v60  ;;  %v661_v60 = vunpack.c.h.s8.bf16 %v515_v7  ;;  %v545_v59 = vld [vmem:[#allocation11 + $0x160] sm:$0xff] }
 0x2c4   :  { %1053 = vmatprep.subr.bf16.mxu1 %v644_v62  ;;  %1135 = vmatprep.subr.bf16.mxu0 %v646_v61  ;;  %v718_v62 = vunpack.c.l.s8.bf16 %v548_v52  ;;  %v547_v61 = vld [vmem:[#allocation11 + $0x170] sm:$0xff]  ;;  %v715_v0 = vunpack.c.l.s8.bf16 %v545_v59 }
 0x2c5   :  { %v717_v1 = vunpack.c.l.s8.bf16 %v547_v61  ;;  %v725_v7 = vunpack.c.h.s8.bf16 %v547_v61  ;;  %v585_v61 = vld [vmem:[#allocation11 + $0x2a0] sm:$0xff] }
 0x2c6   :  { %1054 = vmatpush1.bf16.msra.mxu1 %v643_v2  ;;  %v724_v2 = vunpack.c.h.s8.bf16 %v546_v51 }
 0x2c7   :  { %1136 = vmatpush1.bf16.msra.mxu0 %v645_v3  ;;  %1055 = vmatprep.subr.bf16.mxu1 %v652_v4  ;;  %v726_v3 = vunpack.c.h.s8.bf16 %v548_v52  ;;  %v554_v4 = vld [vmem:[#allocation11 + $0x1a8] sm:$0xff] }
 0x2c8   :  { %1137 = vmatprep.subr.bf16.mxu0 %v654_v6  ;;  %v723_v6 = vunpack.c.h.s8.bf16 %v545_v59 }
 0x2ca   :  { %1056 = vmatpush1.bf16.msra.mxu1 %v651_v57  ;;  %v732_v57 = vunpack.c.l.s8.bf16 %v554_v4 }
 0x2cb   :  { %1138 = vmatpush1.bf16.msra.mxu0 %v653_v8  ;;  %1057 = vmatprep.subr.bf16.mxu1 %v660_v9  ;;  %v553_v8 = vld [vmem:[#allocation11 + $0x1a0] sm:$0xff]  ;;  %v734_v9 = vunpack.c.l.s8.bf16 %v556_v5 }
 0x2cc   :  { %1139 = vmatprep.subr.bf16.mxu0 %v662_v10  ;;  %v555_v10 = vld [vmem:[#allocation11 + $0x1b0] sm:$0xff]  ;;  %v731_v11 = vunpack.c.l.s8.bf16 %v553_v8 }
 0x2cd   :  { %v733_v12 = vunpack.c.l.s8.bf16 %v555_v10  ;;  %v741_v19 = vunpack.c.h.s8.bf16 %v555_v10  ;;  %v593_v10 = vld [vmem:[#allocation11 + $0x2e0] sm:$0xff] }
 0x2ce   :  { %1058 = vmatpush1.bf16.msra.mxu1 %v659_v13  ;;  %v740_v13 = vunpack.c.h.s8.bf16 %v554_v4 }
 0x2cf   :  { %1140 = vmatpush1.bf16.msra.mxu0 %v661_v60  ;;  %1059 = vmatprep.subr.bf16.mxu1 %v668_v14  ;;  %v742_v60 = vunpack.c.h.s8.bf16 %v556_v5  ;;  %v562_v14 = vld [vmem:[#allocation11 + $0x1e8] sm:$0xff] }
 0x2d0   :  { %1141 = vmatprep.subr.bf16.mxu0 %v670_v18  ;;  %v739_v18 = vunpack.c.h.s8.bf16 %v553_v8 }
 0x2d2   :  { %1060 = vmatpush1.bf16.msra.mxu1 %v667_v20  ;;  %v748_v20 = vunpack.c.l.s8.bf16 %v562_v14 }
 0x2d3   :  { %1142 = vmatpush1.bf16.msra.mxu0 %v669_v21  ;;  %1061 = vmatprep.subr.bf16.mxu1 %v676_v22  ;;  %v561_v21 = vld [vmem:[#allocation11 + $0x1e0] sm:$0xff]  ;;  %v750_v22 = vunpack.c.l.s8.bf16 %v564_v15 }
 0x2d4   :  { %1143 = vmatprep.subr.bf16.mxu0 %v678_v23  ;;  %v563_v23 = vld [vmem:[#allocation11 + $0x1f0] sm:$0xff]  ;;  %v747_v24 = vunpack.c.l.s8.bf16 %v561_v21 }
 0x2d5   :  { %v749_v25 = vunpack.c.l.s8.bf16 %v563_v23  ;;  %v757_v32 = vunpack.c.h.s8.bf16 %v563_v23  ;;  %v601_v23 = vld [vmem:[#allocation11 + $0x320] sm:$0xff] }
 0x2d6   :  { %1062 = vmatpush1.bf16.msra.mxu1 %v675_v26  ;;  %v756_v26 = vunpack.c.h.s8.bf16 %v562_v14 }
 0x2d7   :  { %1144 = vmatpush1.bf16.msra.mxu0 %v677_v27  ;;  %1063 = vmatprep.subr.bf16.mxu1 %v684_v28  ;;  %v758_v27 = vunpack.c.h.s8.bf16 %v564_v15  ;;  %v570_v28 = vld [vmem:[#allocation11 + $0x228] sm:$0xff] }
 0x2d8   :  { %1145 = vmatprep.subr.bf16.mxu0 %v686_v30  ;;  %v755_v30 = vunpack.c.h.s8.bf16 %v561_v21 }
 0x2da   :  { %1064 = vmatpush1.bf16.msra.mxu1 %v683_v33  ;;  %v764_v33 = vunpack.c.l.s8.bf16 %v570_v28 }
 0x2db   :  { %1146 = vmatpush1.bf16.msra.mxu0 %v685_v35  ;;  %1065 = vmatprep.subr.bf16.mxu1 %v692_v36  ;;  %v569_v35 = vld [vmem:[#allocation11 + $0x220] sm:$0xff]  ;;  %v766_v36 = vunpack.c.l.s8.bf16 %v572_v29 }
 0x2dc   :  { %1147 = vmatprep.subr.bf16.mxu0 %v694_v37  ;;  %v571_v37 = vld [vmem:[#allocation11 + $0x230] sm:$0xff]  ;;  %v763_v39 = vunpack.c.l.s8.bf16 %v569_v35 }
 0x2dd   :  { %v765_v40 = vunpack.c.l.s8.bf16 %v571_v37  ;;  %v773_v47 = vunpack.c.h.s8.bf16 %v571_v37  ;;  %v609_v37 = vld [vmem:[#allocation11 + $0x360] sm:$0xff] }
 0x2de   :  { %1066 = vmatpush1.bf16.msra.mxu1 %v691_v43  ;;  %v772_v43 = vunpack.c.h.s8.bf16 %v570_v28 }
 0x2df   :  { %1148 = vmatpush1.bf16.msra.mxu0 %v693_v41  ;;  %1067 = vmatprep.subr.bf16.mxu1 %v700_v44  ;;  %v578_v41 = vld [vmem:[#allocation11 + $0x268] sm:$0xff]  ;;  %v774_v44 = vunpack.c.h.s8.bf16 %v572_v29 }
 0x2e0   :  { %1149 = vmatprep.subr.bf16.mxu0 %v702_v46  ;;  %v771_v46 = vunpack.c.h.s8.bf16 %v569_v35 }
 0x2e2   :  { %1068 = vmatpush1.bf16.msra.mxu1 %v699_v48  ;;  %v780_v48 = vunpack.c.l.s8.bf16 %v578_v41 }
 0x2e3   :  { %1150 = vmatpush1.bf16.msra.mxu0 %v701_v49  ;;  %1069 = vmatprep.subr.bf16.mxu1 %v708_v42  ;;  %v577_v49 = vld [vmem:[#allocation11 + $0x260] sm:$0xff]  ;;  %v782_v42 = vunpack.c.l.s8.bf16 %v580_v45 }
 0x2e4   :  { %1151 = vmatprep.subr.bf16.mxu0 %v710_v50  ;;  %v579_v50 = vld [vmem:[#allocation11 + $0x270] sm:$0xff]  ;;  %v779_v51 = vunpack.c.l.s8.bf16 %v577_v49  ;;  %v787_v59 = vunpack.c.h.s8.bf16 %v577_v49 }
 0x2e5   :  { %v781_v52 = vunpack.c.l.s8.bf16 %v579_v50 }
 0x2e6   :  { %1070 = vmatpush1.bf16.msra.mxu1 %v707_v53  ;;  %v790_v53 = vunpack.c.h.s8.bf16 %v580_v45 }
 0x2e7   :  { %1152 = vmatpush1.bf16.msra.mxu0 %v709_v54  ;;  %1071 = vmatprep.subr.bf16.mxu1 %v716_v56  ;;  %v586_v54 = vld [vmem:[#allocation11 + $0x2a8] sm:$0xff]  ;;  %v588_v56 = vld [vmem:[#allocation11 + $0x2b8] sm:$0xff] }
 0x2e8   :  { %1153 = vmatprep.subr.bf16.mxu0 %v718_v62  ;;  %v789_v62 = vunpack.c.h.s8.bf16 %v579_v50  ;;  %v804_v4 = vunpack.c.h.s8.bf16 %v586_v54  ;;  %v806_v5 = vunpack.c.h.s8.bf16 %v588_v56  ;;  %v617_v50 = vld [vmem:[#allocation11 + $0x3a0] sm:$0xff] }
 0x2ea   :  { %1072 = vmatpush1.bf16.msra.mxu1 %v715_v0  ;;  %v798_v0 = vunpack.c.l.s8.bf16 %v588_v56 }
 0x2eb   :  { %1154 = vmatpush1.bf16.msra.mxu0 %v717_v1  ;;  %1073 = vmatprep.subr.bf16.mxu1 %v724_v2  ;;  %v587_v1 = vld [vmem:[#allocation11 + $0x2b0] sm:$0xff]  ;;  %v795_v2 = vunpack.c.l.s8.bf16 %v585_v61 }
 0x2ec   :  { %1155 = vmatprep.subr.bf16.mxu0 %v726_v3  ;;  %v797_v3 = vunpack.c.l.s8.bf16 %v587_v1  ;;  %v805_v8 = vunpack.c.h.s8.bf16 %v587_v1  ;;  %v625_v1 = vld [vmem:[#allocation11 + $0x3e0] sm:$0xff] }
 0x2ee   :  { %1074 = vmatpush1.bf16.msra.mxu1 %v723_v6  ;;  %v594_v6 = vld [vmem:[#allocation11 + $0x2e8] sm:$0xff] }
 0x2ef   :  { %1156 = vmatpush1.bf16.msra.mxu0 %v725_v7  ;;  %1075 = vmatprep.subr.bf16.mxu1 %v732_v57  ;;  %v596_v7 = vld [vmem:[#allocation11 + $0x2f8] sm:$0xff]  ;;  %v803_v57 = vunpack.c.h.s8.bf16 %v585_v61  ;;  %v820_v14 = vunpack.c.h.s8.bf16 %v594_v6 }
 0x2f0   :  { %1157 = vmatprep.subr.bf16.mxu0 %v734_v9  ;;  %v812_v9 = vunpack.c.l.s8.bf16 %v594_v6  ;;  %v822_v15 = vunpack.c.h.s8.bf16 %v596_v7 }
 0x2f2   :  { %1076 = vmatpush1.bf16.msra.mxu1 %v731_v11  ;;  %v814_v11 = vunpack.c.l.s8.bf16 %v596_v7 }
 0x2f3   :  { %1158 = vmatpush1.bf16.msra.mxu0 %v733_v12  ;;  %1077 = vmatprep.subr.bf16.mxu1 %v740_v13  ;;  %v595_v12 = vld [vmem:[#allocation11 + $0x2f0] sm:$0xff]  ;;  %v811_v13 = vunpack.c.l.s8.bf16 %v593_v10 }
 0x2f4   :  { %1159 = vmatprep.subr.bf16.mxu0 %v742_v60  ;;  %v813_v60 = vunpack.c.l.s8.bf16 %v595_v12  ;;  %v821_v21 = vunpack.c.h.s8.bf16 %v595_v12  ;;  %v1329_v12 = vld [vmem:[#allocation13] sm:$0xff] }
 0x2f6   :  { %1078 = vmatpush1.bf16.msra.mxu1 %v739_v18  ;;  %v602_v18 = vld [vmem:[#allocation11 + $0x328] sm:$0xff] }
 0x2f7   :  { %1160 = vmatpush1.bf16.msra.mxu0 %v741_v19  ;;  %1079 = vmatprep.subr.bf16.mxu1 %v748_v20  ;;  %v604_v19 = vld [vmem:[#allocation11 + $0x338] sm:$0xff]  ;;  %v819_v20 = vunpack.c.h.s8.bf16 %v593_v10  ;;  %v836_v28 = vunpack.c.h.s8.bf16 %v602_v18 }
 0x2f8   :  { %1161 = vmatprep.subr.bf16.mxu0 %v750_v22  ;;  %v828_v22 = vunpack.c.l.s8.bf16 %v602_v18  ;;  %v838_v29 = vunpack.c.h.s8.bf16 %v604_v19 }
 0x2fa   :  { %1080 = vmatpush1.bf16.msra.mxu1 %v747_v24  ;;  %v830_v24 = vunpack.c.l.s8.bf16 %v604_v19 }
 0x2fb   :  { %1162 = vmatpush1.bf16.msra.mxu0 %v749_v25  ;;  %1081 = vmatprep.subr.bf16.mxu1 %v756_v26  ;;  %v603_v25 = vld [vmem:[#allocation11 + $0x330] sm:$0xff]  ;;  %v827_v26 = vunpack.c.l.s8.bf16 %v601_v23 }
 0x2fc   :  { %1163 = vmatprep.subr.bf16.mxu0 %v758_v27  ;;  %v829_v27 = vunpack.c.l.s8.bf16 %v603_v25  ;;  %v837_v35 = vunpack.c.h.s8.bf16 %v603_v25  ;;  %v1333_v25 = vld [vmem:[#allocation13 + $0x20] sm:$0xff] }
 0x2fe   :  { %1082 = vmatpush1.bf16.msra.mxu1 %v755_v30  ;;  %v610_v30 = vld [vmem:[#allocation11 + $0x368] sm:$0xff] }
 0x2ff   :  { %1164 = vmatpush1.bf16.msra.mxu0 %v757_v32  ;;  %1092 = vmatprep.subr.bf16.mxu1 %v764_v33  ;;  %v612_v32 = vld [vmem:[#allocation11 + $0x378] sm:$0xff]  ;;  %v835_v33 = vunpack.c.h.s8.bf16 %v601_v23 }
 0x300   :  { %1174 = vmatprep.subr.bf16.mxu0 %v766_v36  ;;  %v844_v36 = vunpack.c.l.s8.bf16 %v610_v30  ;;  %v854_v45 = vunpack.c.h.s8.bf16 %v612_v32 }
 0x301   :  { %1084 = vmatmul.mubr.bf16.vlgmr.msra.gmra.mrb[8].mxu1 %v3036_v63 }
 0x302   :  { %1166 = vmatmul.mubr.bf16.vlgmr.msra.gmra.mrb[12].mxu0 %v3036_v63  ;;  %1093 = vmatpush1.bf16.msra.mxu1 %v763_v39  ;;  %v788_v63 = vunpack.c.h.s8.bf16 %v578_v41  ;;  %v846_v39 = vunpack.c.l.s8.bf16 %v612_v32 }
 0x303   :  { %1124 = vmatprep.mubr.bf16.mxu1 %v3057_v55  ;;  %1175 = vmatpush1.bf16.msra.mxu0 %v765_v40  ;;  %v611_v40 = vld [vmem:[#allocation11 + $0x370] sm:$0xff] }
 0x304   :  { %1206 = vmatprep.mubr.bf16.mxu0 %v3057_v55  ;;  %1094 = vmatprep.subr.bf16.mxu1 %v772_v43  ;;  %v796_v55 = vunpack.c.l.s8.bf16 %v586_v54  ;;  %v843_v43 = vunpack.c.l.s8.bf16 %v609_v37  ;;  %v845_v41 = vunpack.c.l.s8.bf16 %v611_v40  ;;  %v853_v49 = vunpack.c.h.s8.bf16 %v611_v40 }
 0x305   :  { %1176 = vmatprep.subr.bf16.mxu0 %v774_v44  ;;  %v852_v44 = vunpack.c.h.s8.bf16 %v610_v30 }
 0x306   :  { %1095 = vmatpush1.bf16.msra.mxu1 %v771_v46  ;;  %v618_v46 = vld [vmem:[#allocation11 + $0x3a8] sm:$0xff] }
 0x307   :  { %1177 = vmatpush1.bf16.msra.mxu0 %v773_v47  ;;  %1096 = vmatprep.subr.bf16.mxu1 %v780_v48  ;;  %v620_v47 = vld [vmem:[#allocation11 + $0x3b8] sm:$0xff]  ;;  %v851_v48 = vunpack.c.h.s8.bf16 %v609_v37  ;;  %v868_v54 = vunpack.c.h.s8.bf16 %v618_v46 }
 0x308   :  { %1178 = vmatprep.subr.bf16.mxu0 %v782_v42  ;;  %v860_v42 = vunpack.c.l.s8.bf16 %v618_v46  ;;  %v870_v56 = vunpack.c.h.s8.bf16 %v620_v47 }
 0x30a   :  { %1097 = vmatpush1.bf16.msra.mxu1 %v779_v51  ;;  %v862_v51 = vunpack.c.l.s8.bf16 %v620_v47  ;;  %v1342_v47 = vld [vmem:[#allocation13 + $0x68] sm:$0xff] }
 0x30b   :  { %1179 = vmatpush1.bf16.msra.mxu0 %v781_v52  ;;  %1098 = vmatprep.subr.bf16.mxu1 %v788_v63  ;;  %v619_v52 = vld [vmem:[#allocation11 + $0x3b0] sm:$0xff]  ;;  %v859_v63 = vunpack.c.l.s8.bf16 %v617_v50 }
 0x30c   :  { %1180 = vmatprep.subr.bf16.mxu0 %v790_v53  ;;  %v861_v53 = vunpack.c.l.s8.bf16 %v619_v52  ;;  %v869_v61 = vunpack.c.h.s8.bf16 %v619_v52 }
 0x30e   :  { %1099 = vmatpush1.bf16.msra.mxu1 %v787_v59  ;;  %v626_v59 = vld [vmem:[#allocation11 + $0x3e8] sm:$0xff] }
 0x30f   :  { %1181 = vmatpush1.bf16.msra.mxu0 %v789_v62  ;;  %1100 = vmatprep.subr.bf16.mxu1 %v796_v55  ;;  %v628_v62 = vld [vmem:[#allocation11 + $0x3f8] sm:$0xff]  ;;  %v867_v55 = vunpack.c.h.s8.bf16 %v617_v50  ;;  %v884_v6 = vunpack.c.h.s8.bf16 %v626_v59  ;;  %v1484_v50 = vunpack.c.l.s8.bf16 %v1342_v47 }
 0x310   :  { %1182 = vmatprep.subr.bf16.mxu0 %v798_v0  ;;  %v876_v0 = vunpack.c.l.s8.bf16 %v626_v59  ;;  %v886_v7 = vunpack.c.h.s8.bf16 %v628_v62 }
 0x312   :  { %1101 = vmatpush1.bf16.msra.mxu1 %v795_v2  ;;  %v878_v2 = vunpack.c.l.s8.bf16 %v628_v62  ;;  %v1346_v62 = vld [vmem:[#allocation13 + $0x88] sm:$0xff] }
 0x313   :  { %1183 = vmatpush1.bf16.msra.mxu0 %v797_v3  ;;  %1102 = vmatprep.subr.bf16.mxu1 %v804_v4  ;;  %v627_v3 = vld [vmem:[#allocation11 + $0x3f0] sm:$0xff]  ;;  %v875_v4 = vunpack.c.l.s8.bf16 %v625_v1 }
 0x314   :  { %1184 = vmatprep.subr.bf16.mxu0 %v806_v5  ;;  %v877_v5 = vunpack.c.l.s8.bf16 %v627_v3  ;;  %v885_v10 = vunpack.c.h.s8.bf16 %v627_v3 }
 0x316   :  { %1103 = vmatpush1.bf16.msra.mxu1 %v803_v57  ;;  %v1330_v57 = vld [vmem:[#allocation13 + $0x8] sm:$0xff] }
 0x317   :  { %1185 = vmatpush1.bf16.msra.mxu0 %v805_v8  ;;  %1104 = vmatprep.subr.bf16.mxu1 %v812_v9  ;;  %v1332_v8 = vld [vmem:[#allocation13 + $0x18] sm:$0xff]  ;;  %v883_v9 = vunpack.c.h.s8.bf16 %v625_v1  ;;  %v1464_v18 = vunpack.c.h.s8.bf16 %v1330_v57  ;;  %v1492_v1 = vunpack.c.l.s8.bf16 %v1346_v62 }
 0x318   :  { %1186 = vmatprep.subr.bf16.mxu0 %v814_v11  ;;  %v1460_v11 = vunpack.c.l.s8.bf16 %v1330_v57  ;;  %v1466_v19 = vunpack.c.h.s8.bf16 %v1332_v8 }
 0x31a   :  { %1105 = vmatpush1.bf16.msra.mxu1 %v811_v13  ;;  %v1462_v13 = vunpack.c.l.s8.bf16 %v1332_v8  ;;  %v1350_v8 = vld [vmem:[#allocation13 + $0xa8] sm:$0xff] }
 0x31b   :  { %1187 = vmatpush1.bf16.msra.mxu0 %v813_v60  ;;  %1106 = vmatprep.subr.bf16.mxu1 %v820_v14  ;;  %v1331_v60 = vld [vmem:[#allocation13 + $0x10] sm:$0xff]  ;;  %v1459_v14 = vunpack.c.l.s8.bf16 %v1329_v12 }
 0x31c   :  { %1188 = vmatprep.subr.bf16.mxu0 %v822_v15  ;;  %v1461_v15 = vunpack.c.l.s8.bf16 %v1331_v60  ;;  %v1465_v23 = vunpack.c.h.s8.bf16 %v1331_v60 }
 0x31e   :  { %1107 = vmatpush1.bf16.msra.mxu1 %v819_v20  ;;  %v1334_v20 = vld [vmem:[#allocation13 + $0x28] sm:$0xff] }
 0x31f   :  { %1189 = vmatpush1.bf16.msra.mxu0 %v821_v21  ;;  %1108 = vmatprep.subr.bf16.mxu1 %v828_v22  ;;  %v1336_v21 = vld [vmem:[#allocation13 + $0x38] sm:$0xff]  ;;  %v1463_v22 = vunpack.c.h.s8.bf16 %v1329_v12  ;;  %v1472_v30 = vunpack.c.h.s8.bf16 %v1334_v20  ;;  %v1500_v12 = vunpack.c.l.s8.bf16 %v1350_v8 }
 0x320   :  { %1190 = vmatprep.subr.bf16.mxu0 %v830_v24  ;;  %v1468_v24 = vunpack.c.l.s8.bf16 %v1334_v20  ;;  %v1474_v32 = vunpack.c.h.s8.bf16 %v1336_v21 }
 0x322   :  { %1109 = vmatpush1.bf16.msra.mxu1 %v827_v26  ;;  %v1470_v26 = vunpack.c.l.s8.bf16 %v1336_v21  ;;  %v1354_v21 = vld [vmem:[#allocation13 + $0xc8] sm:$0xff] }
 0x323   :  { %1191 = vmatpush1.bf16.msra.mxu0 %v829_v27  ;;  %1110 = vmatprep.subr.bf16.mxu1 %v836_v28  ;;  %v1335_v27 = vld [vmem:[#allocation13 + $0x30] sm:$0xff]  ;;  %v1467_v28 = vunpack.c.l.s8.bf16 %v1333_v25 }
 0x324   :  { %1192 = vmatprep.subr.bf16.mxu0 %v838_v29  ;;  %v1469_v29 = vunpack.c.l.s8.bf16 %v1335_v27 }
 0x326   :  { %1111 = vmatpush1.bf16.msra.mxu1 %v835_v33  ;;  %v1338_v33 = vld [vmem:[#allocation13 + $0x48] sm:$0xff] }
 0x327   :  { %1193 = vmatpush1.bf16.msra.mxu0 %v837_v35  ;;  %1112 = vmatprep.subr.bf16.mxu1 %v844_v36  ;;  %v1471_v35 = vunpack.c.h.s8.bf16 %v1333_v25  ;;  %v1473_v36 = vunpack.c.h.s8.bf16 %v1335_v27  ;;  %v1476_v37 = vunpack.c.l.s8.bf16 %v1338_v33  ;;  %v1508_v25 = vunpack.c.l.s8.bf16 %v1354_v21 }
 0x328   :  { %1194 = vmatprep.subr.bf16.mxu0 %v846_v39  ;;  %v1337_v39 = vld [vmem:[#allocation13 + $0x40] sm:$0xff] }
 0x32a   :  { %1113 = vmatpush1.bf16.msra.mxu1 %v843_v43  ;;  %v1339_v43 = vld [vmem:[#allocation13 + $0x50] sm:$0xff] }
 0x32b   :  { %1195 = vmatpush1.bf16.msra.mxu0 %v845_v41  ;;  %1114 = vmatprep.subr.bf16.mxu1 %v852_v44  ;;  %v1475_v41 = vunpack.c.l.s8.bf16 %v1337_v39  ;;  %v1477_v44 = vunpack.c.l.s8.bf16 %v1339_v43 }
 0x32c   :  { %1196 = vmatprep.subr.bf16.mxu0 %v854_v45  ;;  %v1480_v45 = vunpack.c.h.s8.bf16 %v1338_v33 }
 0x32e   :  { %1115 = vmatpush1.bf16.msra.mxu1 %v851_v48  ;;  %v1344_v48 = vld [vmem:[#allocation13 + $0x78] sm:$0xff] }
 0x32f   :  { %1197 = vmatpush1.bf16.msra.mxu0 %v853_v49  ;;  %1116 = vmatprep.subr.bf16.mxu1 %v860_v42  ;;  %v1479_v49 = vunpack.c.h.s8.bf16 %v1337_v39  ;;  %v1481_v42 = vunpack.c.h.s8.bf16 %v1339_v43  ;;  %v1486_v52 = vunpack.c.l.s8.bf16 %v1344_v48  ;;  %v1490_v59 = vunpack.c.h.s8.bf16 %v1344_v48  ;;  %v3073_v48 = vld [vmem:[#allocation13 + $0x108] sm:$0xff] }
 0x330   :  { %1198 = vmatprep.subr.bf16.mxu0 %v862_v51  ;;  %v1341_v51 = vld [vmem:[#allocation13 + $0x60] sm:$0xff] }
 0x332   :  { %1117 = vmatpush1.bf16.msra.mxu1 %v859_v63  ;;  %v1343_v63 = vld [vmem:[#allocation13 + $0x70] sm:$0xff] }
 0x333   :  { %1199 = vmatpush1.bf16.msra.mxu0 %v861_v53  ;;  %1118 = vmatprep.subr.bf16.mxu1 %v868_v54  ;;  %v1483_v53 = vunpack.c.l.s8.bf16 %v1341_v51  ;;  %v1485_v54 = vunpack.c.l.s8.bf16 %v1343_v63 }
 0x334   :  { %1200 = vmatprep.subr.bf16.mxu0 %v870_v56  ;;  %v1488_v56 = vunpack.c.h.s8.bf16 %v1342_v47 }
 0x336   :  { %1119 = vmatpush1.bf16.msra.mxu1 %v867_v55  ;;  %v1348_v55 = vld [vmem:[#allocation13 + $0x98] sm:$0xff] }
 0x337   :  { %1201 = vmatpush1.bf16.msra.mxu0 %v869_v61  ;;  %1120 = vmatprep.subr.bf16.mxu1 %v876_v0  ;;  %v1487_v61 = vunpack.c.h.s8.bf16 %v1341_v51  ;;  %v1489_v0 = vunpack.c.h.s8.bf16 %v1343_v63  ;;  %v1494_v3 = vunpack.c.l.s8.bf16 %v1348_v55  ;;  %v1498_v57 = vunpack.c.h.s8.bf16 %v1348_v55  ;;  %v3082_v63 = vld [vmem:[%s3190_s8] sm:$0xff] }
 0x338   :  { %1202 = vmatprep.subr.bf16.mxu0 %v878_v2  ;;  %v1345_v2 = vld [vmem:[#allocation13 + $0x80] sm:$0xff]  ;;  %v1524_v51 = vunpack.c.l.s8.bf16 %v3073_v48 }
 0x33a   :  { %1121 = vmatpush1.bf16.msra.mxu1 %v875_v4  ;;  %v1347_v4 = vld [vmem:[#allocation13 + $0x90] sm:$0xff] }
 0x33b   :  { %1203 = vmatpush1.bf16.msra.mxu0 %v877_v5  ;;  %1122 = vmatprep.subr.bf16.mxu1 %v884_v6  ;;  %v1491_v5 = vunpack.c.l.s8.bf16 %v1345_v2  ;;  %v1493_v6 = vunpack.c.l.s8.bf16 %v1347_v4 }
 0x33c   :  { %1204 = vmatprep.subr.bf16.mxu0 %v886_v7  ;;  %v1496_v7 = vunpack.c.h.s8.bf16 %v1346_v62 }
 0x33e   :  { %1123 = vmatpush1.bf16.msra.mxu1 %v883_v9  ;;  %v1352_v9 = vld [vmem:[#allocation13 + $0xb8] sm:$0xff] }
 0x33f   :  { %1205 = vmatpush1.bf16.msra.mxu0 %v885_v10  ;;  %1715 = vmatprep.subr.bf16.mxu1 %v1460_v11  ;;  %v1495_v10 = vunpack.c.h.s8.bf16 %v1345_v2  ;;  %v1497_v11 = vunpack.c.h.s8.bf16 %v1347_v4  ;;  %v1502_v60 = vunpack.c.l.s8.bf16 %v1352_v9  ;;  %v1506_v20 = vunpack.c.h.s8.bf16 %v1352_v9 }
 0x340   :  { %1879 = vmatprep.subr.bf16.mxu0 %v1462_v13  ;;  %v1349_v13 = vld [vmem:[#allocation13 + $0xa0] sm:$0xff] }
 0x341   :  { %1125 = vmatmul.mubr.bf16.vlgmr.msra.gmra.mrb[8].mxu1 %v3059_v58 }
 0x342   :  { %1207 = vmatmul.mubr.bf16.vlgmr.msra.gmra.mrb[12].mxu0 %v3059_v58  ;;  %1716 = vmatpush1.bf16.msra.mxu1 %v1459_v14  ;;  %v1340_v58 = vld [vmem:[#allocation13 + $0x58] sm:$0xff]  ;;  %v1351_v14 = vld [vmem:[#allocation13 + $0xb0] sm:$0xff] }
 0x343   :  { %1880 = vmatpush1.bf16.msra.mxu0 %v1461_v15  ;;  %1717 = vmatprep.subr.bf16.mxu1 %v1464_v18  ;;  %v1478_v40 = vunpack.c.l.s8.bf16 %v1340_v58  ;;  %v1482_v46 = vunpack.c.h.s8.bf16 %v1340_v58  ;;  %v1499_v15 = vunpack.c.l.s8.bf16 %v1349_v13  ;;  %v1501_v18 = vunpack.c.l.s8.bf16 %v1351_v14  ;;  %v1358_v58 = vld [vmem:[#allocation13 + $0xe8] sm:$0xff] }
 0x344   :  { %1881 = vmatprep.subr.bf16.mxu0 %v1466_v19  ;;  %v1504_v19 = vunpack.c.h.s8.bf16 %v1350_v8  ;;  %v1516_v39 = vunpack.c.l.s8.bf16 %v1358_v58 }
 0x346   :  { %1718 = vmatpush1.bf16.msra.mxu1 %v1463_v22  ;;  %v1356_v22 = vld [vmem:[#allocation13 + $0xd8] sm:$0xff] }
 0x347   :  { %1882 = vmatpush1.bf16.msra.mxu0 %v1465_v23  ;;  %1719 = vmatprep.subr.bf16.mxu1 %v1468_v24  ;;  %v1503_v23 = vunpack.c.h.s8.bf16 %v1349_v13  ;;  %v1505_v24 = vunpack.c.h.s8.bf16 %v1351_v14  ;;  %v1510_v27 = vunpack.c.l.s8.bf16 %v1356_v22  ;;  %v1514_v33 = vunpack.c.h.s8.bf16 %v1356_v22  ;;  %v1363_v14 = vld [vmem:[#allocation13 + $0x110] sm:$0xff] }
 0x348   :  { %1883 = vmatprep.subr.bf16.mxu0 %v1470_v26  ;;  %v1353_v26 = vld [vmem:[#allocation13 + $0xc0] sm:$0xff] }
 0x34a   :  { %1720 = vmatpush1.bf16.msra.mxu1 %v1467_v28  ;;  %v1355_v28 = vld [vmem:[#allocation13 + $0xd0] sm:$0xff] }
 0x34b   :  { %1884 = vmatpush1.bf16.msra.mxu0 %v1469_v29  ;;  %1721 = vmatprep.subr.bf16.mxu1 %v1472_v30  ;;  %v1507_v29 = vunpack.c.l.s8.bf16 %v1353_v26  ;;  %v1509_v30 = vunpack.c.l.s8.bf16 %v1355_v28 }
 0x34c   :  { %1885 = vmatprep.subr.bf16.mxu0 %v1474_v32  ;;  %v1512_v32 = vunpack.c.h.s8.bf16 %v1354_v21  ;;  %v1525_v21 = vunpack.c.l.s8.bf16 %v1363_v14 }
 0x34e   :  { %1722 = vmatpush1.bf16.msra.mxu1 %v1471_v35  ;;  %v1360_v35 = vld [vmem:[#allocation13 + $0xf8] sm:$0xff] }
 0x34f   :  { %1886 = vmatpush1.bf16.msra.mxu0 %v1473_v36  ;;  %1723 = vmatprep.subr.bf16.mxu1 %v1476_v37  ;;  %v1511_v36 = vunpack.c.h.s8.bf16 %v1353_v26  ;;  %v1513_v37 = vunpack.c.h.s8.bf16 %v1355_v28  ;;  %v1518_v43 = vunpack.c.l.s8.bf16 %v1360_v35  ;;  %v1522_v47 = vunpack.c.h.s8.bf16 %v1360_v35  ;;  %v1368_v26 = vld [vmem:[#allocation13 + $0x138] sm:$0xff] }
 0x350   :  { %1887 = vmatprep.subr.bf16.mxu0 %v1478_v40  ;;  %v1357_v40 = vld [vmem:[#allocation13 + $0xe0] sm:$0xff] }
 0x352   :  { %1724 = vmatpush1.bf16.msra.mxu1 %v1475_v41  ;;  %v1359_v41 = vld [vmem:[#allocation13 + $0xf0] sm:$0xff] }
 0x353   :  { %1888 = vmatpush1.bf16.msra.mxu0 %v1477_v44  ;;  %1725 = vmatprep.subr.bf16.mxu1 %v1480_v45  ;;  %v1515_v44 = vunpack.c.l.s8.bf16 %v1357_v40  ;;  %v1517_v45 = vunpack.c.l.s8.bf16 %v1359_v41 }
 0x354   :  { %1889 = vmatprep.subr.bf16.mxu0 %v1482_v46  ;;  %v1520_v46 = vunpack.c.h.s8.bf16 %v1358_v58  ;;  %v1367_v58 = vld [vmem:[#allocation13 + $0x130] sm:$0xff] }
 0x356   :  { %1726 = vmatpush1.bf16.msra.mxu1 %v1479_v49  ;;  %v3075_v49 = vld [vmem:[#allocation13 + $0x118] sm:$0xff] }
 0x357   :  { %1890 = vmatpush1.bf16.msra.mxu0 %v1481_v42  ;;  %1727 = vmatprep.subr.bf16.mxu1 %v1484_v50  ;;  %v1519_v42 = vunpack.c.h.s8.bf16 %v1357_v40  ;;  %v1521_v50 = vunpack.c.h.s8.bf16 %v1359_v41  ;;  %v1370_v40 = vld [vmem:[#allocation13 + $0x148] sm:$0xff] }
 0x358   :  { %1891 = vmatprep.subr.bf16.mxu0 %v1486_v52  ;;  %v1526_v52 = vunpack.c.l.s8.bf16 %v3075_v49 }
 0x35a   :  { %1728 = vmatpush1.bf16.msra.mxu1 %v1483_v53  ;;  %v3087_v53 = vld [vmem:[%s3191_s9] sm:$0xff] }
 0x35b   :  { %1892 = vmatpush1.bf16.msra.mxu0 %v1485_v54  ;;  %1729 = vmatprep.subr.bf16.mxu1 %v1488_v56  ;;  %v1219_v54 = vrot.slane %v3082_v63, %v2999_v34  ;;  %v1223_v56 = vrot.slane %v3082_v63, %v3005_v38  ;;  %v1268_v62 = vrot.slane %v3087_v53, %v2999_v34 }
 0x35c   :  { %1893 = vmatprep.subr.bf16.mxu0 %v1490_v59  ;;  %v1231_v59 = vrot.slane %v3082_v63, %v3047_v17 }
 0x35e   :  { %1730 = vmatpush1.bf16.msra.mxu1 %v1487_v61 }
 0x35f   :  { %1894 = vmatpush1.bf16.msra.mxu0 %v1489_v0  ;;  %1731 = vmatprep.subr.bf16.mxu1 %v1492_v1  ;;  %v1272_v0 = vrot.slane %v3087_v53, %v3005_v38  ;;  %v1280_v1 = vrot.slane %v3087_v53, %v3047_v17 }
 0x360   :  { %1895 = vmatprep.subr.bf16.mxu0 %v1494_v3 }
 0x362   :  { %1732 = vmatpush1.bf16.msra.mxu1 %v1491_v5 }
 0x363   :  { %1896 = vmatpush1.bf16.msra.mxu0 %v1493_v6  ;;  %1733 = vmatprep.subr.bf16.mxu1 %v1496_v7 }
 0x364   :  { %1897 = vmatprep.subr.bf16.mxu0 %v1498_v57 }
 0x366   :  { %1734 = vmatpush1.bf16.msra.mxu1 %v1495_v10 }
 0x367   :  { %1898 = vmatpush1.bf16.msra.mxu0 %v1497_v11  ;;  %1735 = vmatprep.subr.bf16.mxu1 %v1500_v12 }
 0x368   :  { %1899 = vmatprep.subr.bf16.mxu0 %v1502_v60  ;;  %v1361_v60 = vld [vmem:[#allocation13 + $0x100] sm:$0xff] }
 0x369   :  { %v1527_v28 = vunpack.c.h.s8.bf16 %v1361_v60 }
 0x36a   :  { %1736 = vmatpush1.bf16.msra.mxu1 %v1499_v15 }
 0x36b   :  { %1900 = vmatpush1.bf16.msra.mxu0 %v1501_v18  ;;  %1737 = vmatprep.subr.bf16.mxu1 %v1504_v19 }
 0x36c   :  { %1901 = vmatprep.subr.bf16.mxu0 %v1506_v20  ;;  %v1523_v20 = vunpack.c.l.s8.bf16 %v1361_v60 }
 0x36e   :  { %1738 = vmatpush1.bf16.msra.mxu1 %v1503_v23  ;;  %v1528_v23 = vunpack.c.h.s8.bf16 %v3073_v48  ;;  %v1371_v48 = vld [vmem:[#allocation13 + $0x150] sm:$0xff] }
 0x36f   :  { %1902 = vmatpush1.bf16.msra.mxu0 %v1505_v24  ;;  %1739 = vmatprep.subr.bf16.mxu1 %v1508_v25  ;;  %v1530_v24 = vunpack.c.h.s8.bf16 %v3075_v49  ;;  %v1366_v25 = vld [vmem:[#allocation13 + $0x128] sm:$0xff] }
 0x370   :  { %1903 = vmatprep.subr.bf16.mxu0 %v1510_v27 }
 0x372   :  { %1740 = vmatpush1.bf16.msra.mxu1 %v1507_v29  ;;  %v1529_v29 = vunpack.c.h.s8.bf16 %v1363_v14 }
 0x373   :  { %1904 = vmatpush1.bf16.msra.mxu0 %v1509_v30  ;;  %1741 = vmatprep.subr.bf16.mxu1 %v1512_v32  ;;  %v1532_v30 = vunpack.c.l.s8.bf16 %v1366_v25  ;;  %v1534_v32 = vunpack.c.l.s8.bf16 %v1368_v26 }
 0x374   :  { %1905 = vmatprep.subr.bf16.mxu0 %v1514_v33  ;;  %v1365_v33 = vld [vmem:[#allocation13 + $0x120] sm:$0xff] }
 0x375   :  { %v1531_v35 = vunpack.c.l.s8.bf16 %v1365_v33  ;;  %v1535_v41 = vunpack.c.h.s8.bf16 %v1365_v33 }
 0x376   :  { %1742 = vmatpush1.bf16.msra.mxu1 %v1511_v36  ;;  %v1533_v36 = vunpack.c.l.s8.bf16 %v1367_v58 }
 0x377   :  { %1906 = vmatpush1.bf16.msra.mxu0 %v1513_v37  ;;  %1743 = vmatprep.subr.bf16.mxu1 %v1516_v39  ;;  %v1536_v37 = vunpack.c.h.s8.bf16 %v1366_v25  ;;  %v1538_v39 = vunpack.c.h.s8.bf16 %v1368_v26  ;;  %v1383_v25 = vld [vmem:[#allocation13 + $0x1b0] sm:$0xff] }
 0x378   :  { %1907 = vmatprep.subr.bf16.mxu0 %v1518_v43  ;;  %v1372_v43 = vld [vmem:[#allocation13 + $0x158] sm:$0xff] }
 0x37a   :  { %1744 = vmatpush1.bf16.msra.mxu1 %v1515_v44  ;;  %v1537_v44 = vunpack.c.h.s8.bf16 %v1367_v58  ;;  %v1569_v58 = vunpack.c.h.s8.bf16 %v1383_v25 }
 0x37b   :  { %1908 = vmatpush1.bf16.msra.mxu0 %v1517_v45  ;;  %1745 = vmatprep.subr.bf16.mxu1 %v1520_v46  ;;  %v1540_v45 = vunpack.c.l.s8.bf16 %v1370_v40  ;;  %v1542_v46 = vunpack.c.l.s8.bf16 %v1372_v43 }
 0x37c   :  { %1909 = vmatprep.subr.bf16.mxu0 %v1522_v47  ;;  %v1369_v47 = vld [vmem:[#allocation13 + $0x140] sm:$0xff] }
 0x37d   :  { %v1539_v49 = vunpack.c.l.s8.bf16 %v1369_v47 }
 0x37e   :  { %1746 = vmatpush1.bf16.msra.mxu1 %v1519_v42  ;;  %v1541_v42 = vunpack.c.l.s8.bf16 %v1371_v48 }
 0x37f   :  { %1910 = vmatpush1.bf16.msra.mxu0 %v1521_v50  ;;  %1756 = vmatprep.subr.bf16.mxu1 %v1524_v51  ;;  %v1544_v50 = vunpack.c.h.s8.bf16 %v1370_v40  ;;  %v1546_v51 = vunpack.c.h.s8.bf16 %v1372_v43 }
 0x380   :  { %1920 = vmatprep.subr.bf16.mxu0 %v1526_v52  ;;  %v1374_v52 = vld [vmem:[#allocation13 + $0x168] sm:$0xff] }
 0x394   :  { %v962_v55 = vpop.f32.mrb[4].mxu1  ;;  %v3097_v61 = vpop.f32.mrb[8].mxu0 }
 0x395   :  { %v1256_v2 = vmul.f32 %v1219_v54, %v962_v55  ;;  %v964_v3 = vpop.f32.mrb[5].mxu1  ;;  %v1046_v4 = vpop.f32.mrb[9].mxu0  ;;  %v1376_v54 = vld [vmem:[#allocation13 + $0x178] sm:$0xff] }
 0x396   :  { %v1257_v5 = vmul.f32 %v1223_v56, %v964_v3  ;;  %v1259_v6 = vmul.f32 %v1231_v59, %v1046_v4  ;;  %v966_v7 = vpop.f32.mrb[6].mxu1  ;;  %v1048_v57 = vpop.f32.mrb[10].mxu0  ;;  %v1543_v56 = vunpack.c.h.s8.bf16 %v1369_v47  ;;  %v1545_v59 = vunpack.c.h.s8.bf16 %v1371_v48  ;;  %v1392_v47 = vld [vmem:[#allocation13 + $0x1f8] sm:$0xff] }
 0x397   :  { %v1305_v8 = vadd.f32 %v1268_v62, %v1256_v2  ;;  %v967_v9 = vpop.f32.mrb[7].mxu1  ;;  %v1049_v10 = vpop.f32.mrb[11].mxu0  ;;  %v1548_v62 = vunpack.c.l.s8.bf16 %v1374_v52  ;;  %v1550_v55 = vunpack.c.l.s8.bf16 %v1376_v54  ;;  %v1552_v4 = vunpack.c.h.s8.bf16 %v1374_v52  ;;  %v1380_v7 = vld [vmem:[#allocation13 + $0x198] sm:$0xff] }
 0x398   :  { %v1306_v11 = vadd.f32 %v1272_v0, %v1257_v5  ;;  %v1308_v12 = vadd.f32 %v1280_v1, %v1259_v6  ;;  %v1373_v0 = vld [vmem:[#allocation13 + $0x160] sm:$0xff]  ;;  %v1375_v1 = vld [vmem:[#allocation13 + $0x170] sm:$0xff]  ;;  %v1554_v5 = vunpack.c.h.s8.bf16 %v1376_v54  ;;  %v1378_v6 = vld [vmem:[#allocation13 + $0x188] sm:$0xff]  ;;  %v1558_v10 = vunpack.c.l.s8.bf16 %v1380_v7 }
 0x399   :  { %v1313_v13 = vmax.f32 %v1305_v8, 0.0  ;;  %v1547_v2 = vunpack.c.l.s8.bf16 %v1373_v0  ;;  %v1549_v3 = vunpack.c.l.s8.bf16 %v1375_v1  ;;  %v1551_v57 = vunpack.c.h.s8.bf16 %v1373_v0  ;;  %v1389_v54 = vld [vmem:[#allocation13 + $0x1e0] sm:$0xff] }
 0x39a   :  { %v1314_v15 = vmax.f32 %v1306_v11, 0.0  ;;  %v1316_v18 = vmax.f32 %v1308_v12, 0.0  ;;  %v1553_v8 = vunpack.c.h.s8.bf16 %v1375_v1  ;;  %v1556_v9 = vunpack.c.l.s8.bf16 %v1378_v6  ;;  %v1377_v11 = vld [vmem:[#allocation13 + $0x180] sm:$0xff]  ;;  %v1379_v12 = vld [vmem:[#allocation13 + $0x190] sm:$0xff] }
 0x39b   :  { %v1321_v22 = vpack.c.bf16 %v1313_v13, %v1313_v13  ;;  %v1555_v13 = vunpack.c.l.s8.bf16 %v1377_v11  ;;  %v1557_v60 = vunpack.c.l.s8.bf16 %v1379_v12  ;;  %v1560_v14 = vunpack.c.h.s8.bf16 %v1378_v6 }
 0x39c   :  { %v1322_v19 = vpack.c.bf16 %v1314_v15, %v1314_v15  ;;  %v1324_v27 = vpack.c.bf16 %v1316_v18, %v1316_v18  ;;  %v1562_v15 = vunpack.c.h.s8.bf16 %v1380_v7  ;;  %v1382_v18 = vld [vmem:[#allocation13 + $0x1a8] sm:$0xff]  ;;  %v1582_v52 = vunpack.c.l.s8.bf16 %v1392_v47 }
 0x39d   :  { %v1586_v1 = vunpack.c.h.s8.bf16 %v1392_v47 }
 0x39e   :  { %1747 = vmatprep.mubr.bf16.mxu1 %v1322_v19  ;;  %1911 = vmatprep.mubr.bf16.mxu0 %v1322_v19  ;;  %v1384_v19 = vld [vmem:[#allocation13 + $0x1b8] sm:$0xff] }
 0x39f   :  { %1748 = vmatmul.mubr.bf16.vlgmr.msra.gmra.mrb[12].mxu1 %v1321_v22  ;;  %1912 = vmatmul.mubr.bf16.vlgmr.msra.gmra.mrb[16].mxu0 %v1321_v22  ;;  %v1564_v22 = vunpack.c.l.s8.bf16 %v1382_v18 }
 0x3a0   :  { %1757 = vmatpush1.bf16.msra.mxu1 %v1523_v20  ;;  %1921 = vmatpush1.bf16.msra.mxu0 %v1525_v21  ;;  %v1559_v20 = vunpack.c.h.s8.bf16 %v1377_v11  ;;  %v1561_v21 = vunpack.c.h.s8.bf16 %v1379_v12 }
 0x3a1   :  { %1788 = vmatprep.mubr.bf16.mxu1 %v1324_v27  ;;  %1952 = vmatprep.mubr.bf16.mxu0 %v1324_v27  ;;  %v1565_v27 = vunpack.c.l.s8.bf16 %v1383_v25 }
 0x3a2   :  { %1758 = vmatprep.subr.bf16.mxu1 %v1528_v23  ;;  %1922 = vmatprep.subr.bf16.mxu0 %v1530_v24  ;;  %v1566_v23 = vunpack.c.l.s8.bf16 %v1384_v19  ;;  %v1381_v24 = vld [vmem:[#allocation13 + $0x1a0] sm:$0xff] }
 0x3a3   :  { %v1563_v26 = vunpack.c.l.s8.bf16 %v1381_v24  ;;  %v1567_v33 = vunpack.c.h.s8.bf16 %v1381_v24 }
 0x3a4   :  { %1759 = vmatpush1.bf16.msra.mxu1 %v1527_v28  ;;  %1923 = vmatpush1.bf16.msra.mxu0 %v1529_v29  ;;  %v1568_v28 = vunpack.c.h.s8.bf16 %v1382_v18  ;;  %v1570_v29 = vunpack.c.h.s8.bf16 %v1384_v19 }
 0x3a5   :  { %1760 = vmatprep.subr.bf16.mxu1 %v1532_v30  ;;  %1924 = vmatprep.subr.bf16.mxu0 %v1534_v32  ;;  %v1386_v30 = vld [vmem:[#allocation13 + $0x1c8] sm:$0xff]  ;;  %v1388_v32 = vld [vmem:[#allocation13 + $0x1d8] sm:$0xff] }
 0x3a8   :  { %1761 = vmatpush1.bf16.msra.mxu1 %v1531_v35  ;;  %1925 = vmatpush1.bf16.msra.mxu0 %v1533_v36  ;;  %v1572_v35 = vunpack.c.l.s8.bf16 %v1386_v30  ;;  %v1574_v36 = vunpack.c.l.s8.bf16 %v1388_v32 }
 0x3a9   :  { %1762 = vmatprep.subr.bf16.mxu1 %v1536_v37  ;;  %1926 = vmatprep.subr.bf16.mxu0 %v1538_v39  ;;  %v1385_v37 = vld [vmem:[#allocation13 + $0x1c0] sm:$0xff]  ;;  %v1387_v39 = vld [vmem:[#allocation13 + $0x1d0] sm:$0xff] }
 0x3aa   :  { %v1571_v40 = vunpack.c.l.s8.bf16 %v1385_v37  ;;  %v1573_v43 = vunpack.c.l.s8.bf16 %v1387_v39  ;;  %v1575_v48 = vunpack.c.h.s8.bf16 %v1385_v37 }
 0x3ac   :  { %1763 = vmatpush1.bf16.msra.mxu1 %v1535_v41  ;;  %1927 = vmatpush1.bf16.msra.mxu0 %v1537_v44  ;;  %v1227_v41 = vrot.slane %v3082_v63, %v3044_v16  ;;  %v1576_v44 = vunpack.c.h.s8.bf16 %v1386_v30 }
 0x3ad   :  { %1764 = vmatprep.subr.bf16.mxu1 %v1540_v45  ;;  %1928 = vmatprep.subr.bf16.mxu0 %v1542_v46  ;;  %v1578_v45 = vunpack.c.h.s8.bf16 %v1388_v32  ;;  %v1390_v46 = vld [vmem:[#allocation13 + $0x1e8] sm:$0xff] }
 0x3ae   :  { %v1584_v0 = vunpack.c.h.s8.bf16 %v1390_v46 }
 0x3b0   :  { %1765 = vmatpush1.bf16.msra.mxu1 %v1539_v49  ;;  %1929 = vmatpush1.bf16.msra.mxu0 %v1541_v42  ;;  %v1577_v49 = vunpack.c.h.s8.bf16 %v1387_v39  ;;  %v1258_v42 = vmul.f32 %v1227_v41, %v3097_v61  ;;  %v1396_v61 = vld [vmem:[#allocation13 + $0x218] sm:$0xff] }
 0x3b1   :  { %1766 = vmatprep.subr.bf16.mxu1 %v1544_v50  ;;  %1930 = vmatprep.subr.bf16.mxu0 %v1546_v51  ;;  %v1276_v50 = vrot.slane %v3087_v53, %v3044_v16  ;;  %v1580_v51 = vunpack.c.l.s8.bf16 %v1390_v46  ;;  %v1590_v7 = vunpack.c.l.s8.bf16 %v1396_v61  ;;  %v1408_v41 = vld [vmem:[#allocation13 + $0x278] sm:$0xff] }
 0x3b2   :  { %v1614_v47 = vunpack.c.l.s8.bf16 %v1408_v41 }
 0x3b4   :  { %1767 = vmatpush1.bf16.msra.mxu1 %v1543_v56  ;;  %1931 = vmatpush1.bf16.msra.mxu0 %v1545_v59  ;;  %v1391_v56 = vld [vmem:[#allocation13 + $0x1f0] sm:$0xff]  ;;  %v1579_v59 = vunpack.c.l.s8.bf16 %v1389_v54 }
 0x3b5   :  { %1768 = vmatprep.subr.bf16.mxu1 %v1548_v62  ;;  %1932 = vmatprep.subr.bf16.mxu0 %v1550_v55  ;;  %v1581_v62 = vunpack.c.l.s8.bf16 %v1391_v56  ;;  %v1307_v55 = vadd.f32 %v1276_v50, %v1258_v42 }
 0x3b8   :  { %1769 = vmatpush1.bf16.msra.mxu1 %v1547_v2  ;;  %1933 = vmatpush1.bf16.msra.mxu0 %v1549_v3  ;;  %v1394_v2 = vld [vmem:[#allocation13 + $0x208] sm:$0xff]  ;;  %v1583_v3 = vunpack.c.h.s8.bf16 %v1389_v54 }
 0x3b9   :  { %1770 = vmatprep.subr.bf16.mxu1 %v1552_v4  ;;  %1934 = vmatprep.subr.bf16.mxu0 %v1554_v5  ;;  %v1585_v4 = vunpack.c.h.s8.bf16 %v1391_v56  ;;  %v1315_v5 = vmax.f32 %v1307_v55, 0.0  ;;  %v1588_v6 = vunpack.c.l.s8.bf16 %v1394_v2  ;;  %v1592_v12 = vunpack.c.h.s8.bf16 %v1394_v2  ;;  %v1410_v54 = vld [vmem:[#allocation13 + $0x288] sm:$0xff]  ;;  %v1412_v56 = vld [vmem:[#allocation13 + $0x298] sm:$0xff]  ;;  %v1411_v2 = vld [vmem:[#allocation13 + $0x290] sm:$0xff] }
 0x3ba   :  { %v1620_v55 = vunpack.c.l.s8.bf16 %v1410_v54 }
 0x3bb   :  { %v1323_v11 = vpack.c.bf16 %v1315_v5, %v1315_v5  ;;  %v1626_v5 = vunpack.c.h.s8.bf16 %v1412_v56 }
 0x3bc   :  { %1771 = vmatpush1.bf16.msra.mxu1 %v1551_v57  ;;  %1935 = vmatpush1.bf16.msra.mxu0 %v1553_v8  ;;  %v1393_v57 = vld [vmem:[#allocation13 + $0x200] sm:$0xff]  ;;  %v1395_v8 = vld [vmem:[#allocation13 + $0x210] sm:$0xff] }
 0x3bd   :  { %1772 = vmatprep.subr.bf16.mxu1 %v1556_v9  ;;  %1936 = vmatprep.subr.bf16.mxu0 %v1558_v10  ;;  %v1587_v9 = vunpack.c.l.s8.bf16 %v1393_v57  ;;  %v1589_v10 = vunpack.c.l.s8.bf16 %v1395_v8  ;;  %v1593_v18 = vunpack.c.h.s8.bf16 %v1395_v8  ;;  %v1625_v8 = vunpack.c.h.s8.bf16 %v1411_v2 }
 0x3c0   :  { %1773 = vmatpush1.bf16.msra.mxu1 %v1555_v13  ;;  %1937 = vmatpush1.bf16.msra.mxu0 %v1557_v60  ;;  %v1594_v13 = vunpack.c.h.s8.bf16 %v1396_v61  ;;  %v1398_v60 = vld [vmem:[#allocation13 + $0x228] sm:$0xff] }
 0x3c1   :  { %1774 = vmatprep.subr.bf16.mxu1 %v1560_v14  ;;  %1938 = vmatprep.subr.bf16.mxu0 %v1562_v15  ;;  %v1400_v14 = vld [vmem:[#allocation13 + $0x238] sm:$0xff]  ;;  %v1591_v15 = vunpack.c.h.s8.bf16 %v1393_v57  ;;  %v1596_v19 = vunpack.c.l.s8.bf16 %v1398_v60  ;;  %v1600_v25 = vunpack.c.h.s8.bf16 %v1398_v60 }
 0x3c4   :  { %1775 = vmatpush1.bf16.msra.mxu1 %v1559_v20  ;;  %1939 = vmatpush1.bf16.msra.mxu0 %v1561_v21  ;;  %v1598_v20 = vunpack.c.l.s8.bf16 %v1400_v14  ;;  %v1397_v21 = vld [vmem:[#allocation13 + $0x220] sm:$0xff] }
 0x3c5   :  { %1776 = vmatprep.subr.bf16.mxu1 %v1564_v22  ;;  %1940 = vmatprep.subr.bf16.mxu0 %v1566_v23  ;;  %v1399_v22 = vld [vmem:[#allocation13 + $0x230] sm:$0xff]  ;;  %v1595_v23 = vunpack.c.l.s8.bf16 %v1397_v21 }
 0x3c6   :  { %v1597_v24 = vunpack.c.l.s8.bf16 %v1399_v22  ;;  %v1601_v30 = vunpack.c.h.s8.bf16 %v1399_v22 }
 0x3c8   :  { %1777 = vmatpush1.bf16.msra.mxu1 %v1563_v26  ;;  %1941 = vmatpush1.bf16.msra.mxu0 %v1565_v27  ;;  %v1602_v26 = vunpack.c.h.s8.bf16 %v1400_v14  ;;  %v1402_v27 = vld [vmem:[#allocation13 + $0x248] sm:$0xff] }
 0x3c9   :  { %1778 = vmatprep.subr.bf16.mxu1 %v1568_v28  ;;  %1942 = vmatprep.subr.bf16.mxu0 %v1570_v29  ;;  %v1404_v28 = vld [vmem:[#allocation13 + $0x258] sm:$0xff]  ;;  %v1599_v29 = vunpack.c.h.s8.bf16 %v1397_v21  ;;  %v1604_v32 = vunpack.c.l.s8.bf16 %v1402_v27  ;;  %v1608_v39 = vunpack.c.h.s8.bf16 %v1402_v27 }
 0x3cc   :  { %1779 = vmatpush1.bf16.msra.mxu1 %v1567_v33  ;;  %1943 = vmatpush1.bf16.msra.mxu0 %v1569_v58  ;;  %v1606_v33 = vunpack.c.l.s8.bf16 %v1404_v28  ;;  %v1401_v58 = vld [vmem:[#allocation13 + $0x240] sm:$0xff] }
 0x3cd   :  { %1780 = vmatprep.subr.bf16.mxu1 %v1572_v35  ;;  %1944 = vmatprep.subr.bf16.mxu0 %v1574_v36  ;;  %v1403_v35 = vld [vmem:[#allocation13 + $0x250] sm:$0xff]  ;;  %v1603_v36 = vunpack.c.l.s8.bf16 %v1401_v58 }
 0x3ce   :  { %v1605_v37 = vunpack.c.l.s8.bf16 %v1403_v35 }
 0x3d0   :  { %1781 = vmatpush1.bf16.msra.mxu1 %v1571_v40  ;;  %1945 = vmatpush1.bf16.msra.mxu0 %v1573_v43  ;;  %v1610_v40 = vunpack.c.h.s8.bf16 %v1404_v28  ;;  %v1406_v43 = vld [vmem:[#allocation13 + $0x268] sm:$0xff] }
 0x3d1   :  { %1782 = vmatprep.subr.bf16.mxu1 %v1576_v44  ;;  %1946 = vmatprep.subr.bf16.mxu0 %v1578_v45  ;;  %v1607_v44 = vunpack.c.h.s8.bf16 %v1401_v58  ;;  %v1609_v45 = vunpack.c.h.s8.bf16 %v1403_v35  ;;  %v1612_v46 = vunpack.c.l.s8.bf16 %v1406_v43  ;;  %v1424_v58 = vld [vmem:[#allocation13 + $0x2f8] sm:$0xff]  ;;  %v1246_v35 = vsub.s32 7, %v2996_v31 }
 0x3d4   :  { %1783 = vmatpush1.bf16.msra.mxu1 %v1575_v48  ;;  %1947 = vmatpush1.bf16.msra.mxu0 %v1577_v49  ;;  %v1405_v48 = vld [vmem:[#allocation13 + $0x260] sm:$0xff]  ;;  %v1407_v49 = vld [vmem:[#allocation13 + $0x270] sm:$0xff] }
 0x3d5   :  { %1784 = vmatprep.subr.bf16.mxu1 %v1580_v51  ;;  %1948 = vmatprep.subr.bf16.mxu0 %v1582_v52  ;;  %v1611_v42 = vunpack.c.l.s8.bf16 %v1405_v48  ;;  %v1613_v50 = vunpack.c.l.s8.bf16 %v1407_v49  ;;  %v1616_v51 = vunpack.c.h.s8.bf16 %v1406_v43  ;;  %v1618_v52 = vunpack.c.h.s8.bf16 %v1408_v41  ;;  %v1421_v41 = vld [vmem:[#allocation13 + $0x2e0] sm:$0xff] }
 0x3d6   :  { %v1646_v43 = vunpack.c.l.s8.bf16 %v1424_v58 }
 0x3d8   :  { %1785 = vmatpush1.bf16.msra.mxu1 %v1579_v59  ;;  %1949 = vmatpush1.bf16.msra.mxu0 %v1581_v62  ;;  %v1615_v59 = vunpack.c.h.s8.bf16 %v1405_v48  ;;  %v1617_v62 = vunpack.c.h.s8.bf16 %v1407_v49 }
 0x3d9   :  { %1786 = vmatprep.subr.bf16.mxu1 %v1584_v0  ;;  %1950 = vmatprep.subr.bf16.mxu0 %v1586_v1  ;;  %v1622_v0 = vunpack.c.l.s8.bf16 %v1412_v56  ;;  %v1409_v1 = vld [vmem:[#allocation13 + $0x280] sm:$0xff]  ;;  %v1296_v56 = vrot.slane %v3087_v53, %v1246_v35 }
 0x3da   :  { %v1619_v61 = vunpack.c.l.s8.bf16 %v1409_v1  ;;  %v1623_v57 = vunpack.c.h.s8.bf16 %v1409_v1  ;;  %v1426_v1 = vld [vmem:[#allocation13 + $0x308] sm:$0xff] }
 0x3dc   :  { %1787 = vmatpush1.bf16.msra.mxu1 %v1583_v3  ;;  %1951 = vmatpush1.bf16.msra.mxu0 %v1585_v4  ;;  %v1621_v3 = vunpack.c.l.s8.bf16 %v1411_v2  ;;  %v1624_v4 = vunpack.c.h.s8.bf16 %v1410_v54  ;;  %v1428_v2 = vld [vmem:[#allocation13 + $0x318] sm:$0xff] }
 0x3dd   :  { %1797 = vmatprep.subr.bf16.mxu1 %v1588_v6  ;;  %1961 = vmatprep.subr.bf16.mxu0 %v1590_v7  ;;  %v1414_v6 = vld [vmem:[#allocation13 + $0x2a8] sm:$0xff]  ;;  %v1416_v7 = vld [vmem:[#allocation13 + $0x2b8] sm:$0xff] }
 0x3de   :  { %v1632_v14 = vunpack.c.h.s8.bf16 %v1414_v6 }
 0x3df   :  { %1789 = vmatmul.mubr.bf16.vlgmr.msra.gmra.mrb[12].mxu1 %v1323_v11  ;;  %1953 = vmatmul.mubr.bf16.vlgmr.msra.gmra.mrb[16].mxu0 %v1323_v11  ;;  %v1413_v11 = vld [vmem:[#allocation13 + $0x2a0] sm:$0xff] }
 0x3e0   :  { %1798 = vmatpush1.bf16.msra.mxu1 %v1587_v9  ;;  %1962 = vmatpush1.bf16.msra.mxu0 %v1589_v10  ;;  %v1628_v9 = vunpack.c.l.s8.bf16 %v1414_v6  ;;  %v1630_v10 = vunpack.c.l.s8.bf16 %v1416_v7 }
 0x3e1   :  { %1799 = vmatprep.subr.bf16.mxu1 %v1592_v12  ;;  %1963 = vmatprep.subr.bf16.mxu0 %v1594_v13  ;;  %v1415_v12 = vld [vmem:[#allocation13 + $0x2b0] sm:$0xff]  ;;  %v1627_v13 = vunpack.c.l.s8.bf16 %v1413_v11 }
 0x3e2   :  { %v1629_v60 = vunpack.c.l.s8.bf16 %v1415_v12  ;;  %v1633_v21 = vunpack.c.h.s8.bf16 %v1415_v12  ;;  %v1425_v12 = vld [vmem:[#allocation13 + $0x300] sm:$0xff] }
 0x3e4   :  { %1800 = vmatpush1.bf16.msra.mxu1 %v1591_v15  ;;  %1964 = vmatpush1.bf16.msra.mxu0 %v1593_v18  ;;  %v1634_v15 = vunpack.c.h.s8.bf16 %v1416_v7  ;;  %v1418_v18 = vld [vmem:[#allocation13 + $0x2c8] sm:$0xff] }
 0x3e5   :  { %1801 = vmatprep.subr.bf16.mxu1 %v1596_v19  ;;  %1965 = vmatprep.subr.bf16.mxu0 %v1598_v20  ;;  %v1420_v19 = vld [vmem:[#allocation13 + $0x2d8] sm:$0xff]  ;;  %v1631_v20 = vunpack.c.h.s8.bf16 %v1413_v11  ;;  %v1636_v22 = vunpack.c.l.s8.bf16 %v1418_v18  ;;  %v1640_v28 = vunpack.c.h.s8.bf16 %v1418_v18  ;;  %v1654_v11 = vunpack.c.l.s8.bf16 %v1428_v2 }
 0x3e6   :  { %v1651_v18 = vunpack.c.l.s8.bf16 %v1425_v12 }
 0x3e8   :  { %1802 = vmatpush1.bf16.msra.mxu1 %v1595_v23  ;;  %1966 = vmatpush1.bf16.msra.mxu0 %v1597_v24  ;;  %v1638_v23 = vunpack.c.l.s8.bf16 %v1420_v19  ;;  %v1417_v24 = vld [vmem:[#allocation13 + $0x2c0] sm:$0xff] }
 0x3e9   :  { %1803 = vmatprep.subr.bf16.mxu1 %v1600_v25  ;;  %1967 = vmatprep.subr.bf16.mxu0 %v1602_v26  ;;  %v1419_v25 = vld [vmem:[#allocation13 + $0x2d0] sm:$0xff]  ;;  %v1635_v26 = vunpack.c.l.s8.bf16 %v1417_v24 }
 0x3ea   :  { %v1637_v27 = vunpack.c.l.s8.bf16 %v1419_v25 }
 0x3ec   :  { %1804 = vmatpush1.bf16.msra.mxu1 %v1599_v29  ;;  %1968 = vmatpush1.bf16.msra.mxu0 %v1601_v30  ;;  %v1642_v29 = vunpack.c.h.s8.bf16 %v1420_v19  ;;  %v1234_v30 = vsub.s32 4, %v2996_v31 }
 0x3ed   :  { %1805 = vmatprep.subr.bf16.mxu1 %v1604_v32  ;;  %1969 = vmatprep.subr.bf16.mxu0 %v1606_v33  ;;  %v1238_v32 = vsub.s32 5, %v2996_v31  ;;  %v1422_v33 = vld [vmem:[#allocation13 + $0x2e8] sm:$0xff] }
 0x3ef   :  { %v1288_v49 = vrot.slane %v3087_v53, %v1238_v32 }
 0x3f0   :  { %1806 = vmatpush1.bf16.msra.mxu1 %v1603_v36  ;;  %1970 = vmatpush1.bf16.msra.mxu0 %v1605_v37  ;;  %v1639_v36 = vunpack.c.h.s8.bf16 %v1417_v24  ;;  %v1641_v37 = vunpack.c.h.s8.bf16 %v1419_v25  ;;  %v1432_v24 = vld [vmem:[#allocation13 + $0x338] sm:$0xff] }
 0x3f1   :  { %1807 = vmatprep.subr.bf16.mxu1 %v1608_v39  ;;  %1971 = vmatprep.subr.bf16.mxu0 %v1610_v40  ;;  %v1235_v39 = vrot.slane %v3082_v63, %v1234_v30  ;;  %v1644_v40 = vunpack.c.l.s8.bf16 %v1422_v33 }
 0x3f4   :  { %1808 = vmatpush1.bf16.msra.mxu1 %v1607_v44  ;;  %1972 = vmatpush1.bf16.msra.mxu0 %v1609_v45  ;;  %v1423_v44 = vld [vmem:[#allocation13 + $0x2f0] sm:$0xff]  ;;  %v1239_v45 = vrot.slane %v3082_v63, %v1238_v32 }
 0x3f5   :  { %1809 = vmatprep.subr.bf16.mxu1 %v1612_v46  ;;  %1973 = vmatprep.subr.bf16.mxu0 %v1614_v47  ;;  %v1284_v46 = vrot.slane %v3087_v53, %v1234_v30  ;;  %v1247_v47 = vrot.slane %v3082_v63, %v1246_v35  ;;  %v1429_v30 = vld [vmem:[#allocation13 + $0x320] sm:$0xff]  ;;  %v1431_v32 = vld [vmem:[#allocation13 + $0x330] sm:$0xff] }
 0x3f8   :  { %1810 = vmatpush1.bf16.msra.mxu1 %v1611_v42  ;;  %1974 = vmatpush1.bf16.msra.mxu0 %v1613_v50  ;;  %v1643_v42 = vunpack.c.l.s8.bf16 %v1421_v41  ;;  %v1645_v50 = vunpack.c.l.s8.bf16 %v1423_v44 }
 0x3f9   :  { %1811 = vmatprep.subr.bf16.mxu1 %v1616_v51  ;;  %1975 = vmatprep.subr.bf16.mxu0 %v1618_v52 }
 0x3fc   :  { %1812 = vmatpush1.bf16.msra.mxu1 %v1615_v59  ;;  %1976 = vmatpush1.bf16.msra.mxu0 %v1617_v62  ;;  %v1648_v59 = vunpack.c.h.s8.bf16 %v1422_v33  ;;  %v1650_v62 = vunpack.c.h.s8.bf16 %v1424_v58  ;;  %v1659_v33 = vunpack.c.l.s8.bf16 %v1429_v30  ;;  %v1661_v58 = vunpack.c.l.s8.bf16 %v1431_v32 }
 0x3fd   :  { %1813 = vmatprep.subr.bf16.mxu1 %v1620_v55  ;;  %1977 = vmatprep.subr.bf16.mxu0 %v1622_v0 }
 0x400   :  { %1814 = vmatpush1.bf16.msra.mxu1 %v1619_v61  ;;  %1978 = vmatpush1.bf16.msra.mxu0 %v1621_v3 }
 0x401   :  { %1815 = vmatprep.subr.bf16.mxu1 %v1624_v4  ;;  %1979 = vmatprep.subr.bf16.mxu0 %v1626_v5 }
 0x404   :  { %1816 = vmatpush1.bf16.msra.mxu1 %v1623_v57  ;;  %1980 = vmatpush1.bf16.msra.mxu0 %v1625_v8  ;;  %v1647_v57 = vunpack.c.h.s8.bf16 %v1421_v41  ;;  %v1649_v8 = vunpack.c.h.s8.bf16 %v1423_v44 }
 0x405   :  { %1817 = vmatprep.subr.bf16.mxu1 %v1628_v9  ;;  %1981 = vmatprep.subr.bf16.mxu0 %v1630_v10  ;;  %v1652_v10 = vunpack.c.l.s8.bf16 %v1426_v1 }
 0x408   :  { %1818 = vmatpush1.bf16.msra.mxu1 %v1627_v13  ;;  %1982 = vmatpush1.bf16.msra.mxu0 %v1629_v60  ;;  %v1427_v13 = vld [vmem:[#allocation13 + $0x310] sm:$0xff] }
 0x409   :  { %1819 = vmatprep.subr.bf16.mxu1 %v1632_v14  ;;  %1983 = vmatprep.subr.bf16.mxu0 %v1634_v15  ;;  %v1653_v19 = vunpack.c.l.s8.bf16 %v1427_v13 }
 0x40c   :  { %1820 = vmatpush1.bf16.msra.mxu1 %v1631_v20  ;;  %1984 = vmatpush1.bf16.msra.mxu0 %v1633_v21  ;;  %v1656_v21 = vunpack.c.h.s8.bf16 %v1426_v1 }
 0x40d   :  { %1821 = vmatprep.subr.bf16.mxu1 %v1636_v22  ;;  %1985 = vmatprep.subr.bf16.mxu0 %v1638_v23  ;;  %v1658_v22 = vunpack.c.h.s8.bf16 %v1428_v2  ;;  %v1430_v23 = vld [vmem:[#allocation13 + $0x328] sm:$0xff] }
 0x40e   :  { %v1664_v35 = vunpack.c.h.s8.bf16 %v1430_v23 }
 0x410   :  { %1822 = vmatpush1.bf16.msra.mxu1 %v1635_v26  ;;  %1986 = vmatpush1.bf16.msra.mxu0 %v1637_v27  ;;  %v1655_v26 = vunpack.c.h.s8.bf16 %v1425_v12  ;;  %v1657_v27 = vunpack.c.h.s8.bf16 %v1427_v13  ;;  %v1446_v13 = vld [vmem:[#allocation13 + $0x3a8] sm:$0xff] }
 0x411   :  { %1823 = vmatprep.subr.bf16.mxu1 %v1640_v28  ;;  %1987 = vmatprep.subr.bf16.mxu0 %v1642_v29  ;;  %v1660_v28 = vunpack.c.l.s8.bf16 %v1430_v23  ;;  %v1662_v29 = vunpack.c.l.s8.bf16 %v1432_v24 }
 0x414   :  { %1824 = vmatpush1.bf16.msra.mxu1 %v1639_v36  ;;  %1988 = vmatpush1.bf16.msra.mxu0 %v1641_v37  ;;  %v1126_v48 = vpop.f32.mrb[8].mxu1  ;;  %v1666_v36 = vunpack.c.h.s8.bf16 %v1432_v24  ;;  %v1434_v37 = vld [vmem:[#allocation13 + $0x348] sm:$0xff]  ;;  %v1696_v24 = vunpack.c.h.s8.bf16 %v1446_v13 }
 0x415   :  { %v1260_v51 = vmul.f32 %v1235_v39, %v1126_v48  ;;  %v3118_v52 = vpop.f32.mrb[12].mxu0  ;;  %v1128_v54 = vpop.f32.mrb[9].mxu1  ;;  %1825 = vmatprep.subr.bf16.mxu1 %v1644_v40  ;;  %1989 = vmatprep.subr.bf16.mxu0 %v1646_v43  ;;  %v1436_v39 = vld [vmem:[#allocation13 + $0x358] sm:$0xff]  ;;  %v1663_v40 = vunpack.c.h.s8.bf16 %v1429_v30  ;;  %v1665_v43 = vunpack.c.h.s8.bf16 %v1431_v32  ;;  %v1668_v41 = vunpack.c.l.s8.bf16 %v1434_v37 }
 0x416   :  { %v1261_v55 = vmul.f32 %v1239_v45, %v1128_v54  ;;  %v1210_v0 = vpop.f32.mrb[13].mxu0  ;;  %v1130_v63 = vpop.f32.mrb[10].mxu1  ;;  %v1670_v44 = vunpack.c.l.s8.bf16 %v1436_v39  ;;  %v1433_v45 = vld [vmem:[#allocation13 + $0x340] sm:$0xff]  ;;  %v1242_v30 = vsub.s32 6, %v2996_v31  ;;  %v1454_v31 = vld [vmem:[#allocation13 + $0x3e8] sm:$0xff] }
 0x417   :  { %v1309_v61 = vadd.f32 %v1284_v46, %v1260_v51  ;;  %v1263_v3 = vmul.f32 %v1247_v47, %v1210_v0  ;;  %v1212_v4 = vpop.f32.mrb[14].mxu0  ;;  %v1131_v5 = vpop.f32.mrb[11].mxu1  ;;  %v1435_v46 = vld [vmem:[#allocation13 + $0x350] sm:$0xff]  ;;  %v1667_v47 = vunpack.c.l.s8.bf16 %v1433_v45  ;;  %v1440_v51 = vld [vmem:[#allocation13 + $0x378] sm:$0xff]  ;;  %v1671_v54 = vunpack.c.h.s8.bf16 %v1433_v45 }
 0x418   :  { %v1310_v6 = vadd.f32 %v1288_v49, %v1261_v55  ;;  %v1213_v7 = vpop.f32.mrb[15].mxu0  ;;  %1826 = vmatpush1.bf16.msra.mxu1 %v1643_v42  ;;  %1990 = vmatpush1.bf16.msra.mxu0 %v1645_v50  ;;  %v1669_v48 = vunpack.c.l.s8.bf16 %v1435_v46  ;;  %v1672_v49 = vunpack.c.h.s8.bf16 %v1434_v37  ;;  %v1674_v42 = vunpack.c.h.s8.bf16 %v1436_v39  ;;  %v1438_v50 = vld [vmem:[#allocation13 + $0x368] sm:$0xff]  ;;  %v1437_v55 = vld [vmem:[#allocation13 + $0x360] sm:$0xff]  ;;  %v1439_v0 = vld [vmem:[#allocation13 + $0x370] sm:$0xff] }
 0x419   :  { %v1317_v53 = vmax.f32 %v1309_v61, 0.0  ;;  %v1312_v9 = vadd.f32 %v1296_v56, %v1263_v3  ;;  %1827 = vmatprep.subr.bf16.mxu1 %v1648_v59  ;;  %1991 = vmatprep.subr.bf16.mxu0 %v1650_v62  ;;  %v1673_v56 = vunpack.c.h.s8.bf16 %v1435_v46  ;;  %v1676_v59 = vunpack.c.l.s8.bf16 %v1438_v50  ;;  %v1442_v3 = vld [vmem:[#allocation13 + $0x388] sm:$0xff]  ;;  %v1444_v4 = vld [vmem:[#allocation13 + $0x398] sm:$0xff] }
 0x41a   :  { %v1318_v60 = vmax.f32 %v1310_v6, 0.0  ;;  %v1678_v62 = vunpack.c.l.s8.bf16 %v1440_v51  ;;  %v1675_v63 = vunpack.c.l.s8.bf16 %v1437_v55  ;;  %v1677_v1 = vunpack.c.l.s8.bf16 %v1439_v0  ;;  %v2512_v39 = vld [vmem:[%s3190_s8] sm:$0xff] }
 0x41b   :  { %v1320_v14 = vmax.f32 %v1312_v9, 0.0  ;;  %v1325_v20 = vpack.c.bf16 %v1317_v53, %v1317_v53  ;;  %v1680_v2 = vunpack.c.h.s8.bf16 %v1438_v50  ;;  %v1682_v61 = vunpack.c.h.s8.bf16 %v1440_v51  ;;  %v1443_v53 = vld [vmem:[#allocation13 + $0x390] sm:$0xff]  ;;  %v1453_v51 = vld [vmem:[#allocation13 + $0x3e0] sm:$0xff] }
 0x41c   :  { %v1326_v15 = vpack.c.bf16 %v1318_v60, %v1318_v60  ;;  %1828 = vmatpush1.bf16.msra.mxu1 %v1647_v57  ;;  %1992 = vmatpush1.bf16.msra.mxu0 %v1649_v8  ;;  %v1679_v5 = vunpack.c.h.s8.bf16 %v1437_v55  ;;  %v1681_v6 = vunpack.c.h.s8.bf16 %v1439_v0  ;;  %v1684_v7 = vunpack.c.l.s8.bf16 %v1442_v3  ;;  %v1441_v8 = vld [vmem:[#allocation13 + $0x380] sm:$0xff]  ;;  %v1448_v60 = vld [vmem:[#allocation13 + $0x3b8] sm:$0xff]  ;;  %v2102_v0 = vld [vmem:[#allocation14 + $0x8] sm:$0xff] }
 0x41d   :  { %1838 = vmatprep.subr.bf16.mxu1 %v1652_v10  ;;  %2002 = vmatprep.subr.bf16.mxu0 %v1654_v11  ;;  %v1328_v25 = vpack.c.bf16 %v1320_v14, %v1320_v14  ;;  %v1686_v57 = vunpack.c.l.s8.bf16 %v1444_v4  ;;  %v1683_v9 = vunpack.c.l.s8.bf16 %v1441_v8  ;;  %v1685_v10 = vunpack.c.l.s8.bf16 %v1443_v53 }
 0x41e   :  { %1829 = vmatprep.mubr.bf16.mxu1 %v1326_v15  ;;  %1993 = vmatprep.mubr.bf16.mxu0 %v1326_v15  ;;  %v1688_v11 = vunpack.c.h.s8.bf16 %v1442_v3  ;;  %v1690_v12 = vunpack.c.h.s8.bf16 %v1444_v4  ;;  %v1687_v14 = vunpack.c.h.s8.bf16 %v1441_v8  ;;  %v1689_v15 = vunpack.c.h.s8.bf16 %v1443_v53  ;;  %v2101_v3 = vld [vmem:[#allocation14] sm:$0xff]  ;;  %v2103_v53 = vld [vmem:[#allocation14 + $0x10] sm:$0xff] }
 0x41f   :  { %1830 = vmatmul.mubr.bf16.vlgmr.msra.gmra.mrb[12].mxu1 %v1325_v20  ;;  %1994 = vmatmul.mubr.bf16.vlgmr.msra.gmra.mrb[16].mxu0 %v1325_v20  ;;  %v1445_v20 = vld [vmem:[#allocation13 + $0x3a0] sm:$0xff]  ;;  %v1712_v55 = vunpack.c.h.s8.bf16 %v1454_v31  ;;  %v2135_v4 = vunpack.c.l.s8.bf16 %v2101_v3 }
 0x420   :  { %1839 = vmatpush1.bf16.msra.mxu1 %v1651_v18  ;;  %2003 = vmatpush1.bf16.msra.mxu0 %v1653_v19  ;;  %v1692_v18 = vunpack.c.l.s8.bf16 %v1446_v13  ;;  %v1694_v19 = vunpack.c.l.s8.bf16 %v1448_v60 }
 0x421   :  { %1870 = vmatprep.mubr.bf16.mxu1 %v1328_v25  ;;  %2034 = vmatprep.mubr.bf16.mxu0 %v1328_v25  ;;  %v1698_v25 = vunpack.c.h.s8.bf16 %v1448_v60  ;;  %v2105_v60 = vld [vmem:[#allocation14 + $0x20] sm:$0xff] }
 0x422   :  { %1840 = vmatprep.subr.bf16.mxu1 %v1656_v21  ;;  %2004 = vmatprep.subr.bf16.mxu0 %v1658_v22  ;;  %v1447_v21 = vld [vmem:[#allocation13 + $0x3b0] sm:$0xff]  ;;  %v1691_v22 = vunpack.c.l.s8.bf16 %v1445_v20 }
 0x423   :  { %v1693_v23 = vunpack.c.l.s8.bf16 %v1447_v21 }
 0x424   :  { %1841 = vmatpush1.bf16.msra.mxu1 %v1655_v26  ;;  %2005 = vmatpush1.bf16.msra.mxu0 %v1657_v27  ;;  %v1450_v26 = vld [vmem:[#allocation13 + $0x3c8] sm:$0xff]  ;;  %v1452_v27 = vld [vmem:[#allocation13 + $0x3d8] sm:$0xff] }
 0x425   :  { %1842 = vmatprep.subr.bf16.mxu1 %v1660_v28  ;;  %2006 = vmatprep.subr.bf16.mxu0 %v1662_v29  ;;  %v1695_v28 = vunpack.c.h.s8.bf16 %v1445_v20  ;;  %v1697_v29 = vunpack.c.h.s8.bf16 %v1447_v21  ;;  %v1700_v32 = vunpack.c.l.s8.bf16 %v1450_v26  ;;  %v2107_v21 = vld [vmem:[#allocation14 + $0x30] sm:$0xff] }
 0x428   :  { %1843 = vmatpush1.bf16.msra.mxu1 %v1659_v33  ;;  %2007 = vmatpush1.bf16.msra.mxu0 %v1661_v58  ;;  %v1702_v33 = vunpack.c.l.s8.bf16 %v1452_v27  ;;  %v1449_v58 = vld [vmem:[#allocation13 + $0x3c0] sm:$0xff] }
 0x429   :  { %1844 = vmatprep.subr.bf16.mxu1 %v1664_v35  ;;  %2008 = vmatprep.subr.bf16.mxu0 %v1666_v36  ;;  %v1451_v35 = vld [vmem:[#allocation13 + $0x3d0] sm:$0xff]  ;;  %v1699_v36 = vunpack.c.l.s8.bf16 %v1449_v58  ;;  %v1703_v45 = vunpack.c.h.s8.bf16 %v1449_v58 }
 0x42a   :  { %v1701_v37 = vunpack.c.l.s8.bf16 %v1451_v35  ;;  %v1705_v46 = vunpack.c.h.s8.bf16 %v1451_v35  ;;  %v2111_v58 = vld [vmem:[#allocation14 + $0x50] sm:$0xff] }
 0x42b   :  { %v2155_v35 = vunpack.c.l.s8.bf16 %v2111_v58 }
 0x42c   :  { %1845 = vmatpush1.bf16.msra.mxu1 %v1663_v40  ;;  %2009 = vmatpush1.bf16.msra.mxu0 %v1665_v43  ;;  %v1243_v40 = vrot.slane %v2512_v39, %v1242_v30  ;;  %v1704_v43 = vunpack.c.h.s8.bf16 %v1450_v26  ;;  %v2157_v39 = vunpack.c.h.s8.bf16 %v2111_v58 }
 0x42d   :  { %1846 = vmatprep.subr.bf16.mxu1 %v1668_v41  ;;  %2010 = vmatprep.subr.bf16.mxu0 %v1670_v44  ;;  %v1706_v41 = vunpack.c.h.s8.bf16 %v1452_v27  ;;  %v1456_v44 = vld [vmem:[#allocation13 + $0x3f8] sm:$0xff]  ;;  %v2109_v27 = vld [vmem:[#allocation14 + $0x40] sm:$0xff] }
 0x42e   :  { %v1710_v50 = vunpack.c.l.s8.bf16 %v1456_v44 }
 0x430   :  { %1847 = vmatpush1.bf16.msra.mxu1 %v1667_v47  ;;  %2011 = vmatpush1.bf16.msra.mxu0 %v1669_v48  ;;  %v1262_v47 = vmul.f32 %v1243_v40, %v3118_v52  ;;  %v2513_v48 = vld [vmem:[%s3191_s9] sm:$0xff]  ;;  %v1714_v52 = vunpack.c.h.s8.bf16 %v1456_v44 }
 0x431   :  { %1848 = vmatprep.subr.bf16.mxu1 %v1672_v49  ;;  %2012 = vmatprep.subr.bf16.mxu0 %v1674_v42  ;;  %v1292_v49 = vrot.slane %v2513_v48, %v1242_v30  ;;  %v1708_v42 = vunpack.c.l.s8.bf16 %v1454_v31  ;;  %v2112_v30 = vld [vmem:[#allocation14 + $0x58] sm:$0xff] }
 0x434   :  { %1849 = vmatpush1.bf16.msra.mxu1 %v1671_v54  ;;  %2013 = vmatpush1.bf16.msra.mxu0 %v1673_v56  ;;  %v1455_v54 = vld [vmem:[#allocation13 + $0x3f0] sm:$0xff]  ;;  %v1707_v56 = vunpack.c.l.s8.bf16 %v1453_v51 }
 0x435   :  { %1850 = vmatprep.subr.bf16.mxu1 %v1676_v59  ;;  %2014 = vmatprep.subr.bf16.mxu0 %v1678_v62  ;;  %v1709_v59 = vunpack.c.l.s8.bf16 %v1455_v54  ;;  %v1311_v62 = vadd.f32 %v1292_v49, %v1262_v47  ;;  %v2115_v47 = vld [vmem:[#allocation14 + $0x70] sm:$0xff] }
 0x436   :  { %v2163_v48 = vunpack.c.l.s8.bf16 %v2115_v47 }
 0x438   :  { %1851 = vmatpush1.bf16.msra.mxu1 %v1675_v63  ;;  %2015 = vmatpush1.bf16.msra.mxu0 %v1677_v1  ;;  %v1711_v63 = vunpack.c.h.s8.bf16 %v1453_v51  ;;  %v1713_v1 = vunpack.c.h.s8.bf16 %v1455_v54  ;;  %v2315_v54 = vld [vmem:[#allocation16 + $0x20] sm:$0xff] }
 0x439   :  { %1852 = vmatprep.subr.bf16.mxu1 %v1680_v2  ;;  %2016 = vmatprep.subr.bf16.mxu0 %v1682_v61  ;;  %v1319_v2 = vmax.f32 %v1311_v62, 0.0  ;;  %v2136_v61 = vunpack.c.l.s8.bf16 %v2102_v0 }
 0x43c   :  { %1853 = vmatpush1.bf16.msra.mxu1 %v1679_v5  ;;  %2017 = vmatpush1.bf16.msra.mxu0 %v1681_v6  ;;  %v1327_v5 = vpack.c.bf16 %v1319_v2, %v1319_v2  ;;  %v2138_v6 = vunpack.c.h.s8.bf16 %v2102_v0 }
 0x43d   :  { %1854 = vmatprep.subr.bf16.mxu1 %v1684_v7  ;;  %2018 = vmatprep.subr.bf16.mxu0 %v1686_v57  ;;  %v2104_v7 = vld [vmem:[#allocation14 + $0x18] sm:$0xff]  ;;  %v2137_v57 = vunpack.c.h.s8.bf16 %v2101_v3  ;;  %v2317_v3 = vld [vmem:[#allocation16 + $0x30] sm:$0xff] }
 0x43e   :  { %v2140_v8 = vunpack.c.l.s8.bf16 %v2104_v7 }
 0x440   :  { %1855 = vmatpush1.bf16.msra.mxu1 %v1683_v9  ;;  %2019 = vmatpush1.bf16.msra.mxu0 %v1685_v10  ;;  %v2139_v9 = vunpack.c.l.s8.bf16 %v2103_v53  ;;  %v2142_v10 = vunpack.c.h.s8.bf16 %v2104_v7 }
 0x441   :  { %1856 = vmatprep.subr.bf16.mxu1 %v1688_v11  ;;  %2020 = vmatprep.subr.bf16.mxu0 %v1690_v12  ;;  %v2106_v11 = vld [vmem:[#allocation14 + $0x28] sm:$0xff]  ;;  %v2141_v12 = vunpack.c.h.s8.bf16 %v2103_v53  ;;  %v1458_v53 = vld [vmem:[%s3194_s12] sm:$0xf] }
 0x442   :  { %v2144_v13 = vunpack.c.l.s8.bf16 %v2106_v11 }
 0x444   :  { %1857 = vmatpush1.bf16.msra.mxu1 %v1687_v14  ;;  %2021 = vmatpush1.bf16.msra.mxu0 %v1689_v15  ;;  %v2143_v14 = vunpack.c.l.s8.bf16 %v2105_v60  ;;  %v2146_v15 = vunpack.c.h.s8.bf16 %v2106_v11 }
 0x445   :  { %1858 = vmatprep.subr.bf16.mxu1 %v1692_v18  ;;  %2022 = vmatprep.subr.bf16.mxu0 %v1694_v19  ;;  %v2108_v18 = vld [vmem:[#allocation14 + $0x38] sm:$0xff]  ;;  %v2145_v19 = vunpack.c.h.s8.bf16 %v2105_v60  ;;  %v2080_v60 = vrot.slane %v1458_v53, %v3044_v16 }
 0x446   :  { %v2148_v20 = vunpack.c.l.s8.bf16 %v2108_v18 }
 0x448   :  { %1859 = vmatpush1.bf16.msra.mxu1 %v1691_v22  ;;  %2023 = vmatpush1.bf16.msra.mxu0 %v1693_v23  ;;  %v2147_v22 = vunpack.c.l.s8.bf16 %v2107_v21  ;;  %v2150_v23 = vunpack.c.h.s8.bf16 %v2108_v18  ;;  %v2076_v18 = vrot.slane %v1458_v53, %v3005_v38 }
 0x449   :  { %1860 = vmatprep.subr.bf16.mxu1 %v1696_v24  ;;  %2024 = vmatprep.subr.bf16.mxu0 %v1698_v25  ;;  %v2110_v24 = vld [vmem:[#allocation14 + $0x48] sm:$0xff]  ;;  %v2149_v25 = vunpack.c.h.s8.bf16 %v2107_v21 }
 0x44a   :  { %v2152_v26 = vunpack.c.l.s8.bf16 %v2110_v24 }
 0x44c   :  { %1861 = vmatpush1.bf16.msra.mxu1 %v1695_v28  ;;  %2025 = vmatpush1.bf16.msra.mxu0 %v1697_v29  ;;  %v2151_v28 = vunpack.c.l.s8.bf16 %v2109_v27  ;;  %v2154_v29 = vunpack.c.h.s8.bf16 %v2110_v24 }
 0x44d   :  { %1862 = vmatprep.subr.bf16.mxu1 %v1700_v32  ;;  %2026 = vmatprep.subr.bf16.mxu0 %v1702_v33  ;;  %v2153_v32 = vunpack.c.h.s8.bf16 %v2109_v27  ;;  %v2156_v33 = vunpack.c.l.s8.bf16 %v2112_v30 }
 0x450   :  { %1863 = vmatpush1.bf16.msra.mxu1 %v1699_v36  ;;  %2027 = vmatpush1.bf16.msra.mxu0 %v1701_v37  ;;  %v2158_v36 = vunpack.c.h.s8.bf16 %v2112_v30  ;;  %v2114_v37 = vld [vmem:[#allocation14 + $0x68] sm:$0xff] }
 0x451   :  { %1864 = vmatprep.subr.bf16.mxu1 %v1704_v43  ;;  %2028 = vmatprep.subr.bf16.mxu0 %v1706_v41  ;;  %v2160_v40 = vunpack.c.l.s8.bf16 %v2114_v37  ;;  %v2113_v43 = vld [vmem:[#allocation14 + $0x60] sm:$0xff]  ;;  %v2162_v31 = vunpack.c.h.s8.bf16 %v2114_v37 }
 0x452   :  { %v2159_v41 = vunpack.c.l.s8.bf16 %v2113_v43  ;;  %v2161_v44 = vunpack.c.h.s8.bf16 %v2113_v43 }
 0x454   :  { %1865 = vmatpush1.bf16.msra.mxu1 %v1703_v45  ;;  %2029 = vmatpush1.bf16.msra.mxu0 %v1705_v46  ;;  %v2116_v45 = vld [vmem:[#allocation14 + $0x78] sm:$0xff] }
 0x455   :  { %1866 = vmatprep.subr.bf16.mxu1 %v1708_v42  ;;  %2030 = vmatprep.subr.bf16.mxu0 %v1710_v50  ;;  %v2164_v46 = vunpack.c.l.s8.bf16 %v2116_v45  ;;  %v2166_v49 = vunpack.c.h.s8.bf16 %v2116_v45  ;;  %v2165_v42 = vunpack.c.h.s8.bf16 %v2115_v47  ;;  %v3129_v50 = vld [vmem:[#allocation14 + $0x88] sm:$0xff] }
 0x456   :  { %v2168_v51 = vunpack.c.l.s8.bf16 %v3129_v50  ;;  %v2170_v43 = vunpack.c.h.s8.bf16 %v3129_v50  ;;  %v2121_v50 = vld [vmem:[#allocation14 + $0xa0] sm:$0xff] }
 0x458   :  { %1867 = vmatpush1.bf16.msra.mxu1 %v1707_v56  ;;  %2031 = vmatpush1.bf16.msra.mxu0 %v1709_v59  ;;  %v2311_v56 = vld [vmem:[#allocation16] sm:$0xff]  ;;  %v2329_v59 = vunpack.c.l.s8.bf16 %v2315_v54 }
 0x459   :  { %1868 = vmatprep.subr.bf16.mxu1 %v1712_v55  ;;  %2032 = vmatprep.subr.bf16.mxu0 %v1714_v52  ;;  %v2321_v62 = vunpack.c.l.s8.bf16 %v2311_v56  ;;  %v2330_v55 = vunpack.c.h.s8.bf16 %v2315_v54  ;;  %v2316_v52 = vld [vmem:[#allocation16 + $0x28] sm:$0xff]  ;;  %v2322_v0 = vunpack.c.h.s8.bf16 %v2311_v56  ;;  %v2175_v54 = vunpack.c.l.s8.bf16 %v2121_v50 }
 0x45c   :  { %1869 = vmatpush1.bf16.msra.mxu1 %v1711_v63  ;;  %2033 = vmatpush1.bf16.msra.mxu0 %v1713_v1  ;;  %v2331_v63 = vunpack.c.l.s8.bf16 %v2316_v52  ;;  %v2312_v1 = vld [vmem:[#allocation16 + $0x8] sm:$0xff] }
 0x45d   :  { %2199 = vmatprep.subr.bf16.mxu1 %v2136_v61  ;;  %2423 = vmatprep.subr.bf16.mxu0 %v2329_v59  ;;  %v2323_v2 = vunpack.c.l.s8.bf16 %v2312_v1  ;;  %v2332_v61 = vunpack.c.h.s8.bf16 %v2316_v52  ;;  %v2124_v59 = vld [vmem:[#allocation14 + $0xb8] sm:$0xff]  ;;  %v2123_v52 = vld [vmem:[#allocation14 + $0xb0] sm:$0xff] }
 0x45f   :  { %1871 = vmatmul.mubr.bf16.vlgmr.msra.gmra.mrb[12].mxu1 %v1327_v5  ;;  %2035 = vmatmul.mubr.bf16.vlgmr.msra.gmra.mrb[16].mxu0 %v1327_v5  ;;  %v2333_v5 = vunpack.c.l.s8.bf16 %v2317_v3 }
 0x460   :  { %2200 = vmatpush1.bf16.msra.mxu1 %v2135_v4  ;;  %2424 = vmatpush3.bf16.msra.mxu0 %v2321_v62  ;;  %v2324_v4 = vunpack.c.h.s8.bf16 %v2312_v1  ;;  %v2177_v62 = vunpack.c.h.s8.bf16 %v2121_v50  ;;  %v2126_v1 = vld [vmem:[#allocation14 + $0xc8] sm:$0xff] }
 0x461   :  { %2201 = vmatprep.subr.bf16.mxu1 %v2138_v6  ;;  %2425 = vmatprep.subr.bf16.mxu0 %v2330_v55  ;;  %v3132_v6 = vld [vmem:[#allocation16 + $0x10] sm:$0xff]  ;;  %v2180_v55 = vunpack.c.l.s8.bf16 %v2124_v59 }
 0x462   :  { %v2325_v7 = vunpack.c.l.s8.bf16 %v3132_v6 }
 0x464   :  { %2202 = vmatpush1.bf16.msra.mxu1 %v2137_v57  ;;  %2426 = vmatpush3.bf16.msra.mxu0 %v2322_v0  ;;  %v2334_v57 = vunpack.c.h.s8.bf16 %v2317_v3  ;;  %v2179_v0 = vunpack.c.l.s8.bf16 %v2123_v52  ;;  %v2125_v3 = vld [vmem:[#allocation14 + $0xc0] sm:$0xff] }
 0x465   :  { %2203 = vmatprep.subr.bf16.mxu1 %v2140_v8  ;;  %2427 = vmatprep.subr.bf16.mxu0 %v2331_v63  ;;  %v1457_v8 = vld [vmem:[%s3193_s11] sm:$0xf]  ;;  %v2182_v63 = vunpack.c.h.s8.bf16 %v2124_v59 }
 0x466   :  { %v2051_v11 = vrot.slane %v1457_v8, %v3005_v38  ;;  %v2422_v59 = vld [vmem:[%s3200_s18] ss:$0 sm:$0xff] }
 0x468   :  { %2204 = vmatpush1.bf16.msra.mxu1 %v2139_v9  ;;  %2428 = vmatpush3.bf16.msra.mxu0 %v2323_v2  ;;  %v2047_v9 = vrot.slane %v1457_v8, %v2999_v34  ;;  %v2181_v2 = vunpack.c.h.s8.bf16 %v2123_v52 }
 0x469   :  { %2205 = vmatprep.subr.bf16.mxu1 %v2142_v10  ;;  %2429 = vmatprep.subr.bf16.mxu0 %v2332_v61  ;;  %v2055_v10 = vrot.slane %v1457_v8, %v3044_v16  ;;  %v2184_v61 = vunpack.c.l.s8.bf16 %v2126_v1 }
 0x46c   :  { %2206 = vmatpush1.bf16.msra.mxu1 %v2141_v12  ;;  %2430 = vmatpush3.bf16.msra.mxu0 %v2324_v4  ;;  %v2059_v12 = vrot.slane %v1457_v8, %v3047_v17  ;;  %v2183_v4 = vunpack.c.l.s8.bf16 %v2125_v3 }
 0x46d   :  { %2207 = vmatprep.subr.bf16.mxu1 %v2144_v13  ;;  %2431 = vmatprep.subr.bf16.mxu0 %v2333_v5  ;;  %v2072_v13 = vrot.slane %v1458_v53, %v2999_v34  ;;  %v2186_v5 = vunpack.c.h.s8.bf16 %v2126_v1 }
 0x470   :  { %2208 = vmatpush1.bf16.msra.mxu1 %v2143_v14  ;;  %2432 = vmatpush3.bf16.msra.mxu0 %v2325_v7  ;;  %v2128_v7 = vld [vmem:[#allocation14 + $0xd8] sm:$0xff] }
 0x471   :  { %2209 = vmatprep.subr.bf16.mxu1 %v2146_v15  ;;  %2433 = vmatprep.subr.bf16.mxu0 %v2334_v57  ;;  %v2185_v57 = vunpack.c.h.s8.bf16 %v2125_v3  ;;  %v2188_v8 = vunpack.c.l.s8.bf16 %v2128_v7 }
 0x474   :  { %2210 = vmatpush1.bf16.msra.mxu1 %v2145_v19  ;;  %v2084_v19 = vrot.slane %v1458_v53, %v3047_v17  ;;  %v2127_v53 = vld [vmem:[#allocation14 + $0xd0] sm:$0xff] }
 0x475   :  { %2211 = vmatprep.subr.bf16.mxu1 %v2148_v20 }
 0x478   :  { %2212 = vmatpush1.bf16.msra.mxu1 %v2147_v22 }
 0x479   :  { %2213 = vmatprep.subr.bf16.mxu1 %v2150_v23 }
 0x47c   :  { %2214 = vmatpush1.bf16.msra.mxu1 %v2149_v25 }
 0x47d   :  { %2215 = vmatprep.subr.bf16.mxu1 %v2152_v26 }
 0x480   :  { %2216 = vmatpush1.bf16.msra.mxu1 %v2151_v28 }
 0x481   :  { %2217 = vmatprep.subr.bf16.mxu1 %v2154_v29 }
 0x484   :  { %2218 = vmatpush1.bf16.msra.mxu1 %v2153_v32 }
 0x485   :  { %2219 = vmatprep.subr.bf16.mxu1 %v2156_v33 }
 0x488   :  { %2220 = vmatpush1.bf16.msra.mxu1 %v2155_v35  ;;  %v2117_v35 = vld [vmem:[#allocation14 + $0x80] sm:$0xff] }
 0x489   :  { %2221 = vmatprep.subr.bf16.mxu1 %v2158_v36 }
 0x48c   :  { %2222 = vmatpush1.bf16.msra.mxu1 %v2157_v39  ;;  %v2167_v39 = vunpack.c.l.s8.bf16 %v2117_v35 }
 0x48d   :  { %2223 = vmatprep.subr.bf16.mxu1 %v2160_v40 }
 0x490   :  { %2224 = vmatpush1.bf16.msra.mxu1 %v2159_v41 }
 0x491   :  { %2225 = vmatprep.subr.bf16.mxu1 %v2162_v31  ;;  %v2120_v31 = vld [vmem:[#allocation14 + $0x98] sm:$0xff] }
 0x492   :  { %v2172_v45 = vunpack.c.l.s8.bf16 %v2120_v31 }
 0x494   :  { %2226 = vmatpush1.bf16.msra.mxu1 %v2161_v44  ;;  %v2169_v44 = vunpack.c.h.s8.bf16 %v2117_v35  ;;  %v2134_v35 = vld [vmem:[%s3197_s15] sm:$0x3] }
 0x495   :  { %2227 = vmatprep.subr.bf16.mxu1 %v2164_v46  ;;  %v2119_v46 = vld [vmem:[#allocation14 + $0x90] sm:$0xff] }
 0x496   :  { %v2171_v47 = vunpack.c.l.s8.bf16 %v2119_v46 }
 0x498   :  { %2228 = vmatpush1.bf16.msra.mxu1 %v2163_v48  ;;  %v2174_v48 = vunpack.c.h.s8.bf16 %v2120_v31 }
 0x499   :  { %2229 = vmatprep.subr.bf16.mxu1 %v2166_v49  ;;  %v2122_v49 = vld [vmem:[#allocation14 + $0xa8] sm:$0xff] }
 0x49a   :  { %v2178_v56 = vunpack.c.h.s8.bf16 %v2122_v49 }
 0x49c   :  { %2230 = vmatpush1.bf16.msra.mxu1 %v2165_v42  ;;  %v2173_v42 = vunpack.c.h.s8.bf16 %v2119_v46 }
 0x49d   :  { %2240 = vmatprep.subr.bf16.mxu1 %v2168_v51  ;;  %v2176_v51 = vunpack.c.l.s8.bf16 %v2122_v49 }
 0x532   :  { %v1872_v14 = vpop.f32.mrb[12].mxu1  ;;  %v2036_v15 = vpop.f32.mrb[16].mxu0 }
 0x533   :  { %v2064_v20 = vmul.f32 %v2047_v9, %v1872_v14  ;;  %v2066_v21 = vmul.f32 %v2055_v10, %v2036_v15  ;;  %v1874_v22 = vpop.f32.mrb[13].mxu1  ;;  %v2038_v23 = vpop.f32.mrb[17].mxu0  ;;  %v2187_v9 = vunpack.c.l.s8.bf16 %v2127_v53  ;;  %v2190_v10 = vunpack.c.h.s8.bf16 %v2128_v7 }
 0x534   :  { %v2065_v24 = vmul.f32 %v2051_v11, %v1874_v22  ;;  %v2067_v25 = vmul.f32 %v2059_v12, %v2038_v23  ;;  %v1876_v26 = vpop.f32.mrb[14].mxu1  ;;  %v2040_v27 = vpop.f32.mrb[18].mxu0  ;;  %v2130_v11 = vld [vmem:[#allocation14 + $0xe8] sm:$0xff]  ;;  %v2189_v12 = vunpack.c.h.s8.bf16 %v2127_v53 }
 0x535   :  { %v2089_v28 = vadd.f32 %v2072_v13, %v2064_v20  ;;  %v3149_v29 = vadd.f32 %v2080_v60, %v2066_v21  ;;  %v1877_v30 = vpop.f32.mrb[15].mxu1  ;;  %v2041_v32 = vpop.f32.mrb[19].mxu0  ;;  %v2192_v13 = vunpack.c.l.s8.bf16 %v2130_v11  ;;  %v2129_v60 = vld [vmem:[#allocation14 + $0xe0] sm:$0xff]  ;;  %v2194_v15 = vunpack.c.h.s8.bf16 %v2130_v11  ;;  %v2131_v21 = vld [vmem:[#allocation14 + $0xf0] sm:$0xff] }
 0x536   :  { %v2090_v16 = vadd.f32 %v2076_v18, %v2065_v24  ;;  %v2092_v33 = vadd.f32 %v2084_v19, %v2067_v25  ;;  %v2191_v14 = vunpack.c.l.s8.bf16 %v2129_v60  ;;  %v2132_v18 = vld [vmem:[#allocation14 + $0xf8] sm:$0xff]  ;;  %v2193_v19 = vunpack.c.h.s8.bf16 %v2129_v60 }
 0x537   :  { %v2093_v58 = vmax.f32 %v2089_v28, 0.0  ;;  %v2196_v20 = vunpack.c.l.s8.bf16 %v2132_v18  ;;  %v2195_v22 = vunpack.c.l.s8.bf16 %v2131_v21  ;;  %v2198_v23 = vunpack.c.h.s8.bf16 %v2132_v18  ;;  %v2318_v28 = vld [vmem:[#allocation16 + $0x38] sm:$0xff] }
 0x538   :  { %v2094_v36 = vmax.f32 %v2090_v16, 0.0  ;;  %v2096_v37 = vmax.f32 %v2092_v33, 0.0  ;;  %v2197_v24 = vunpack.c.h.s8.bf16 %v2131_v21  ;;  %v2095_v25 = vmax.f32 %v3149_v29, 0.0  ;;  %v2314_v32 = vld [vmem:[#allocation16 + $0x18] sm:$0xff]  ;;  %v2133_v29 = vld [vmem:[%s3196_s14] sm:$0x3] }
 0x539   :  { %v2097_v40 = vpack.c.bf16 %v2093_v58, %v2093_v58  ;;  %v2326_v27 = vunpack.c.h.s8.bf16 %v3132_v6  ;;  %v2335_v30 = vunpack.c.l.s8.bf16 %v2318_v28  ;;  %v2327_v16 = vunpack.c.l.s8.bf16 %v2314_v32 }
 0x53a   :  { %v2098_v17 = vpack.c.bf16 %v2094_v36, %v2094_v36  ;;  %v2100_v41 = vpack.c.bf16 %v2096_v37, %v2096_v37  ;;  %v2099_v26 = vpack.c.bf16 %v2095_v25, %v2095_v25  ;;  %v2336_v33 = vunpack.c.h.s8.bf16 %v2318_v28 }
 0x53b   :  { %2434 = vmatpush3.bf16.msra.mxu0 %v2326_v27  ;;  %v2328_v58 = vunpack.c.h.s8.bf16 %v2314_v32  ;;  %v2285_v6 = vrot.slane %v2133_v29, %v2999_v34  ;;  %v2289_v36 = vrot.slane %v2133_v29, %v3005_v38  ;;  %v2298_v37 = vrot.slane %v2134_v35, %v2999_v34  ;;  %v2421_v34 = vld [vmem:[%s3199_s17] ss:$0 sm:$0xff]  ;;  %s2764_s17 = smov [#allocation17]  }
 0x53c   :  { %2231 = vmatprep.mubr.bf16.mxu1 %v2098_v17  ;;  %2435 = vmatprep.subr.bf16.mxu0 %v2335_v30  ;;  %s2407_s13 = sshll.u32 %s2764_s17, 4  ;;  %s2408_s13 = int_to_ptr.vmem [resolvable:$true] %s2407_s13 }
 0x53d   :  { %2232 = vmatmul.mubr.bf16.vlgmr.msra.gmra.mrb[16].mxu1 %v2097_v40  ;;  %s2712_s30 = scalar_lea.vmem %s2408_s13, 128  ;;  %p2717_p3 = scmp.lt.s32.totalorder %s2408_s13, %s2408_s13 }
 0x53e   :  { %2241 = vmatpush1.bf16.msra.mxu1 %v2167_v39  ;;  %2272 = vmatprep.mubr.bf16.mxu1 %v2100_v41  ;;  %v2302_v39 = vrot.slane %v2134_v35, %v3005_v38  ;;  %p2713_p2 = scmp.ne.s32.totalorder %s2408_s13, %s2712_s30  ;;  %p2718_p4 = scmp.lt.s32.totalorder %s2712_s30, %s2712_s30 }
 0x53f   :  { %2242 = vmatprep.subr.bf16.mxu1 %v2170_v43  ;;  %2436 = vmatpush3.bf16.msra.mxu0 %v2327_v16 }
 0x540   :  { %2437 = vmatprep.subr.bf16.mxu0 %v2336_v33  ;;  %p2719_p5 = por %p2718_p4, %p2717_p3 }
 0x542   :  { %2243 = vmatpush1.bf16.msra.mxu1 %v2169_v44  ;;  %p2720_p6 = pnand %p2719_p5, %p2713_p2 }
 0x543   :  { %2244 = vmatprep.subr.bf16.mxu1 %v2172_v45  ;;  %2438 = vmatpush3.bf16.msra.mxu0 %v2328_v58 }
 0x546   :  { %2245 = vmatpush1.bf16.msra.mxu1 %v2171_v47 }
 0x547   :  { %2246 = vmatprep.subr.bf16.mxu1 %v2174_v48 }
 0x54a   :  { %2247 = vmatpush1.bf16.msra.mxu1 %v2173_v42 }
 0x54b   :  { %2248 = vmatprep.subr.bf16.mxu1 %v2176_v51 }
 0x54e   :  { %2249 = vmatpush1.bf16.msra.mxu1 %v2175_v54 }
 0x54f   :  { %2250 = vmatprep.subr.bf16.mxu1 %v2178_v56 }
 0x552   :  { %2251 = vmatpush1.bf16.msra.mxu1 %v2177_v62 }
 0x553   :  { %2252 = vmatprep.subr.bf16.mxu1 %v2180_v55 }
 0x556   :  { %2253 = vmatpush1.bf16.msra.mxu1 %v2179_v0 }
 0x557   :  { %2254 = vmatprep.subr.bf16.mxu1 %v2182_v63 }
 0x55a   :  { %2255 = vmatpush1.bf16.msra.mxu1 %v2181_v2 }
 0x55b   :  { %2256 = vmatprep.subr.bf16.mxu1 %v2184_v61 }
 0x55e   :  { %2257 = vmatpush1.bf16.msra.mxu1 %v2183_v4 }
 0x55f   :  { %2258 = vmatprep.subr.bf16.mxu1 %v2186_v5 }
 0x562   :  { %2259 = vmatpush1.bf16.msra.mxu1 %v2185_v57 }
 0x563   :  { %2260 = vmatprep.subr.bf16.mxu1 %v2188_v8 }
 0x566   :  { %2261 = vmatpush1.bf16.msra.mxu1 %v2187_v9 }
 0x567   :  { %2262 = vmatprep.subr.bf16.mxu1 %v2190_v10 }
 0x56a   :  { %2263 = vmatpush1.bf16.msra.mxu1 %v2189_v12 }
 0x56b   :  { %2264 = vmatprep.subr.bf16.mxu1 %v2192_v13 }
 0x56e   :  { %2265 = vmatpush1.bf16.msra.mxu1 %v2191_v14 }
 0x56f   :  { %2266 = vmatprep.subr.bf16.mxu1 %v2194_v15 }
 0x572   :  { %2267 = vmatpush1.bf16.msra.mxu1 %v2193_v19 }
 0x573   :  { %2268 = vmatprep.subr.bf16.mxu1 %v2196_v20 }
 0x576   :  { %2269 = vmatpush1.bf16.msra.mxu1 %v2195_v22 }
 0x577   :  { %2270 = vmatprep.subr.bf16.mxu1 %v2198_v23 }
 0x57a   :  { %2271 = vmatpush1.bf16.msra.mxu1 %v2197_v24 }
 0x57d   :  { %2273 = vmatmul.mubr.bf16.vlgmr.msra.gmra.mrb[16].mxu1 %v2099_v26 }
 0x650   :  { %v2274_v17 = vpop.f32.mrb[16].mxu1 }
 0x651   :  { %v2292_v40 = vmul.f32 %v2285_v6, %v2274_v17  ;;  %v2276_v43 = vpop.f32.mrb[17].mxu1 }
 0x652   :  { %v2293_v41 = vmul.f32 %v2289_v36, %v2276_v43  ;;  %v2278_v31 = vpop.f32.mrb[18].mxu1 }
 0x653   :  { %v2305_v44 = vadd.f32 %v2298_v37, %v2292_v40  ;;  %v2279_v45 = vpop.f32.mrb[19].mxu1 }
 0x654   :  { %v2306_v46 = vadd.f32 %v2302_v39, %v2293_v41 }
 0x655   :  { %v2307_v47 = vmax.f32 %v2305_v44, 0.0 }
 0x656   :  { %v2308_v48 = vmax.f32 %v2306_v46, 0.0 }
 0x657   :  { %v2309_v42 = vpack.c.bf16 %v2307_v47, %v2307_v47 }
 0x658   :  { %v2310_v49 = vpack.c.bf16 %v2308_v48, %v2308_v48 }
 0x65a   :  { %2369 = vmatprep.mubr.bf16.mxu0 %v2310_v49 }
 0x65b   :  { %2370 = vmatmul.mubr.bf16.vlgmr.msra.gmra.mrb[20].mxu0 %v2309_v42 }
 0x72e   :  { %v2439_v51 = vpop.f32.mrb[20].mxu0 }
 0x72f   :  { %v2440_v50 = vpop.f32.mrb[21].mxu0 }
 0x730   :  { %v2441_v38 = vadd.f32 %v2440_v50, %v2439_v51  ;;  %v2442_v54 = vpop.f32.mrb[22].mxu0 }
 0x731   :  { %v2443_v56 = vpop.f32.mrb[23].mxu0 }
 0x732   :  { %v2383_v62 = vmul.f32 %v2441_v38, %v2421_v34 }
 0x734   :  { %v2390_v55 = vadd.f32 %v2422_v59, %v2383_v62 }
 0x736   :  { %2391 = vmax.xlane.f32.xlu0 %v2390_v55 }
 0x7c3   :  { %v2392_v52 = vpop.xlane.xlu0 %2391 }
 0x7c4   :  { %v2393_v0 = vsub.f32 %v2390_v55, %v2392_v52 }
 0x7c6   :  { %v2394_v63 = vmul.f32 1.442695, %v2393_v0 }
 0x7c8   :  { %2508 = vpow2.f32 %v2394_v63 }
 0x7d2   :  { %v2509_v1 = vpop.eup %2508 }
 0x7d3   :  { %2396 = vadd.xlane.f32.xlu0 %v2509_v1 }
 0x860   :  { %v2397_v2 = vpop.xlane.xlu0 %2396 }
 0x861   :  { %2510 = vrcp.f32 %v2397_v2 }
 0x86b   :  { %v2511_v61 = vpop.eup %2510 }
 0x86c   :  { %v2399_v3 = vmul.f32 %v2511_v61, %v2509_v1 }
 0x86e   :  { %2400 = vst [vmem:[#allocation17] sm:$0xff] %v2399_v3 }
 0x86f   :  { %2723 = shalt.err (!%p2720_p6)
}
 0x870   :  { %s2724_s16 = scalar_lea.hbm %s3201_s19, 128 }
 0x871   :  { %p2725_p7 = scmp.ne.s32.totalorder %s3201_s19, %s2724_s16  ;;  %p2728_p8 = scmp.lt.u32.totalorder %s2724_s16, %s3201_s19 }
 0x873   :  { %p2730_p9 = pnand %p2728_p8, %p2725_p7 }
 0x875   :  { %2733 = shalt.err (!%p2730_p9)
}
 0x876   :  { %2410 = dma.vmem_to_hbm [thread:$0]  %s2408_s13, 128, %s3201_s19, [#allocation4]  }
 0x877   :  { %2744 = dma.done.wait [#allocation4], 128  }
 0x878   :  { %2745 = vsyncadd [#allocation4], 4294967168 }
 0x879   :  { %2414 = vsyncpa [#allocation3], 1 }
 0x87a   :  { %2415 = vsyncpa [#allocation6], 1 }
 0x87b   :  { %2416 = vsyncpa [#allocation9], 1 }
 0x87c   :  { %2417 = vsyncpa [#allocation12], 1 }
 0x87d   :  { %2418 = vsyncpa [#allocation15], 1 }
 0x87e   :  { %2419 = vsyncpa [#allocation4], 1 }

</bundles_post_ra>
